<compile_context>
chip_gen: v5e
topology: v5e:2x2
jax: 0.10.0
libtpu: 0.0.40
codegen_flags: <defaults>
</compile_context>

<pallas_src>
import functools

import numpy as np
import jax
import jax.numpy as jnp
from jax.experimental import pallas as pl
from jax.experimental.pallas import tpu as pltpu


def _round_up(x, m):
    return ((x + m - 1) // m) * m


def _vmem_budget(frac=0.8, fallback=64 * 2**20):
    """~80% of physical VMEM (51 MiB on v7x, ~102 MiB on v5e/v6e)."""
    try:
        cap = int(pltpu.get_tpu_info().vmem_capacity_bytes)
    except Exception:
        cap = fallback
    return int(cap * frac)


def _pick_tk(d_pad, tk_max):
    """Largest tk <= tk_max that is a multiple of 128 AND divides d_pad exactly."""
    n128 = d_pad // 128
    best = 128
    for m in range(1, n128 + 1):
        if n128 % m == 0 and m * 128 <= tk_max:
            best = m * 128
    return best


# ----------------------------------------------------------------------------
# Pallas kernel: (optionally K-tiled) MLP head + fused cls/reg + argmax/score +
#                per-class delta gather + box decode, one lane-dense output slab.
# ----------------------------------------------------------------------------
def fastrcnn_head_kernel(x_ref, w1_ref, b1_ref, w2_ref, b2_ref,
                         wcr_ref, bcr_ref, rois_ref,
                         out_ref, acc_ref, *, num_classes):
    k = pl.program_id(1)

    @pl.when(k == 0)
    def _():
        acc_ref[...] = jnp.zeros_like(acc_ref)

    # First matmul (bf16 inputs, f32 accumulation).  When w1 is VMEM-resident the
    # grid's K extent is 1 and this runs exactly once per R tile.
    acc_ref[...] += jnp.dot(x_ref[...], w1_ref[...],
                            preferred_element_type=jnp.float32)

    @pl.when(k == pl.num_programs(1) - 1)
    def _():
        C = num_classes
        C5 = 5 * C
        CO = out_ref.shape[1]

        # hidden_unit: (Linear -> ReLU) x 2; elementwise kept in f32.
        h1 = jnp.maximum(acc_ref[...] + b1_ref[...], 0.0)
        h2 = jnp.dot(h1.astype(w2_ref.dtype), w2_ref[...],
                     preferred_element_type=jnp.float32) + b2_ref[...]
        h2 = jnp.maximum(h2, 0.0)

        # Fused cls + reg heads, lane-padded to CO (pad columns are exactly zero).
        clsreg = jnp.dot(h2.astype(wcr_ref.dtype), wcr_ref[...],
                         preferred_element_type=jnp.float32) + bcr_ref[...]

        cls_logits = clsreg[:, :C]          # argmax restricted to real classes only
        reg = clsreg[:, C:C5]

        # argmax / max-softmax straight from logits (softmax is monotone):
        #   preds  = argmax(logits)  (first index on ties, like torch .max())
        #   scores = softmax(logits)[preds] = 1 / sum(exp(logits - max))
        m = jnp.max(cls_logits, axis=-1, keepdims=True)
        ids = jax.lax.broadcasted_iota(jnp.int32, cls_logits.shape, 1)
        preds = jnp.min(jnp.where(cls_logits >= m, ids, C),
                        axis=-1, keepdims=True)
        denom = jnp.sum(jnp.exp(cls_logits - m), axis=-1, keepdims=True)
        scores = 1.0 / denom                # exact divide (tiny epilogue; no tie drift)

        # Per-class delta gather: reg column pred*4 + {0,1,2,3}; one compare base.
        col = jax.lax.broadcasted_iota(jnp.int32, reg.shape, 1)
        rel = col - preds * 4

        def sel(j):
            return jnp.sum(jnp.where(rel == j, reg, 0.0), axis=-1, keepdims=True)

        dx, dy, dw, dh = sel(0), sel(1), sel(2), sel(3)

        # offsets2boxes (standard Faster-RCNN decode); clamp dw/dh (torchvision's
        # log(1000/16)) so exp stays finite for wild regression outputs.
        bbox_xform_clip = 4.135166556742356
        dw = jnp.minimum(dw, bbox_xform_clip)
        dh = jnp.minimum(dh, bbox_xform_clip)

        rois = rois_ref[...]
        rx1 = rois[:, 0:1]
        ry1 = rois[:, 1:2]
        rx2 = rois[:, 2:3]
        ry2 = rois[:, 3:4]
        w = rx2 - rx1
        h = ry2 - ry1
        cx = rx1 + 0.5 * w
        cy = ry1 + 0.5 * h
        pcx = dx * w + cx
        pcy = dy * h + cy
        pw = jnp.exp(dw) * w
        ph = jnp.exp(dh) * h

        # Single lane-dense slab: [cls|reg logits (C5), x1, y1, x2, y2, score, pred, 0...]
        tail = CO - C5 - 6
        pieces = [clsreg[:, :C5],
                  pcx - 0.5 * pw, pcy - 0.5 * ph, pcx + 0.5 * pw, pcy + 0.5 * ph,
                  scores, preds.astype(jnp.float32)]
        if tail > 0:
            pieces.append(jnp.zeros((clsreg.shape[0], tail), jnp.float32))
        out_ref[...] = jnp.concatenate(pieces, axis=-1)


# ----------------------------------------------------------------------------
# One-time weight preparation (hoisted out of the per-call path).
# ----------------------------------------------------------------------------
def prepare_head_params(params, num_classes):
    D, H = params["w1"].shape
    C = num_classes
    C5 = 5 * C
    d_pad = _round_up(D, 128)
    H_pad = _round_up(H, 128)          # zero-padded hidden dims contribute nothing
    CO = _round_up(C5 + 6, 128)        # cls|reg lanes + 6 packed fields, lane-dense

    w1 = jnp.pad(params["w1"], ((0, d_pad - D), (0, H_pad - H))).astype(jnp.bfloat16)
    b1 = jnp.pad(params["b1"], ((0, 0), (0, H_pad - H))).astype(jnp.float32)
    w2 = jnp.pad(params["w2"], ((0, H_pad - H), (0, H_pad - H))).astype(jnp.bfloat16)
    b2 = jnp.pad(params["b2"], ((0, 0), (0, H_pad - H))).astype(jnp.float32)

    wcr = jnp.concatenate([params["wc"], params["wr"]], axis=1)       # (H, 5C)
    bcr = jnp.concatenate([params["bc"], params["br"]], axis=1)       # (1, 5C)
    wcr = jnp.pad(wcr, ((0, H_pad - H), (0, CO - C5))).astype(jnp.bfloat16)
    bcr = jnp.pad(bcr, ((0, 0), (0, CO - C5))).astype(jnp.float32)

    return dict(w1=w1, b1=b1, w2=w2, b2=b2, wcr=wcr, bcr=bcr,
                D=D, H=H, C=C, C5=C5, CO=CO, d_pad=d_pad, H_pad=H_pad)


# ----------------------------------------------------------------------------
# Head wrapper: tiling decisions + pallas_call + output slicing.
# ----------------------------------------------------------------------------
def head_pallas(x, prep, rois, *, tr_default=256, tk_max=2048):
    R, D = x.shape
    C, C5, CO = prep["C"], prep["C5"], prep["CO"]
    d_pad, H_pad = prep["d_pad"], prep["H_pad"]

    # ---- R tiling: 256 fills the 256-wide MXUs (v6e/v7x); keep >=2 R tiles when
    #      possible so the "parallel" axis can shard across v7x's 2 TensorCores.
    tr = min(tr_default, max(128, _round_up(R, 128)))
    if R > 128 and pl.cdiv(R, tr) < 2 and pl.cdiv(R, 128) >= 2:
        tr = 128
    r_pad = _round_up(R, tr)
    nr = r_pad // tr

    budget = _vmem_budget()

    def _vmem_bytes(tk, nk):
        w1_bufs = 1 if nk == 1 else 2
        return (w1_bufs * tk * H_pad * 2                    # w1 (bf16)
                + H_pad * H_pad * 2 + H_pad * CO * 2        # resident w2 / wcr (bf16)
                + (2 * H_pad + CO) * 4                      # biases (f32)
                + 2 * tr * tk * 2                           # x tiles (bf16, dbl-buf)
                + 2 * tr * 4 * 4                            # rois tiles
                + 2 * tr * CO * 4                           # output tiles
                + tr * H_pad * 4)                           # f32 accumulator scratch

    headroom = 2 * 2**20
    if _vmem_bytes(d_pad, 1) + headroom <= budget:
        tk, nk = d_pad, 1                  # w1 fully VMEM-resident (the common case)
    else:
        tk = _pick_tk(d_pad, tk_max)       # streamed fallback: tk divides d_pad
        nk = d_pad // tk

    # ---- per-call input prep (x is already bf16 from the RoI-align output) ----
    xf = jnp.pad(x, ((0, r_pad - R), (0, d_pad - D)))
    rois_p = jnp.pad(rois.astype(jnp.float32), ((0, r_pad - R), (0, 0)))

    const = dict(pipeline_mode=pl.Buffered(1))   # never re-indexed -> single buffer
    if nk == 1:
        w1_spec = pl.BlockSpec((tk, H_pad), lambda i, k: (0, 0), **const)
    else:
        w1_spec = pl.BlockSpec((tk, H_pad), lambda i, k: (k, 0))

    kernel = functools.partial(fastrcnn_head_kernel, num_classes=C)

    out = pl.pallas_call(
        kernel,
        out_shape=jax.ShapeDtypeStruct((r_pad, CO), jnp.float32),
        grid_spec=pltpu.PrefetchScalarGridSpec(
            num_scalar_prefetch=0,
            grid=(nr, nk),
            in_specs=[
                pl.BlockSpec((tr, tk), lambda i, k: (i, k)),               # x (streamed)
                w1_spec,                                                   # w1
                pl.BlockSpec((1, H_pad), lambda i, k: (0, 0), **const),    # b1
                pl.BlockSpec((H_pad, H_pad), lambda i, k: (0, 0), **const),# w2
                pl.BlockSpec((1, H_pad), lambda i, k: (0, 0), **const),    # b2
                pl.BlockSpec((H_pad, CO), lambda i, k: (0, 0), **const),   # wcr
                pl.BlockSpec((1, CO), lambda i, k: (0, 0), **const),       # bcr
                pl.BlockSpec((tr, 4), lambda i, k: (i, 0)),                # rois (streamed)
            ],
            out_specs=pl.BlockSpec((tr, CO), lambda i, k: (i, 0)),         # one lane-dense slab
            scratch_shapes=[pltpu.VMEM((tr, H_pad), jnp.float32)]),
        compiler_params=pltpu.CompilerParams(
            dimension_semantics=("parallel", "arbitrary"),
            vmem_limit_bytes=int(budget)),
    )(xf, prep["w1"], prep["b1"], prep["w2"], prep["b2"],
      prep["wcr"], prep["bcr"], rois_p)

    out = out[:R]
    cls_logits = out[:, :C]
    reg_flat = out[:, C:C5]
    boxes = out[:, C5:C5 + 4]
    scores = out[:, C5 + 4:C5 + 5]
    preds = out[:, C5 + 5:C5 + 6].astype(jnp.int32)
    return cls_logits, reg_flat, scores, preds, boxes


# ----------------------------------------------------------------------------
# MultiScaleRoIAlign (plain-JAX glue: data-dependent bilinear gather)
# TODO(synk): computes all FPN levels for every RoI and masks the rest; replace
#             with a per-level/scalar-prefetch gather kernel for production sizes.
# ----------------------------------------------------------------------------
def roi_align_level(fmap, rois, batch_ids, scale, P, sr):
    # fmap: (B, C, Hf, Wf) NCHW, rois: (R, 4) image coords
    _, _, Hf, Wf = fmap.shape
    R = rois.shape[0]
    x1 = rois[:, 0] * scale
    y1 = rois[:, 1] * scale
    x2 = rois[:, 2] * scale
    y2 = rois[:, 3] * scale
    roi_w = jnp.maximum(x2 - x1, 1.0)
    roi_h = jnp.maximum(y2 - y1, 1.0)
    bin_w = roi_w / P
    bin_h = roi_h / P

    grid = jnp.arange(P)[:, None] + (jnp.arange(sr)[None, :] + 0.5) / sr      # (P, sr)
    ys = y1[:, None, None] + grid[None] * bin_h[:, None, None]                # (R, P, sr)
    xs = x1[:, None, None] + grid[None] * bin_w[:, None, None]

    Y = jnp.broadcast_to(ys[:, :, :, None, None], (R, P, sr, P, sr))
    X = jnp.broadcast_to(xs[:, None, None, :, :], (R, P, sr, P, sr))
    valid = (Y > -1.0) & (Y < Hf) & (X > -1.0) & (X < Wf)
    y = jnp.clip(Y, 0.0, Hf - 1)
    x = jnp.clip(X, 0.0, Wf - 1)
    y0 = jnp.floor(y).astype(jnp.int32)
    x0 = jnp.floor(x).astype(jnp.int32)
    y1i = jnp.minimum(y0 + 1, Hf - 1)
    x1i = jnp.minimum(x0 + 1, Wf - 1)
    ly = y - y0
    lx = x - x0
    hy = 1.0 - ly
    hx = 1.0 - lx

    b = jnp.broadcast_to(batch_ids[:, None, None, None, None], Y.shape)
    v00 = fmap[b, :, y0, x0]     # (R, P, sr, P, sr, C)
    v01 = fmap[b, :, y0, x1i]
    v10 = fmap[b, :, y1i, x0]
    v11 = fmap[b, :, y1i, x1i]
    val = ((hy * hx)[..., None] * v00 + (hy * lx)[..., None] * v01 +
           (ly * hx)[..., None] * v10 + (ly * lx)[..., None] * v11)
    val = jnp.where(valid[..., None], val, 0.0)
    pooled = val.mean(axis=(2, 4))                       # (R, P, P, C)
    return jnp.transpose(pooled, (0, 3, 1, 2))           # (R, C, P, P)


def multiscale_roi_align(fmap_list, rois_list, img_dims, output_size=7, sampling_ratio=2):
    all_rois = jnp.concatenate(rois_list, axis=0)
    batch_ids = jnp.concatenate(
        [jnp.full((r.shape[0],), i, jnp.int32) for i, r in enumerate(rois_list)], axis=0)
    img_h = float(img_dims[0][0])

    scales = []
    for fmap in fmap_list:
        approx = fmap.shape[2] / img_h
        scales.append(2.0 ** round(float(np.log2(approx))))
    k_min = int(-np.log2(scales[0]))
    k_max = int(-np.log2(scales[-1]))

    areas = (all_rois[:, 2] - all_rois[:, 0]) * (all_rois[:, 3] - all_rois[:, 1])
    k = jnp.floor(4.0 + jnp.log2(jnp.sqrt(areas) / 224.0 + 1e-6))
    lvl = jnp.clip(k, k_min, k_max).astype(jnp.int32) - k_min

    pooled = None
    for li, (fmap, scale) in enumerate(zip(fmap_list, scales)):
        p_l = roi_align_level(fmap, all_rois, batch_ids, scale,
                              output_size, sampling_ratio)
        sel = (lvl == li)[:, None, None, None]
        pooled = jnp.where(sel, p_l, 0.0) if pooled is None else pooled + jnp.where(sel, p_l, 0.0)
    # Emit bf16 directly so the head's pad/cast doesn't add an extra fp32 pass.
    return pooled.astype(jnp.bfloat16), all_rois


# ----------------------------------------------------------------------------
# Host-side post-processing (dynamic shapes: fg/conf filter, class-aware NMS, topk)
# ----------------------------------------------------------------------------
def _nms_np(boxes, scores, iou_thr):
    order = np.argsort(-scores)
    keep = []
    areas = (boxes[:, 2] - boxes[:, 0]).clip(min=0) * (boxes[:, 3] - boxes[:, 1]).clip(min=0)
    while order.size > 0:
        i = order[0]
        keep.append(i)
        if order.size == 1:
            break
        rest = order[1:]
        xx1 = np.maximum(boxes[i, 0], boxes[rest, 0])
        yy1 = np.maximum(boxes[i, 1], boxes[rest, 1])
        xx2 = np.minimum(boxes[i, 2], boxes[rest, 2])
        yy2 = np.minimum(boxes[i, 3], boxes[rest, 3])
        inter = np.maximum(0.0, xx2 - xx1) * np.maximum(0.0, yy2 - yy1)
        iou = inter / np.maximum(areas[i] + areas[rest] - inter, 1e-9)
        order = rest[iou <= iou_thr]
    return np.asarray(keep, dtype=np.int64)


def _batched_nms_np(boxes, scores, classes, iou_thr):
    if boxes.shape[0] == 0:
        return np.zeros((0,), dtype=np.int64)
    max_coord = boxes.max() + 1.0
    offsets = classes.astype(boxes.dtype) * max_coord
    shifted = boxes + offsets[:, None]
    return _nms_np(shifted, scores, iou_thr)


def host_post_process(scores, preds, boxes, roi_counts,
                      conf_threshold=0.05, nms_threshold=0.5, keep_top_n=100):
    scores = np.asarray(jax.device_get(scores))[:, 0]
    preds = np.asarray(jax.device_get(preds))[:, 0]
    boxes = np.asarray(jax.device_get(boxes))
    dets = []
    cur = 0
    for n in roi_counts:
        s, p, b = scores[cur:cur + n], preds[cur:cur + n], boxes[cur:cur + n]
        cur += n
        fg = p != 0
        s, p, b = s[fg], p[fg], b[fg]
        keep = s >= conf_threshold
        s, p, b = s[keep], p[keep], b[keep]
        if s.size == 0:
            dets.append(np.zeros((0, 6), dtype=np.float32))
            continue
        keep = _batched_nms_np(b, s, p, nms_threshold)
        s, p, b = s[keep], p[keep], b[keep]
        k = min(keep_top_n, s.size)
        order = np.argsort(-s)[:k]
        s, p, b = s[order], p[order], b[order]
        dets.append(np.concatenate([b, s[:, None], p[:, None].astype(b.dtype)], axis=-1))
    return dets


# ----------------------------------------------------------------------------
# Parameter init + full forward
# ----------------------------------------------------------------------------
def init_params(key, features, num_classes, roi_output_size=7, hidden_channels=1024):
    D = roi_output_size * roi_output_size * features
    ks = jax.random.split(key, 4)

    def lin(k, fin, fout, scale):
        kw, kb = jax.random.split(k)
        W = jax.random.normal(kw, (fin, fout), jnp.float32) * scale
        b = jax.random.normal(kb, (1, fout), jnp.float32) * 0.01
        return W, b

    w1, b1 = lin(ks[0], D, hidden_channels, 1.0 / np.sqrt(D))
    w2, b2 = lin(ks[1], hidden_channels, hidden_channels, 1.0 / np.sqrt(hidden_channels))
    wc, bc = lin(ks[2], hidden_channels, num_classes, 1.0 / np.sqrt(hidden_channels))
    wr, br = lin(ks[3], hidden_channels, num_classes * 4, 0.01)
    return dict(w1=w1, b1=b1, w2=w2, b2=b2, wc=wc, bc=bc, wr=wr, br=br)


def fastrcnn_multihead_forward(prep, fmaps, rois_list, img_dims,
                               num_classes, roi_output_size=7):
    # 1) RoI pooling over the FPN levels  (plain-JAX glue, gather-heavy)
    pooled, all_rois = multiscale_roi_align(list(fmaps.values()), rois_list, img_dims,
                                            output_size=roi_output_size, sampling_ratio=2)
    R = pooled.shape[0]
    x = pooled.reshape(R, -1)        # flatten(start_dim=1), PyTorch NCHW order (bf16)

    # 2) Fused, gridded Pallas head (matmuls + argmax/score + class-gather + decode)
    cls_logits, reg_flat, scores, preds, boxes = head_pallas(x, prep, all_rois)
    reg_deltas = reg_flat.reshape(R, num_classes, 4)

    # 3) Dynamic-shape post-processing on host
    roi_counts = [int(r.shape[0]) for r in rois_list]
    batched_dets = host_post_process(scores, preds, boxes, roi_counts,
                                     conf_threshold=0.05, nms_threshold=0.5, keep_top_n=100)
    return batched_dets, (cls_logits, reg_deltas)


# ----------------------------------------------------------------------------
if __name__ == "__main__":
    key = jax.random.PRNGKey(0)
    B = 2                 # images
    features = 4          # channels of each feature map
    num_classes = 5
    roi_output_size = 7
    hidden_channels = 32
    img_h, img_w = 64, 64
    rois_per_image = 8

    k_param, k_feat, k_roi = jax.random.split(key, 3)
    params = init_params(k_param, features, num_classes, roi_output_size, hidden_channels)

    # Weight prep is hoisted: pad/cast/concat exactly once, reused every forward.
    prep = prepare_head_params(params, num_classes)

    # FPN-style feature maps at strides 4, 8, 16, 32  (NCHW)
    fkeys = jax.random.split(k_feat, 4)
    fmaps = {
        "0": jax.random.normal(fkeys[0], (B, features, 16, 16), jnp.float32),
        "1": jax.random.normal(fkeys[1], (B, features, 8, 8), jnp.float32),
        "2": jax.random.normal(fkeys[2], (B, features, 4, 4), jnp.float32),
        "3": jax.random.normal(fkeys[3], (B, features, 2, 2), jnp.float32),
    }

    # Random proposals per image in image coordinates (x1, y1, x2, y2)
    rkeys = jax.random.split(k_roi, B)
    rois_list = []
    for bi in range(B):
        kx, ky, kw, kh = jax.random.split(rkeys[bi], 4)
        x1 = jax.random.uniform(kx, (rois_per_image,), minval=0.0, maxval=40.0)
        y1 = jax.random.uniform(ky, (rois_per_image,), minval=0.0, maxval=40.0)
        w = jax.random.uniform(kw, (rois_per_image,), minval=8.0, maxval=40.0)
        h = jax.random.uniform(kh, (rois_per_image,), minval=8.0, maxval=40.0)
        x2 = jnp.minimum(x1 + w, float(img_w))
        y2 = jnp.minimum(y1 + h, float(img_h))
        rois_list.append(jnp.stack([x1, y1, x2, y2], axis=-1))

    img_dims = [(img_h, img_w)] * B

    batched_dets, (cls_logits, reg_deltas) = fastrcnn_multihead_forward(
        prep, fmaps, rois_list, img_dims, num_classes, roi_output_size)

    jax.block_until_ready(cls_logits)
    jax.block_until_ready(reg_deltas)
    assert cls_logits.shape == (B * rois_per_image, num_classes)
    assert reg_deltas.shape == (B * rois_per_image, num_classes, 4)
    assert len(batched_dets) == B
    for d in batched_dets:
        assert d.ndim == 2 and d.shape[1] == 6
    assert bool(jnp.all(jnp.isfinite(cls_logits)))
    assert bool(jnp.all(jnp.isfinite(reg_deltas)))

    print("KERNEL_OK")
</pallas_src>

<mosaic_0001>
module attributes {stable_mosaic.version = 11 : i64} {
  func.func @fastrcnn_head_kernel(%arg0: i32, %arg1: i32, %arg2: memref<128x256xbf16, #tpu.memory_space<vmem>>, %arg3: memref<256x128xbf16, #tpu.memory_space<vmem>>, %arg4: memref<1x128xf32, #tpu.memory_space<vmem>>, %arg5: memref<128x128xbf16, #tpu.memory_space<vmem>>, %arg6: memref<1x128xf32, #tpu.memory_space<vmem>>, %arg7: memref<128x128xbf16, #tpu.memory_space<vmem>>, %arg8: memref<1x128xf32, #tpu.memory_space<vmem>>, %arg9: memref<128x4xf32, #tpu.memory_space<vmem>>, %arg10: memref<128x128xf32, #tpu.memory_space<vmem>>, %arg11: memref<128x128xf32, #tpu.memory_space<vmem>>) attributes {dimension_semantics = [#tpu.dimension_semantics<parallel>, #tpu.dimension_semantics<arbitrary>], iteration_bounds = array<i64: 1, 1>, scalar_prefetch = 0 : i64, scratch_operands = 1 : i64, tpu.core_type = #tpu.core_type<tc>, window_params = [{transform_indices = @transform_0, window_bounds = array<i64: 128, 256>}, {pipeline_mode = #tpu.pipeline_mode<synchronous>, transform_indices = @transform_1, window_bounds = array<i64: 256, 128>}, {pipeline_mode = #tpu.pipeline_mode<synchronous>, transform_indices = @transform_2, window_bounds = array<i64: 1, 128>}, {pipeline_mode = #tpu.pipeline_mode<synchronous>, transform_indices = @transform_3, window_bounds = array<i64: 128, 128>}, {pipeline_mode = #tpu.pipeline_mode<synchronous>, transform_indices = @transform_4, window_bounds = array<i64: 1, 128>}, {pipeline_mode = #tpu.pipeline_mode<synchronous>, transform_indices = @transform_5, window_bounds = array<i64: 128, 128>}, {pipeline_mode = #tpu.pipeline_mode<synchronous>, transform_indices = @transform_6, window_bounds = array<i64: 1, 128>}, {transform_indices = @transform_7, window_bounds = array<i64: 128, 4>}, {transform_indices = @transform_8, window_bounds = array<i64: 128, 128>}]} {
    %c0_i32 = arith.constant 0 : i32
    %0 = arith.cmpi eq, %arg1, %c0_i32 : i32
    %1 = arith.extui %0 : i1 to i32
    %c0_i32_0 = arith.constant 0 : i32
    %2 = arith.cmpi ne, %1, %c0_i32_0 : i32
    scf.if %2 {
      %cst_10 = arith.constant 0.000000e+00 : f32
      %12 = vector.broadcast %cst_10 : f32 to vector<128x128xf32>
      %c0_11 = arith.constant 0 : index
      %c0_12 = arith.constant 0 : index
      %13 = vector.load %arg11[%c0_11, %c0_12] : memref<128x128xf32, #tpu.memory_space<vmem>>, vector<128x128xf32>
      tpu.vector_store %arg11[%c0_11, %c0_12], %12 {strides = array<i32>} : memref<128x128xf32, #tpu.memory_space<vmem>>, vector<128x128xf32>,
    } else {
    }
    %c0 = arith.constant 0 : index
    %c0_1 = arith.constant 0 : index
    %3 = vector.load %arg11[%c0, %c0_1] : memref<128x128xf32, #tpu.memory_space<vmem>>, vector<128x128xf32>
    %c0_2 = arith.constant 0 : index
    %c0_3 = arith.constant 0 : index
    %4 = vector.load %arg2[%c0_2, %c0_3] : memref<128x256xbf16, #tpu.memory_space<vmem>>, vector<128x256xbf16>
    %c0_4 = arith.constant 0 : index
    %c0_5 = arith.constant 0 : index
    %5 = vector.load %arg3[%c0_4, %c0_5] : memref<256x128xbf16, #tpu.memory_space<vmem>>, vector<256x128xbf16>
    %cst = arith.constant dense<0.000000e+00> : vector<128x128xf32>
    %6 = tpu.matmul %4, %5, %cst {dimension_numbers = #tpu.dot_dimension_numbers<[1], [0], [0], [1], [0, 0, 1, 1], [], []>} : vector<128x256xbf16>, vector<256x128xbf16>, vector<128x128xf32> -> vector<128x128xf32>
    %7 = arith.addf %3, %6 : vector<128x128xf32>
    %c0_6 = arith.constant 0 : index
    %c0_7 = arith.constant 0 : index
    %8 = vector.load %arg11[%c0_6, %c0_7] : memref<128x128xf32, #tpu.memory_space<vmem>>, vector<128x128xf32>
    tpu.vector_store %arg11[%c0_6, %c0_7], %7 {strides = array<i32>} : memref<128x128xf32, #tpu.memory_space<vmem>>, vector<128x128xf32>,
    %c0_i32_8 = arith.constant 0 : i32
    %9 = arith.cmpi eq, %arg1, %c0_i32_8 : i32
    %10 = arith.extui %9 : i1 to i32
    %c0_i32_9 = arith.constant 0 : i32
    %11 = arith.cmpi ne, %10, %c0_i32_9 : i32
    scf.if %11 {
      %c0_10 = arith.constant 0 : index
      %c0_11 = arith.constant 0 : index
      %12 = vector.load %arg11[%c0_10, %c0_11] : memref<128x128xf32, #tpu.memory_space<vmem>>, vector<128x128xf32>
      %c0_12 = arith.constant 0 : index
      %c0_13 = arith.constant 0 : index
      %13 = vector.load %arg4[%c0_12, %c0_13] : memref<1x128xf32, #tpu.memory_space<vmem>>, vector<1x128xf32>
      %14 = vector.broadcast %13 : vector<1x128xf32> to vector<128x128xf32>
      %15 = arith.addf %12, %14 : vector<128x128xf32>
      %cst_14 = arith.constant 0.000000e+00 : f32
      %16 = vector.broadcast %cst_14 : f32 to vector<128x128xf32>
      %17 = arith.maximumf %15, %16 : vector<128x128xf32>
      %18 = arith.truncf %17 : vector<128x128xf32> to vector<128x128xbf16>
      %c0_15 = arith.constant 0 : index
      %c0_16 = arith.constant 0 : index
      %19 = vector.load %arg5[%c0_15, %c0_16] : memref<128x128xbf16, #tpu.memory_space<vmem>>, vector<128x128xbf16>
      %cst_17 = arith.constant dense<0.000000e+00> : vector<128x128xf32>
      %20 = tpu.matmul %18, %19, %cst_17 {dimension_numbers = #tpu.dot_dimension_numbers<[1], [0], [0], [1], [0, 0, 1, 1], [], []>} : vector<128x128xbf16>, vector<128x128xbf16>, vector<128x128xf32> -> vector<128x128xf32>
      %c0_18 = arith.constant 0 : index
      %c0_19 = arith.constant 0 : index
      %21 = vector.load %arg6[%c0_18, %c0_19] : memref<1x128xf32, #tpu.memory_space<vmem>>, vector<1x128xf32>
      %22 = vector.broadcast %21 : vector<1x128xf32> to vector<128x128xf32>
      %23 = arith.addf %20, %22 : vector<128x128xf32>
      %cst_20 = arith.constant 0.000000e+00 : f32
      %24 = vector.broadcast %cst_20 : f32 to vector<128x128xf32>
      %25 = arith.maximumf %23, %24 : vector<128x128xf32>
      %26 = arith.truncf %25 : vector<128x128xf32> to vector<128x128xbf16>
      %c0_21 = arith.constant 0 : index
      %c0_22 = arith.constant 0 : index
      %27 = vector.load %arg7[%c0_21, %c0_22] : memref<128x128xbf16, #tpu.memory_space<vmem>>, vector<128x128xbf16>
      %cst_23 = arith.constant dense<0.000000e+00> : vector<128x128xf32>
      %28 = tpu.matmul %26, %27, %cst_23 {dimension_numbers = #tpu.dot_dimension_numbers<[1], [0], [0], [1], [0, 0, 1, 1], [], []>} : vector<128x128xbf16>, vector<128x128xbf16>, vector<128x128xf32> -> vector<128x128xf32>
      %c0_24 = arith.constant 0 : index
      %c0_25 = arith.constant 0 : index
      %29 = vector.load %arg8[%c0_24, %c0_25] : memref<1x128xf32, #tpu.memory_space<vmem>>, vector<1x128xf32>
      %30 = vector.broadcast %29 : vector<1x128xf32> to vector<128x128xf32>
      %31 = arith.addf %28, %30 : vector<128x128xf32>
      %32 = vector.extract_strided_slice %31 {offsets = [0, 0], sizes = [128, 5], strides = [1, 1]} : vector<128x128xf32> to vector<128x5xf32>
      %33 = vector.extract_strided_slice %31 {offsets = [0, 5], sizes = [128, 20], strides = [1, 1]} : vector<128x128xf32> to vector<128x20xf32>
      %cst_26 = arith.constant dense<0xFF800000> : vector<128xf32>
      %34 = vector.multi_reduction <maximumf>, %32, %cst_26 [1] : vector<128x5xf32> to vector<128xf32>
      %35 = vector.shape_cast %34 : vector<128xf32> to vector<128x1xf32>
      %36 = tpu.iota {dimensions = array<i32: 1>} : vector<128x5xi32>
      %37 = vector.broadcast %35 : vector<128x1xf32> to vector<128x5xf32>
      %38 = arith.cmpf oge, %32, %37 : vector<128x5xf32>
      %c5_i32 = arith.constant 5 : i32
      %39 = vector.broadcast %c5_i32 : i32 to vector<128x5xi32>
      %40 = arith.select %38, %36, %39 : vector<128x5xi1>, vector<128x5xi32>
      %cst_27 = arith.constant dense<2147483647> : vector<128xi32>
      %41 = vector.multi_reduction <minsi>, %40, %cst_27 [1] : vector<128x5xi32> to vector<128xi32>
      %42 = vector.shape_cast %41 : vector<128xi32> to vector<128x1xi32>
      %43 = vector.broadcast %35 : vector<128x1xf32> to vector<128x5xf32>
      %44 = arith.subf %32, %43 : vector<128x5xf32>
      %45 = math.exp %44 : vector<128x5xf32>
      %cst_28 = arith.constant dense<0.000000e+00> : vector<128xf32>
      %46 = vector.multi_reduction <add>, %45, %cst_28 [1] : vector<128x5xf32> to vector<128xf32>
      %47 = vector.shape_cast %46 : vector<128xf32> to vector<128x1xf32>
      %cst_29 = arith.constant 1.000000e+00 : f32
      %48 = vector.broadcast %cst_29 : f32 to vector<128x1xf32>
      %49 = arith.divf %48, %47 : vector<128x1xf32>
      %50 = tpu.iota {dimensions = array<i32: 1>} : vector<128x20xi32>
      %c4_i32 = arith.constant 4 : i32
      %51 = vector.broadcast %c4_i32 : i32 to vector<128x1xi32>
      %52 = arith.muli %42, %51 : vector<128x1xi32>
      %53 = vector.broadcast %52 : vector<128x1xi32> to vector<128x20xi32>
      %54 = arith.subi %50, %53 : vector<128x20xi32>
      %c0_i32_30 = arith.constant 0 : i32
      %55 = vector.broadcast %c0_i32_30 : i32 to vector<128x20xi32>
      %56 = arith.cmpi eq, %54, %55 : vector<128x20xi32>
      %cst_31 = arith.constant 0.000000e+00 : f32
      %57 = vector.broadcast %cst_31 : f32 to vector<128x20xf32>
      %58 = arith.select %56, %33, %57 : vector<128x20xi1>, vector<128x20xf32>
      %cst_32 = arith.constant dense<0.000000e+00> : vector<128xf32>
      %59 = vector.multi_reduction <add>, %58, %cst_32 [1] : vector<128x20xf32> to vector<128xf32>
      %60 = vector.shape_cast %59 : vector<128xf32> to vector<128x1xf32>
      %c1_i32 = arith.constant 1 : i32
      %61 = vector.broadcast %c1_i32 : i32 to vector<128x20xi32>
      %62 = arith.cmpi eq, %54, %61 : vector<128x20xi32>
      %cst_33 = arith.constant 0.000000e+00 : f32
      %63 = vector.broadcast %cst_33 : f32 to vector<128x20xf32>
      %64 = arith.select %62, %33, %63 : vector<128x20xi1>, vector<128x20xf32>
      %cst_34 = arith.constant dense<0.000000e+00> : vector<128xf32>
      %65 = vector.multi_reduction <add>, %64, %cst_34 [1] : vector<128x20xf32> to vector<128xf32>
      %66 = vector.shape_cast %65 : vector<128xf32> to vector<128x1xf32>
      %c2_i32 = arith.constant 2 : i32
      %67 = vector.broadcast %c2_i32 : i32 to vector<128x20xi32>
      %68 = arith.cmpi eq, %54, %67 : vector<128x20xi32>
      %cst_35 = arith.constant 0.000000e+00 : f32
      %69 = vector.broadcast %cst_35 : f32 to vector<128x20xf32>
      %70 = arith.select %68, %33, %69 : vector<128x20xi1>, vector<128x20xf32>
      %cst_36 = arith.constant dense<0.000000e+00> : vector<128xf32>
      %71 = vector.multi_reduction <add>, %70, %cst_36 [1] : vector<128x20xf32> to vector<128xf32>
      %72 = vector.shape_cast %71 : vector<128xf32> to vector<128x1xf32>
      %c3_i32 = arith.constant 3 : i32
      %73 = vector.broadcast %c3_i32 : i32 to vector<128x20xi32>
      %74 = arith.cmpi eq, %54, %73 : vector<128x20xi32>
      %cst_37 = arith.constant 0.000000e+00 : f32
      %75 = vector.broadcast %cst_37 : f32 to vector<128x20xf32>
      %76 = arith.select %74, %33, %75 : vector<128x20xi1>, vector<128x20xf32>
      %cst_38 = arith.constant dense<0.000000e+00> : vector<128xf32>
      %77 = vector.multi_reduction <add>, %76, %cst_38 [1] : vector<128x20xf32> to vector<128xf32>
      %78 = vector.shape_cast %77 : vector<128xf32> to vector<128x1xf32>
      %cst_39 = arith.constant 4.13516665 : f32
      %79 = vector.broadcast %cst_39 : f32 to vector<128x1xf32>
      %80 = arith.minimumf %72, %79 : vector<128x1xf32>
      %cst_40 = arith.constant 4.13516665 : f32
      %81 = vector.broadcast %cst_40 : f32 to vector<128x1xf32>
      %82 = arith.minimumf %78, %81 : vector<128x1xf32>
      %c0_41 = arith.constant 0 : index
      %c0_42 = arith.constant 0 : index
      %83 = vector.load %arg9[%c0_41, %c0_42] : memref<128x4xf32, #tpu.memory_space<vmem>>, vector<128x4xf32>
      %84 = vector.extract_strided_slice %83 {offsets = [0, 0], sizes = [128, 1], strides = [1, 1]} : vector<128x4xf32> to vector<128x1xf32>
      %85 = vector.extract_strided_slice %83 {offsets = [0, 1], sizes = [128, 1], strides = [1, 1]} : vector<128x4xf32> to vector<128x1xf32>
      %86 = vector.extract_strided_slice %83 {offsets = [0, 2], sizes = [128, 1], strides = [1, 1]} : vector<128x4xf32> to vector<128x1xf32>
      %87 = vector.extract_strided_slice %83 {offsets = [0, 3], sizes = [128, 1], strides = [1, 1]} : vector<128x4xf32> to vector<128x1xf32>
      %88 = arith.subf %86, %84 : vector<128x1xf32>
      %89 = arith.subf %87, %85 : vector<128x1xf32>
      %cst_43 = arith.constant 5.000000e-01 : f32
      %90 = vector.broadcast %cst_43 : f32 to vector<128x1xf32>
      %91 = arith.mulf %90, %88 : vector<128x1xf32>
      %92 = arith.addf %84, %91 : vector<128x1xf32>
      %cst_44 = arith.constant 5.000000e-01 : f32
      %93 = vector.broadcast %cst_44 : f32 to vector<128x1xf32>
      %94 = arith.mulf %93, %89 : vector<128x1xf32>
      %95 = arith.addf %85, %94 : vector<128x1xf32>
      %96 = arith.mulf %60, %88 : vector<128x1xf32>
      %97 = arith.addf %96, %92 : vector<128x1xf32>
      %98 = arith.mulf %66, %89 : vector<128x1xf32>
      %99 = arith.addf %98, %95 : vector<128x1xf32>
      %100 = math.exp %80 : vector<128x1xf32>
      %101 = arith.mulf %100, %88 : vector<128x1xf32>
      %102 = math.exp %82 : vector<128x1xf32>
      %103 = arith.mulf %102, %89 : vector<128x1xf32>
      %104 = vector.extract_strided_slice %31 {offsets = [0, 0], sizes = [128, 25], strides = [1, 1]} : vector<128x128xf32> to vector<128x25xf32>
      %cst_45 = arith.constant 5.000000e-01 : f32
      %105 = vector.broadcast %cst_45 : f32 to vector<128x1xf32>
      %106 = arith.mulf %105, %101 : vector<128x1xf32>
      %107 = arith.subf %97, %106 : vector<128x1xf32>
      %cst_46 = arith.constant 5.000000e-01 : f32
      %108 = vector.broadcast %cst_46 : f32 to vector<128x1xf32>
      %109 = arith.mulf %108, %103 : vector<128x1xf32>
      %110 = arith.subf %99, %109 : vector<128x1xf32>
      %cst_47 = arith.constant 5.000000e-01 : f32
      %111 = vector.broadcast %cst_47 : f32 to vector<128x1xf32>
      %112 = arith.mulf %111, %101 : vector<128x1xf32>
      %113 = arith.addf %97, %112 : vector<128x1xf32>
      %cst_48 = arith.constant 5.000000e-01 : f32
      %114 = vector.broadcast %cst_48 : f32 to vector<128x1xf32>
      %115 = arith.mulf %114, %103 : vector<128x1xf32>
      %116 = arith.addf %99, %115 : vector<128x1xf32>
      %117 = arith.sitofp %42 : vector<128x1xi32> to vector<128x1xf32>
      %cst_49 = arith.constant 0.000000e+00 : f32
      %118 = vector.broadcast %cst_49 : f32 to vector<128x97xf32>
      %119 = tpu.concatenate %104, %107, %110, %113, %116, %49, %117, %118 in 1 : vector<128x25xf32>, vector<128x1xf32>, vector<128x1xf32>, vector<128x1xf32>, vector<128x1xf32>, vector<128x1xf32>, vector<128x1xf32>, vector<128x97xf32> -> vector<128x128xf32>
      %c0_50 = arith.constant 0 : index
      %c0_51 = arith.constant 0 : index
      %120 = vector.load %arg10[%c0_50, %c0_51] : memref<128x128xf32, #tpu.memory_space<vmem>>, vector<128x128xf32>
      tpu.vector_store %arg10[%c0_50, %c0_51], %119 {strides = array<i32>} : memref<128x128xf32, #tpu.memory_space<vmem>>, vector<128x128xf32>,
    } else {
    }
    return
  }
  func.func @transform_0(%arg0: i32, %arg1: i32) -> (i32, i32) {
    %c0_i32 = arith.constant 0 : i32
    return %arg0, %arg1 : i32, i32
  }
  func.func @transform_1(%arg0: i32, %arg1: i32) -> (i32, i32) {
    %c0_i32 = arith.constant 0 : i32
    %c0_i32_0 = arith.constant 0 : i32
    %c0_i32_1 = arith.constant 0 : i32
    return %c0_i32, %c0_i32_0 : i32, i32
  }
  func.func @transform_2(%arg0: i32, %arg1: i32) -> (i32, i32) {
    %c0_i32 = arith.constant 0 : i32
    %c0_i32_0 = arith.constant 0 : i32
    %c0_i32_1 = arith.constant 0 : i32
    return %c0_i32, %c0_i32_0 : i32, i32
  }
  func.func @transform_3(%arg0: i32, %arg1: i32) -> (i32, i32) {
    %c0_i32 = arith.constant 0 : i32
    %c0_i32_0 = arith.constant 0 : i32
    %c0_i32_1 = arith.constant 0 : i32
    return %c0_i32, %c0_i32_0 : i32, i32
  }
  func.func @transform_4(%arg0: i32, %arg1: i32) -> (i32, i32) {
    %c0_i32 = arith.constant 0 : i32
    %c0_i32_0 = arith.constant 0 : i32
    %c0_i32_1 = arith.constant 0 : i32
    return %c0_i32, %c0_i32_0 : i32, i32
  }
  func.func @transform_5(%arg0: i32, %arg1: i32) -> (i32, i32) {
    %c0_i32 = arith.constant 0 : i32
    %c0_i32_0 = arith.constant 0 : i32
    %c0_i32_1 = arith.constant 0 : i32
    return %c0_i32, %c0_i32_0 : i32, i32
  }
  func.func @transform_6(%arg0: i32, %arg1: i32) -> (i32, i32) {
    %c0_i32 = arith.constant 0 : i32
    %c0_i32_0 = arith.constant 0 : i32
    %c0_i32_1 = arith.constant 0 : i32
    return %c0_i32, %c0_i32_0 : i32, i32
  }
  func.func @transform_7(%arg0: i32, %arg1: i32) -> (i32, i32) {
    %c0_i32 = arith.constant 0 : i32
    %c0_i32_0 = arith.constant 0 : i32
    return %arg0, %c0_i32 : i32, i32
  }
  func.func @transform_8(%arg0: i32, %arg1: i32) -> (i32, i32) {
    %c0_i32 = arith.constant 0 : i32
    %c0_i32_0 = arith.constant 0 : i32
    return %arg0, %c0_i32 : i32, i32
  }
}

</mosaic_0001>

<bundles_post_ra>
// kernel: tpu_custom_call.1
= control target key start
LH: loop header
LB: loop body
LE: loop exit
PB: predicated region body
PF: predicated region fallthrough
CT: control target
= control target key end

     0   :  { %13 = vsyncpa [#allocation4], 0  ;;  %s5254_s0 = inlined_call_operand.vmem [shape: bf16[128,256], index: 0, kind: input, shape index: {}]   ;;  %s5255_s1 = inlined_call_operand.hbm [shape: bf16[256,128], index: 1, kind: input, shape index: {}]   ;;  %s5256_s2 = inlined_call_operand.vmem [shape: f32[1,128], index: 2, kind: input, shape index: {}]   ;;  %s5257_s3 = inlined_call_operand.hbm [shape: bf16[128,128], index: 3, kind: input, shape index: {}]   ;;  %s5258_s4 = inlined_call_operand.vmem [shape: f32[1,128], index: 4, kind: input, shape index: {}]   ;;  %s5259_s5 = inlined_call_operand.hbm [shape: bf16[128,128], index: 5, kind: input, shape index: {}]   ;;  %s5260_s6 = inlined_call_operand.vmem [shape: f32[1,128], index: 6, kind: input, shape index: {}]   ;;  %s5261_s7 = inlined_call_operand.vmem [shape: f32[128,4], index: 7, kind: input, shape index: {}]   ;;  %s5262_s8 = inlined_call_operand.hbm [shape: f32[128,128], index: 8, kind: output, shape index: {}]  }
   0x1   :  { %14 = vsyncpa [#allocation7], 0 }
   0x2   :  { %15 = vsyncpa [#allocation5], 0  ;;  %s37_s29 = sshll.u32 %s5257_s3, 4  ;;  %s3321_s30 = smov [#allocation6]   ;;  %s38_s29 = int_to_ptr.hbm [resolvable:$true] %s37_s29 }
   0x3   :  { %s39_s9 = sshll.u32 %s3321_s30, 4  ;;  %s22_s12 = sshll.u32 %s5255_s1, 4  ;;  %s40_s9 = int_to_ptr.vmem [resolvable:$true] %s39_s9  ;;  %s23_s12 = int_to_ptr.hbm [resolvable:$true] %s22_s12 }
   0x4   :  { %s3322_s13 = smov 64   ;;  %s3323_s14 = smov 4  }
   0x5   :  { %45 = dma.hbm_to_vmem [thread:$0]  %s38_s29, 1024, %s40_s9, [#allocation7], %s3322_s13, %s3322_s13, %s3323_s14  }
   0x6   :  { %s3324_s15 = smov [#allocation3]   ;;  %s52_s19 = sshll.u32 %s5259_s5, 4  ;;  %s53_s19 = int_to_ptr.hbm [resolvable:$true] %s52_s19 }
   0x7   :  { %s24_s16 = sshll.u32 %s3324_s15, 4  ;;  %s3325_s3 = smov [#allocation8]   ;;  %s25_s16 = int_to_ptr.vmem [resolvable:$true] %s24_s16 }
   0x8   :  { %30 = dma.hbm_to_vmem [thread:$0]  %s23_s12, 2048, %s25_s16, [#allocation4], %s3322_s13, %s3322_s13, %s3323_s14  }
   0x9   :  { %s54_s20 = sshll.u32 %s3325_s3, 4  ;;  %s55_s20 = int_to_ptr.vmem [resolvable:$true] %s54_s20 }
   0xa   :  { %60 = dma.hbm_to_vmem [thread:$0]  %s53_s19, 1024, %s55_s20, [#allocation7], %s3322_s13, %s3322_s13, %s3323_s14  }
   0xb   :  { %3315 = dma.done.wait [#allocation4], 2048  }
   0xc   :  { %3316 = vsyncadd [#allocation4], 4294965248 }
   0xd   :  { %3317 = dma.done.wait [#allocation7], 2048  }
   0xe   :  { %3318 = vsyncadd [#allocation7], 4294965248  ;;  %v3050_v0 = vld [vmem:[#allocation3 + $0x38] sm:$0xff]  ;;  %v3049_v2 = vld [vmem:[#allocation3 + $0x30] sm:$0xff]  ;;  %s3326_s14 = smov 2   ;;  %vm788_vm0 = vcmask 39936  }
   0xf   :  { %v3058_v1 = vld [vmem:[#allocation3 + $0x78] sm:$0xff]  ;;  %337 = vmatpush.bf16.msra.mxu0 %v3050_v0  ;;  %v3057_v3 = vld [vmem:[#allocation3 + $0x70] sm:$0xff]  ;;  %v3048_v4 = vld [vmem:[#allocation3 + $0x28] sm:$0xff]  ;;  %s3330_s5 = smov 23   ;;  %s3331_s21 = smov [#allocation9]  }
  0x10   :  { %386 = vmatpush.bf16.msra.mxu1 %v3058_v1  ;;  %v3056_v5 = vld [vmem:[#allocation3 + $0x68] sm:$0xff]  ;;  %v3047_v6 = vld [vmem:[#allocation3 + $0x20] sm:$0xff]  ;;  %v3046_v8 = vld [vmem:[#allocation3 + $0x18] sm:$0xff]  ;;  %s2819_s22 = sshll.u32 %s3331_s21, 4  ;;  %s2821_s25 = sshll.u32 %s5262_s8, 4  ;;  %s2820_s22 = int_to_ptr.vmem [resolvable:$true] %s2819_s22  ;;  %s2822_s25 = int_to_ptr.hbm [resolvable:$true] %s2821_s25 }
  0x11   :  { %v3055_v7 = vld [vmem:[#allocation3 + $0x60] sm:$0xff]  ;;  %v3054_v9 = vld [vmem:[#allocation3 + $0x58] sm:$0xff]  ;;  %v3045_v10 = vld [vmem:[#allocation3 + $0x10] sm:$0xff]  ;;  %s3332_s26 = smov 128   ;;  %s3333_s8 = smov 8  }
  0x12   :  { %v3053_v11 = vld [vmem:[#allocation3 + $0x50] sm:$0xff]  ;;  %v3044_v12 = vld [vmem:[#allocation3 + $0x8] sm:$0xff]  ;;  %v3043_v14 = vld [vmem:[#allocation3] sm:$0xff] }
  0x13   :  { %338 = vmatpush.bf16.msra.mxu0 %v3049_v2  ;;  %v3052_v13 = vld [vmem:[#allocation3 + $0x48] sm:$0xff]  ;;  %v3051_v15 = vld [vmem:[#allocation3 + $0x40] sm:$0xff]  ;;  %v2845_v22 = vld [vmem:[%s5254_s0 + $0x10] sm:$0xf] }
  0x14   :  { %387 = vmatpush.bf16.msra.mxu1 %v3057_v3  ;;  %v2837_v16 = vld [vmem:[%s5254_s0] sm:$0xf]  ;;  %v3028_v17 = vld [vmem:[%s5254_s0 + $0x4] sm:$0xf0]  ;;  %v3027_v18 = vld [vmem:[%s5254_s0 + $0x4] sm:$0xf] }
  0x15   :  { %v2839_v19 = vld [vmem:[%s5254_s0 + $0x8] sm:$0xf0]  ;;  %v2838_v20 = vor.u32 %v3028_v17, %v2837_v16  ;;  %v3030_v23 = vld [vmem:[%s5254_s0 + $0x14] sm:$0xf0]  ;;  %v3029_v24 = vld [vmem:[%s5254_s0 + $0x14] sm:$0xf] }
  0x16   :  { %v2842_v21 = vor.u32 %v3027_v18, %v2839_v19  ;;  %v2847_v25 = vld [vmem:[%s5254_s0 + $0x18] sm:$0xf0]  ;;  %v2846_v26 = vor.u32 %v3030_v23, %v2845_v22  ;;  %v2853_v28 = vld [vmem:[%s5254_s0 + $0x20] sm:$0xf]  ;;  %v3032_v29 = vld [vmem:[%s5254_s0 + $0x24] sm:$0xf0] }
  0x17   :  { %339 = vmatpush.bf16.msra.mxu0 %v3048_v4  ;;  %v2850_v27 = vor.u32 %v3029_v24, %v2847_v25  ;;  %v3031_v30 = vld [vmem:[%s5254_s0 + $0x24] sm:$0xf]  ;;  %v2855_v31 = vld [vmem:[%s5254_s0 + $0x28] sm:$0xf0]  ;;  %v2854_v32 = vor.u32 %v3032_v29, %v2853_v28  ;;  %v3066_v34 = vld [vmem:[#allocation6 + $0x38] sm:$0xff] }
  0x18   :  { %388 = vmatpush.bf16.msra.mxu1 %v3056_v5  ;;  %v2858_v33 = vor.u32 %v3031_v30, %v2855_v31  ;;  %598 = vmatpush.bf16.msra.mxu2 %v3066_v34  ;;  %v3065_v35 = vld [vmem:[#allocation6 + $0x30] sm:$0xff]  ;;  %v3064_v36 = vld [vmem:[#allocation6 + $0x28] sm:$0xff]  ;;  %v3034_v38 = vld [vmem:[%s5254_s0 + $0x34] sm:$0xf0] }
  0x19   :  { %v2861_v37 = vld [vmem:[%s5254_s0 + $0x30] sm:$0xf]  ;;  %v3033_v39 = vld [vmem:[%s5254_s0 + $0x34] sm:$0xf]  ;;  %v2863_v40 = vld [vmem:[%s5254_s0 + $0x38] sm:$0xf0] }
  0x1a   :  { %v3063_v41 = vld [vmem:[#allocation6 + $0x20] sm:$0xff]  ;;  %v2862_v42 = vor.u32 %v3034_v38, %v2861_v37  ;;  %v2866_v43 = vor.u32 %v3033_v39, %v2863_v40  ;;  %v3036_v45 = vld [vmem:[%s5254_s0 + $0x44] sm:$0xf0]  ;;  %v2871_v47 = vld [vmem:[%s5254_s0 + $0x48] sm:$0xf0] }
  0x1b   :  { %340 = vmatpush.bf16.msra.mxu0 %v3047_v6  ;;  %v2869_v44 = vld [vmem:[%s5254_s0 + $0x40] sm:$0xf]  ;;  %v3035_v46 = vld [vmem:[%s5254_s0 + $0x44] sm:$0xf]  ;;  %v3062_v50 = vld [vmem:[#allocation6 + $0x18] sm:$0xff] }
  0x1c   :  { %389 = vmatpush.bf16.msra.mxu1 %v3055_v7  ;;  %599 = vmatpush.bf16.msra.mxu2 %v3065_v35  ;;  %v2870_v48 = vor.u32 %v3036_v45, %v2869_v44  ;;  %v2874_v49 = vor.u32 %v3035_v46, %v2871_v47  ;;  %v3451_v51 = vld [vmem:[%s5261_s7] sm:$0xff]  ;;  %v3061_v52 = vld [vmem:[#allocation6 + $0x10] sm:$0xff]  ;;  %v3060_v53 = vld [vmem:[#allocation6 + $0x8] sm:$0xff] }
  0x1d   :  { %1928 = vrot.lane.b32.xlu0 %v3451_v51, %s3326_s14  ;;  %v3458_v54 = vld [vmem:[%s5261_s7 + $0x10] sm:$0xff]  ;;  %v3463_v55 = vld [vmem:[%s5261_s7 + $0x18] sm:$0xff]  ;;  %v3059_v56 = vld [vmem:[#allocation6] sm:$0xff] }
  0x1e   :  { %1932 = vrot.lane.b32.xlu1 %v3458_v54, %s3326_s14  ;;  %v3472_v57 = vld [vmem:[%s5261_s7 + $0x30] sm:$0xff]  ;;  %v3038_v59 = vld [vmem:[%s5254_s0 + $0x54] sm:$0xf0]  ;;  %v2879_v62 = vld [vmem:[%s5254_s0 + $0x58] sm:$0xf0] }
  0x1f   :  { %341 = vmatpush.bf16.msra.mxu0 %v3046_v8  ;;  %v2877_v58 = vld [vmem:[%s5254_s0 + $0x50] sm:$0xf]  ;;  %v3037_v60 = vld [vmem:[%s5254_s0 + $0x54] sm:$0xf]  ;;  %v3491_v0 = vld [vmem:[%s5261_s7 + $0x48] sm:$0xff] }
  0x20   :  { %390 = vmatpush.bf16.msra.mxu1 %v3054_v9  ;;  %600 = vmatpush.bf16.msra.mxu2 %v3064_v36  ;;  %v2878_v61 = vor.u32 %v3038_v59, %v2877_v58  ;;  %v2882_v63 = vor.u32 %v3037_v60, %v2879_v62  ;;  %v3498_v3 = vld [vmem:[%s5261_s7 + $0x60] sm:$0xff]  ;;  %v3505_v4 = vld [vmem:[%s5261_s7 + $0x28] sm:$0xff]  ;;  %v3572_v34 = vld [vmem:[%s5261_s7 + $0x70] sm:$0xff] }
  0x21   :  { %v3510_v6 = vld [vmem:[%s5256_s2] ss:$0 sm:$0xff]  ;;  %v3040_v24 = vld [vmem:[%s5254_s0 + $0x64] sm:$0xf0]  ;;  %v3039_v25 = vld [vmem:[%s5254_s0 + $0x64] sm:$0xf] }
  0x22   :  { %v2885_v23 = vld [vmem:[%s5254_s0 + $0x60] sm:$0xf]  ;;  %v3041_v44 = vld [vmem:[%s5254_s0 + $0x74] sm:$0xf]  ;;  %v2895_v45 = vld [vmem:[%s5254_s0 + $0x78] sm:$0xf0] }
  0x23   :  { %342 = vmatpush.bf16.msra.mxu0 %v3045_v10 }
  0x24   :  { %391 = vmatpush.bf16.msra.mxu1 %v3053_v11  ;;  %601 = vmatpush.bf16.msra.mxu2 %v3063_v41  ;;  %v3582_v41 = vld [vmem:[%s5261_s7 + $0x50] sm:$0xff] }
  0x25   :  { %1934 = vrot.lane.b32.xlu0 %v3463_v55, %s3326_s14 }
  0x26   :  { %1940 = vrot.lane.b32.xlu1 %v3472_v57, %s3326_s14 }
  0x27   :  { %343 = vmatpush.bf16.msra.mxu0 %v3044_v12  ;;  %v3519_v12 = vld [vmem:[%s5261_s7 + $0x78] sm:$0xff] }
  0x28   :  { %392 = vmatpush.bf16.msra.mxu1 %v3052_v13  ;;  %602 = vmatpush.bf16.msra.mxu2 %v3062_v50  ;;  %v3526_v13 = vld [vmem:[%s5261_s7 + $0x8] sm:$0xff] }
  0x29   :  { %1930 = vrot.lane.b32.xlu2 %v3526_v13, %s3326_s14 }
  0x2b   :  { %344 = vmatpush.bf16.msra.mxu0 %v3043_v14  ;;  %v3531_v14 = vld [vmem:[%s5261_s7 + $0x40] sm:$0xff] }
  0x2c   :  { %393 = vmatpush.bf16.msra.mxu1 %v3051_v15  ;;  %603 = vmatpush.bf16.msra.mxu2 %v3061_v52 }
  0x2d   :  { %1938 = vrot.lane.b32.xlu0 %v3505_v4, %s3326_s14 }
  0x2e   :  { %345 = vmatmul.bf16.vlgmr.msra.gmra.mxu0 %v2838_v20  ;;  %1946 = vrot.lane.b32.xlu1 %v3491_v0, %s3326_s14  ;;  %v3540_v20 = vld [vmem:[%s5261_s7 + $0x20] sm:$0xff] }
  0x2f   :  { %394 = vmatmul.bf16.vlgmr.msra.gmra.mxu1 %v2842_v21  ;;  %v3545_v21 = vld [vmem:[%s5261_s7 + $0x58] sm:$0xff] }
  0x30   :  { %604 = vmatpush.bf16.msra.mxu2 %v3060_v53 }
  0x31   :  { %1936 = vrot.lane.b32.xlu2 %v3540_v20, %s3326_s14 }
  0x34   :  { %605 = vmatpush.bf16.msra.mxu2 %v3059_v56  ;;  %v3602_v56 = vld [vmem:[%s5261_s7 + $0x68] sm:$0xff] }
  0x35   :  { %1944 = vrot.lane.b32.xlu0 %v3531_v14, %s3326_s14 }
  0x36   :  { %1952 = vrot.lane.b32.xlu1 %v3498_v3, %s3326_s14 }
  0x3d   :  { %1950 = vrot.lane.b32.xlu0 %v3545_v21, %s3326_s14 }
  0x3e   :  { %350 = vmatmul.bf16.gmra.mxu0 %v2846_v26  ;;  %1958 = vrot.lane.b32.xlu1 %v3519_v12, %s3326_s14  ;;  %v2887_v26 = vld [vmem:[%s5254_s0 + $0x68] sm:$0xf0] }
  0x3f   :  { %399 = vmatmul.bf16.gmra.mxu1 %v2850_v27  ;;  %v2886_v27 = vor.u32 %v3040_v24, %v2885_v23  ;;  %v2890_v28 = vor.u32 %v3039_v25, %v2887_v26  ;;  %v3073_v25 = vld [vmem:[#allocation8 + $0x30] sm:$0xff] }
  0x45   :  { %1956 = vrot.lane.b32.xlu0 %v3572_v34, %s3326_s14 }
  0x4e   :  { %355 = vmatmul.bf16.gmra.mxu0 %v2854_v32 }
  0x4f   :  { %404 = vmatmul.bf16.gmra.mxu1 %v2858_v33  ;;  %v3567_v33 = vld [vmem:[%s5261_s7 + $0x38] sm:$0xff] }
  0x50   :  { %1942 = vrot.lane.b32.xlu2 %v3567_v33, %s3326_s14 }
  0x58   :  { %1948 = vrot.lane.b32.xlu2 %v3582_v41, %s3326_s14 }
  0x5e   :  { %360 = vmatmul.bf16.gmra.mxu0 %v2862_v42  ;;  %v2893_v42 = vld [vmem:[%s5254_s0 + $0x70] sm:$0xf] }
  0x5f   :  { %409 = vmatmul.bf16.gmra.mxu1 %v2866_v43  ;;  %v3042_v43 = vld [vmem:[%s5254_s0 + $0x74] sm:$0xf0]  ;;  %s3327_s0 = smov 126  }
  0x60   :  { %v2894_v47 = vor.u32 %v3042_v43, %v2893_v42  ;;  %1954 = vrot.lane.b32.xlu2 %v3602_v56, %s3326_s14 }
  0x6e   :  { %365 = vmatmul.bf16.gmra.mxu0 %v2870_v48  ;;  %v2898_v48 = vor.u32 %v3041_v44, %v2895_v45 }
  0x6f   :  { %414 = vmatmul.bf16.gmra.mxu1 %v2874_v49 }
  0x7e   :  { %370 = vmatmul.bf16.gmra.mxu0 %v2878_v61 }
  0x7f   :  { %419 = vmatmul.bf16.gmra.mxu1 %v2882_v63 }
  0x8e   :  { %375 = vmatmul.bf16.gmra.mxu0 %v2886_v27 }
  0x8f   :  { %424 = vmatmul.bf16.gmra.mxu1 %v2890_v28 }
  0x9e   :  { %380 = vmatmul.bf16.gmra.mxu0 %v2894_v47  ;;  %v1931_v47 = vpop.permute.xlu2 %1930 }
  0x9f   :  { %429 = vmatmul.bf16.gmra.mxu1 %v2898_v48  ;;  %v3630_v48 = vsub.f32 %v3526_v13, %v1931_v47 }
  0xab   :  { %v346_v1 = vpop.f32.mrf.mxu0 }
  0xac   :  { %v395_v2 = vpop.f32.mrf.mxu1 }
  0xad   :  { %v396_v5 = vadd.f32 %v395_v2, %v346_v1 }
  0xaf   :  { %v490_v9 = vadd.f32 %v3510_v6, %v396_v5 }
  0xb1   :  { %v506_v15 = vmax.f32 %v490_v9, 0.0 }
  0xb3   :  { %v348_v7 = vpop.f32.mrf.mxu0 }
  0xb4   :  { %v397_v8 = vpop.f32.mrf.mxu1 }
  0xb5   :  { %v398_v10 = vadd.f32 %v397_v8, %v348_v7 }
  0xb7   :  { %v491_v11 = vadd.f32 %v3510_v6, %v398_v10 }
  0xb9   :  { %v507_v16 = vmax.f32 %v491_v11, 0.0 }
  0xbb   :  { %v522_v17 = vpack.c.bf16 %v507_v16, %v506_v15  ;;  %v351_v18 = vpop.f32.mrf.mxu0 }
  0xbc   :  { %v400_v19 = vpop.f32.mrf.mxu1 }
  0xbd   :  { %606 = vmatmul.bf16.vlgmr.msra.gmra.mxu2 %v522_v17  ;;  %v401_v22 = vadd.f32 %v400_v19, %v351_v18  ;;  %v3074_v19 = vld [vmem:[#allocation8 + $0x38] sm:$0xff] }
  0xbe   :  { %739 = vmatpush.bf16.msra.mxu3 %v3074_v19 }
  0xbf   :  { %v492_v31 = vadd.f32 %v3510_v6, %v401_v22 }
  0xc1   :  { %v508_v36 = vmax.f32 %v492_v31, 0.0 }
  0xc2   :  { %740 = vmatpush.bf16.msra.mxu3 %v3073_v25  ;;  %v3067_v25 = vld [vmem:[#allocation8] sm:$0xff] }
  0xc3   :  { %v353_v29 = vpop.f32.mrf.mxu0 }
  0xc4   :  { %v402_v30 = vpop.f32.mrf.mxu1 }
  0xc5   :  { %v403_v32 = vadd.f32 %v402_v30, %v353_v29  ;;  %v3072_v29 = vld [vmem:[#allocation8 + $0x28] sm:$0xff] }
  0xc6   :  { %741 = vmatpush.bf16.msra.mxu3 %v3072_v29 }
  0xc7   :  { %v493_v35 = vadd.f32 %v3510_v6, %v403_v32  ;;  %v3071_v32 = vld [vmem:[#allocation8 + $0x20] sm:$0xff] }
  0xc9   :  { %v509_v37 = vmax.f32 %v493_v35, 0.0  ;;  %v1929_v35 = vpop.permute.xlu0 %1928 }
  0xca   :  { %742 = vmatpush.bf16.msra.mxu3 %v3071_v32 }
  0xcb   :  { %v523_v38 = vpack.c.bf16 %v509_v37, %v508_v36  ;;  %v356_v39 = vpop.f32.mrf.mxu0  ;;  %v3612_v36 = vsub.f32 %v3451_v51, %v1929_v35 }
  0xcc   :  { %v405_v40 = vpop.f32.mrf.mxu1 }
  0xcd   :  { %611 = vmatmul.bf16.gmra.mxu2 %v523_v38  ;;  %v406_v46 = vadd.f32 %v405_v40, %v356_v39  ;;  %v1992_v37 = vmul.f32 0.5, %v3612_v36  ;;  %v1933_v38 = vpop.permute.xlu1 %1932 }
  0xce   :  { %v3617_v40 = vsub.f32 %v3458_v54, %v1933_v38 }
  0xcf   :  { %v494_v49 = vadd.f32 %v3510_v6, %v406_v46  ;;  %2024 = vrot.lane.b32.xlu2 %v1992_v37, %s3327_s0 }
  0xd0   :  { %5334 = vst [vmem:[#allocation13_spill] sm:$0xff] %v3617_v40  ;;  %v1994_v44 = vmul.f32 0.5, %v3617_v40 }
  0xd1   :  { %v510_v58 = vmax.f32 %v494_v49, 0.0  ;;  %v1935_v39 = vpop.permute.xlu0 %1934 }
  0xd2   :  { %v3620_v42 = vsub.f32 %v3463_v55, %v1935_v39  ;;  %2028 = vrot.lane.b32.xlu1 %v1994_v44, %s3327_s0 }
  0xd3   :  { %v358_v50 = vpop.f32.mrf.mxu0 }
  0xd4   :  { %v407_v52 = vpop.f32.mrf.mxu1  ;;  %5335 = vst [vmem:[#allocation14_spill] sm:$0xff] %v3620_v42  ;;  %v1995_v43 = vmul.f32 0.5, %v3620_v42 }
  0xd5   :  { %v408_v53 = vadd.f32 %v407_v52, %v358_v50  ;;  %v1941_v45 = vpop.permute.xlu1 %1940  ;;  %v1993_v50 = vmul.f32 0.5, %v3630_v48 }
  0xd6   :  { %v3627_v46 = vsub.f32 %v3472_v57, %v1941_v45 }
  0xd7   :  { %v495_v59 = vadd.f32 %v3510_v6, %v408_v53  ;;  %2030 = vrot.lane.b32.xlu2 %v1995_v43, %s3327_s0  ;;  %2026 = vrot.lane.b32.xlu0 %v1993_v50, %s3327_s0 }
  0xd8   :  { %5336 = vst [vmem:[#allocation15_spill] sm:$0xff] %v3627_v46  ;;  %v1998_v49 = vmul.f32 0.5, %v3627_v46 }
  0xd9   :  { %v511_v60 = vmax.f32 %v495_v59, 0.0 }
  0xdb   :  { %v524_v61 = vpack.c.bf16 %v511_v60, %v510_v58  ;;  %v361_v62 = vpop.f32.mrf.mxu0  ;;  %v1937_v58 = vpop.permute.xlu2 %1936 }
  0xdc   :  { %v410_v63 = vpop.f32.mrf.mxu1  ;;  %v3640_v59 = vsub.f32 %v3540_v20, %v1937_v58 }
  0xdd   :  { %616 = vmatmul.bf16.gmra.mxu2 %v524_v61  ;;  %v411_v1 = vadd.f32 %v410_v63, %v361_v62  ;;  %v1947_v52 = vpop.permute.xlu1 %1946  ;;  %v3070_v62 = vld [vmem:[#allocation8 + $0x18] sm:$0xff] }
  0xde   :  { %v3637_v53 = vsub.f32 %v3491_v0, %v1947_v52  ;;  %5338 = vst [vmem:[#allocation17_spill] sm:$0xff] %v3640_v59  ;;  %v1996_v61 = vmul.f32 0.5, %v3640_v59  ;;  %743 = vmatpush.bf16.msra.mxu3 %v3070_v62 }
  0xdf   :  { %v496_v2 = vadd.f32 %v3510_v6, %v411_v1  ;;  %2036 = vrot.lane.b32.xlu2 %v1998_v49, %s3327_s0 }
  0xe0   :  { %5337 = vst [vmem:[#allocation16_spill] sm:$0xff] %v3637_v53  ;;  %v2001_v60 = vmul.f32 0.5, %v3637_v53  ;;  %2032 = vrot.lane.b32.xlu0 %v1996_v61, %s3327_s0 }
  0xe1   :  { %v512_v9 = vmax.f32 %v496_v2, 0.0  ;;  %v3069_v2 = vld [vmem:[#allocation8 + $0x10] sm:$0xff] }
  0xe2   :  { %744 = vmatpush.bf16.msra.mxu3 %v3069_v2  ;;  %v3696_v2 = vld [vmem:[%s5258_s4] ss:$0 sm:$0xff] }
  0xe3   :  { %v363_v5 = vpop.f32.mrf.mxu0 }
  0xe4   :  { %v412_v7 = vpop.f32.mrf.mxu1 }
  0xe5   :  { %v413_v8 = vadd.f32 %v412_v7, %v363_v5  ;;  %v1953_v63 = vpop.permute.xlu1 %1952 }
  0xe6   :  { %v3647_v5 = vsub.f32 %v3498_v3, %v1953_v63 }
  0xe7   :  { %v497_v10 = vadd.f32 %v3510_v6, %v413_v8  ;;  %2042 = vrot.lane.b32.xlu2 %v2001_v60, %s3327_s0  ;;  %v1943_v8 = vpop.permute.xlu2 %1942 }
  0xe8   :  { %5339 = vst [vmem:[#allocation18_spill] sm:$0xff] %v3647_v5 }
  0xe9   :  { %v513_v11 = vmax.f32 %v497_v10, 0.0  ;;  %v1939_v10 = vpop.permute.xlu0 %1938 }
  0xeb   :  { %v525_v15 = vpack.c.bf16 %v513_v11, %v512_v9  ;;  %v366_v16 = vpop.f32.mrf.mxu0  ;;  %v3650_v9 = vsub.f32 %v3567_v33, %v1943_v8  ;;  %v3653_v11 = vsub.f32 %v3505_v4, %v1939_v10 }
  0xec   :  { %v415_v17 = vpop.f32.mrf.mxu1 }
  0xed   :  { %621 = vmatmul.bf16.gmra.mxu2 %v525_v15  ;;  %v416_v18 = vadd.f32 %v415_v17, %v366_v16  ;;  %5340 = vst [vmem:[#allocation19_spill] sm:$0xff] %v3650_v9  ;;  %v2004_v15 = vmul.f32 0.5, %v3647_v5  ;;  %v1999_v17 = vmul.f32 0.5, %v3650_v9  ;;  %v1997_v19 = vmul.f32 0.5, %v3653_v11 }
  0xee   :  { %5341 = vst [vmem:[#allocation20_spill] sm:$0xff] %v3653_v11 }
  0xef   :  { %v498_v22 = vadd.f32 %v3510_v6, %v416_v18  ;;  %v3068_v18 = vld [vmem:[#allocation8 + $0x8] sm:$0xff]  ;;  %2048 = vrot.lane.b32.xlu2 %v2004_v15, %s3327_s0  ;;  %2038 = vrot.lane.b32.xlu0 %v1999_v17, %s3327_s0 }
  0xf0   :  { %745 = vmatpush.bf16.msra.mxu3 %v3068_v18  ;;  %2034 = vrot.lane.b32.xlu1 %v1997_v19, %s3327_s0 }
  0xf1   :  { %v514_v27 = vmax.f32 %v498_v22, 0.0 }
  0xf3   :  { %v368_v23 = vpop.f32.mrf.mxu0 }
  0xf4   :  { %v417_v24 = vpop.f32.mrf.mxu1  ;;  %746 = vmatpush.bf16.msra.mxu3 %v3067_v25 }
  0xf5   :  { %v418_v26 = vadd.f32 %v417_v24, %v368_v23  ;;  %v1959_v23 = vpop.permute.xlu1 %1958 }
  0xf7   :  { %v499_v28 = vadd.f32 %v3510_v6, %v418_v26  ;;  %v3663_v26 = vsub.f32 %v3519_v12, %v1959_v23 }
  0xf9   :  { %v515_v30 = vmax.f32 %v499_v28, 0.0  ;;  %5342 = vst [vmem:[#allocation21_spill] sm:$0xff] %v3663_v26  ;;  %v1949_v28 = vpop.permute.xlu2 %1948  ;;  %v2007_v35 = vmul.f32 0.5, %v3663_v26 }
  0xfb   :  { %v526_v31 = vpack.c.bf16 %v515_v30, %v514_v27  ;;  %v371_v1 = vpop.f32.mrf.mxu0  ;;  %v3666_v30 = vsub.f32 %v3582_v41, %v1949_v28  ;;  %2054 = vrot.lane.b32.xlu2 %v2007_v35, %s3327_s0 }
  0xfc   :  { %v420_v7 = vpop.f32.mrf.mxu1 }
  0xfd   :  { %626 = vmatmul.bf16.gmra.mxu2 %v526_v31  ;;  %v421_v16 = vadd.f32 %v420_v7, %v371_v1  ;;  %5343 = vst [vmem:[#allocation22_spill] sm:$0xff] %v3666_v30  ;;  %v1945_v31 = vpop.permute.xlu0 %1944  ;;  %v2002_v39 = vmul.f32 0.5, %v3666_v30 }
  0xfe   :  { %v3669_v32 = vsub.f32 %v3531_v14, %v1945_v31 }
  0xff   :  { %v500_v22 = vadd.f32 %v3510_v6, %v421_v16  ;;  %2044 = vrot.lane.b32.xlu0 %v2002_v39, %s3327_s0 }
 0x100   :  { %5344 = vst [vmem:[#allocation23_spill] sm:$0xff] %v3669_v32  ;;  %v2000_v43 = vmul.f32 0.5, %v3669_v32 }
 0x101   :  { %v516_v37 = vmax.f32 %v500_v22, 0.0  ;;  %v1955_v47 = vpop.permute.xlu2 %1954 }
 0x102   :  { %2040 = vrot.lane.b32.xlu1 %v2000_v43, %s3327_s0  ;;  %v3679_v49 = vsub.f32 %v3602_v56, %v1955_v47 }
 0x103   :  { %v373_v24 = vpop.f32.mrf.mxu0 }
 0x104   :  { %v422_v27 = vpop.f32.mrf.mxu1  ;;  %5345 = vst [vmem:[#allocation24_spill] sm:$0xff] %v3679_v49  ;;  %v2005_v58 = vmul.f32 0.5, %v3679_v49 }
 0x105   :  { %v423_v29 = vadd.f32 %v422_v27, %v373_v24  ;;  %v1951_v50 = vpop.permute.xlu0 %1950 }
 0x106   :  { %v3682_v52 = vsub.f32 %v3545_v21, %v1951_v50 }
 0x107   :  { %v501_v38 = vadd.f32 %v3510_v6, %v423_v29  ;;  %2050 = vrot.lane.b32.xlu0 %v2005_v58, %s3327_s0 }
 0x108   :  { %5346 = vst [vmem:[#allocation25_spill] sm:$0xff] %v3682_v52  ;;  %v2003_v60 = vmul.f32 0.5, %v3682_v52 }
 0x109   :  { %v517_v44 = vmax.f32 %v501_v38, 0.0 }
 0x10a   :  { %2046 = vrot.lane.b32.xlu1 %v2003_v60, %s3327_s0 }
 0x10b   :  { %v527_v45 = vpack.c.bf16 %v517_v44, %v516_v37  ;;  %v376_v18 = vpop.f32.mrf.mxu0 }
 0x10c   :  { %v425_v19 = vpop.f32.mrf.mxu1 }
 0x10d   :  { %631 = vmatmul.bf16.gmra.mxu2 %v527_v45  ;;  %v1957_v61 = vpop.permute.xlu0 %1956  ;;  %v426_v23 = vadd.f32 %v425_v19, %v376_v18 }
 0x10e   :  { %v3689_v62 = vsub.f32 %v3572_v34, %v1957_v61 }
 0x10f   :  { %v502_v24 = vadd.f32 %v3510_v6, %v426_v23 }
 0x110   :  { %5347 = vst [vmem:[#allocation26_spill] sm:$0xff] %v3689_v62  ;;  %v2006_v63 = vmul.f32 0.5, %v3689_v62 }
 0x111   :  { %v518_v37 = vmax.f32 %v502_v24, 0.0 }
 0x112   :  { %2052 = vrot.lane.b32.xlu1 %v2006_v63, %s3327_s0 }
 0x113   :  { %v378_v27 = vpop.f32.mrf.mxu0 }
 0x114   :  { %v427_v28 = vpop.f32.mrf.mxu1 }
 0x115   :  { %v428_v31 = vadd.f32 %v427_v28, %v378_v27 }
 0x117   :  { %v503_v38 = vadd.f32 %v3510_v6, %v428_v31 }
 0x119   :  { %v519_v44 = vmax.f32 %v503_v38, 0.0 }
 0x11b   :  { %v528_v47 = vpack.c.bf16 %v519_v44, %v518_v37  ;;  %v381_v50 = vpop.f32.mrf.mxu0 }
 0x11c   :  { %v430_v58 = vpop.f32.mrf.mxu1 }
 0x11d   :  { %636 = vmatmul.bf16.gmra.mxu2 %v528_v47 }
 0x129   :  { %v2025_v61 = vpop.permute.xlu2 %2024 }
 0x12a   :  { %v2072_v63 = vadd.f32 %v2025_v61, %v3451_v51 }
 0x12c   :  { %2120 = vrot.lane.b32.xlu0 %v2072_v63, %s3326_s14 }
 0x140   :  { %v607_v1 = vpop.f32.mrf.mxu2 }
 0x141   :  { %v608_v7 = vadd.f32 %v3696_v2, %v607_v1  ;;  %v431_v1 = vadd.f32 %v430_v58, %v381_v50 }
 0x143   :  { %v647_v15 = vmax.f32 %v608_v7, 0.0 }
 0x148   :  { %v609_v8 = vpop.f32.mrf.mxu2 }
 0x149   :  { %v610_v10 = vadd.f32 %v3696_v2, %v609_v8  ;;  %v504_v8 = vadd.f32 %v3510_v6, %v431_v1 }
 0x14b   :  { %v648_v16 = vmax.f32 %v610_v10, 0.0  ;;  %v383_v10 = vpop.f32.mrf.mxu0  ;;  %v520_v24 = vmax.f32 %v504_v8, 0.0 }
 0x14d   :  { %v663_v17 = vpack.c.bf16 %v648_v16, %v647_v15  ;;  %v432_v15 = vpop.f32.mrf.mxu1 }
 0x14f   :  { %747 = vmatmul.bf16.vlgmr.msra.gmra.mxu3 %v663_v17  ;;  %v433_v17 = vadd.f32 %v432_v15, %v383_v10  ;;  %v2027_v15 = vpop.permute.xlu0 %2026 }
 0x150   :  { %v612_v22 = vpop.f32.mrf.mxu2 }
 0x151   :  { %v613_v25 = vadd.f32 %v3696_v2, %v612_v22  ;;  %v2031_v22 = vpop.permute.xlu2 %2030  ;;  %v505_v51 = vadd.f32 %v3510_v6, %v433_v17 }
 0x152   :  { %v2075_v23 = vadd.f32 %v2031_v22, %v3463_v55 }
 0x153   :  { %v649_v39 = vmax.f32 %v613_v25, 0.0  ;;  %v521_v27 = vmax.f32 %v505_v51, 0.0 }
 0x154   :  { %2126 = vrot.lane.b32.xlu0 %v2075_v23, %s3326_s14 }
 0x158   :  { %v614_v29 = vpop.f32.mrf.mxu2 }
 0x159   :  { %v615_v35 = vadd.f32 %v3696_v2, %v614_v29  ;;  %v529_v29 = vpack.c.bf16 %v521_v27, %v520_v24 }
 0x15b   :  { %v650_v43 = vmax.f32 %v615_v35, 0.0  ;;  %641 = vmatmul.bf16.gmra.mxu2 %v529_v29  ;;  %v2037_v35 = vpop.permute.xlu2 %2036 }
 0x15c   :  { %v2078_v37 = vadd.f32 %v2037_v35, %v3472_v57 }
 0x15d   :  { %v664_v45 = vpack.c.bf16 %v650_v43, %v649_v39 }
 0x15e   :  { %2132 = vrot.lane.b32.xlu0 %v2078_v37, %s3326_s14 }
 0x15f   :  { %752 = vmatmul.bf16.gmra.mxu3 %v664_v45 }
 0x160   :  { %v617_v60 = vpop.f32.mrf.mxu2 }
 0x161   :  { %v618_v7 = vadd.f32 %v3696_v2, %v617_v60  ;;  %v2029_v60 = vpop.permute.xlu1 %2028 }
 0x162   :  { %v2074_v61 = vadd.f32 %v2029_v60, %v3458_v54 }
 0x163   :  { %v651_v18 = vmax.f32 %v618_v7, 0.0  ;;  %v2043_v43 = vpop.permute.xlu2 %2042 }
 0x164   :  { %v2081_v44 = vadd.f32 %v2043_v43, %v3491_v0  ;;  %2124 = vrot.lane.b32.xlu2 %v2074_v61, %s3326_s14 }
 0x166   :  { %2138 = vrot.lane.b32.xlu0 %v2081_v44, %s3326_s14 }
 0x168   :  { %v619_v16 = vpop.f32.mrf.mxu2 }
 0x169   :  { %v620_v19 = vadd.f32 %v3696_v2, %v619_v16  ;;  %v2073_v16 = vadd.f32 %v2027_v15, %v3526_v13  ;;  %v2035_v22 = vpop.permute.xlu1 %2034 }
 0x16b   :  { %v652_v25 = vmax.f32 %v620_v19, 0.0  ;;  %v2049_v58 = vpop.permute.xlu2 %2048  ;;  %2122 = vrot.lane.b32.xlu1 %v2073_v16, %s3326_s14 }
 0x16c   :  { %v2084_v57 = vadd.f32 %v2049_v58, %v3498_v3  ;;  %v2033_v3 = vpop.permute.xlu0 %2032 }
 0x16d   :  { %v665_v28 = vpack.c.bf16 %v652_v25, %v651_v18  ;;  %v2076_v18 = vadd.f32 %v2033_v3, %v3540_v20 }
 0x16e   :  { %2144 = vrot.lane.b32.xlu0 %v2084_v57, %s3326_s14 }
 0x16f   :  { %757 = vmatmul.bf16.gmra.mxu3 %v665_v28 }
 0x170   :  { %v622_v31 = vpop.f32.mrf.mxu2 }
 0x171   :  { %v623_v38 = vadd.f32 %v3696_v2, %v622_v31 }
 0x173   :  { %v653_v39 = vmax.f32 %v623_v38, 0.0  ;;  %v2055_v7 = vpop.permute.xlu2 %2054  ;;  %2128 = vrot.lane.b32.xlu1 %v2076_v18, %s3326_s14 }
 0x174   :  { %v2087_v10 = vadd.f32 %v2055_v7, %v3519_v12  ;;  %v2039_v19 = vpop.permute.xlu0 %2038  ;;  %v2077_v12 = vadd.f32 %v2035_v22, %v3505_v4  ;;  %v2041_v24 = vpop.permute.xlu1 %2040 }
 0x175   :  { %v2079_v23 = vadd.f32 %v2039_v19, %v3567_v33  ;;  %v2080_v25 = vadd.f32 %v2041_v24, %v3531_v14 }
 0x176   :  { %2150 = vrot.lane.b32.xlu0 %v2087_v10, %s3326_s14  ;;  %2130 = vrot.lane.b32.xlu2 %v2077_v12, %s3326_s14 }
 0x178   :  { %v624_v55 = vpop.f32.mrf.mxu2 }
 0x179   :  { %v625_v6 = vadd.f32 %v3696_v2, %v624_v55 }
 0x17b   :  { %v654_v45 = vmax.f32 %v625_v6, 0.0  ;;  %2134 = vrot.lane.b32.xlu1 %v2079_v23, %s3326_s14 }
 0x17c   :  { %v2045_v13 = vpop.permute.xlu0 %2044  ;;  %v2047_v27 = vpop.permute.xlu1 %2046 }
 0x17d   :  { %v666_v47 = vpack.c.bf16 %v654_v45, %v653_v39  ;;  %v2082_v51 = vadd.f32 %v2045_v13, %v3582_v41  ;;  %v2083_v4 = vadd.f32 %v2047_v27, %v3545_v21  ;;  %v3749_v21 = vld [vmem:[%s5260_s6] ss:$0 sm:$0xff]  ;;  %s3329_s6 = smov 25  }
 0x17e   :  { %2136 = vrot.lane.b32.xlu2 %v2080_v25, %s3326_s14 }
 0x17f   :  { %762 = vmatmul.bf16.gmra.mxu3 %v666_v47 }
 0x180   :  { %v627_v50 = vpop.f32.mrf.mxu2 }
 0x181   :  { %v628_v63 = vadd.f32 %v3696_v2, %v627_v50 }
 0x183   :  { %v655_v0 = vmax.f32 %v628_v63, 0.0  ;;  %2140 = vrot.lane.b32.xlu1 %v2082_v51, %s3326_s14 }
 0x184   :  { %v2051_v20 = vpop.permute.xlu0 %2050  ;;  %v2053_v28 = vpop.permute.xlu1 %2052 }
 0x185   :  { %v2085_v33 = vadd.f32 %v2051_v20, %v3602_v56  ;;  %v2086_v29 = vadd.f32 %v2053_v28, %v3572_v34 }
 0x186   :  { %2142 = vrot.lane.b32.xlu2 %v2083_v4, %s3326_s14 }
 0x188   :  { %v629_v1 = vpop.f32.mrf.mxu2 }
 0x189   :  { %v630_v8 = vadd.f32 %v3696_v2, %v629_v1 }
 0x18b   :  { %v656_v17 = vmax.f32 %v630_v8, 0.0  ;;  %2146 = vrot.lane.b32.xlu1 %v2085_v33, %s3326_s14 }
 0x18d   :  { %v667_v54 = vpack.c.bf16 %v656_v17, %v655_v0 }
 0x18e   :  { %2148 = vrot.lane.b32.xlu2 %v2086_v29, %s3326_s14  ;;  %s3328_s14 = smov 123  }
 0x18f   :  { %767 = vmatmul.bf16.gmra.mxu3 %v667_v54 }
 0x190   :  { %v632_v14 = vpop.f32.mrf.mxu2 }
 0x191   :  { %v633_v41 = vadd.f32 %v3696_v2, %v632_v14 }
 0x193   :  { %v657_v35 = vmax.f32 %v633_v41, 0.0 }
 0x198   :  { %v634_v31 = vpop.f32.mrf.mxu2 }
 0x199   :  { %v635_v37 = vadd.f32 %v3696_v2, %v634_v31 }
 0x19b   :  { %v658_v38 = vmax.f32 %v635_v37, 0.0 }
 0x19d   :  { %v668_v56 = vpack.c.bf16 %v658_v38, %v657_v35 }
 0x19f   :  { %772 = vmatmul.bf16.gmra.mxu3 %v668_v56 }
 0x1a0   :  { %v637_v47 = vpop.f32.mrf.mxu2 }
 0x1a1   :  { %v638_v60 = vadd.f32 %v3696_v2, %v637_v47 }
 0x1a3   :  { %v659_v0 = vmax.f32 %v638_v60, 0.0 }
 0x1a8   :  { %v639_v57 = vpop.f32.mrf.mxu2 }
 0x1a9   :  { %v640_v63 = vadd.f32 %v3696_v2, %v639_v57 }
 0x1ab   :  { %v660_v7 = vmax.f32 %v640_v63, 0.0 }
 0x1ad   :  { %v669_v8 = vpack.c.bf16 %v660_v7, %v659_v0 }
 0x1af   :  { %777 = vmatmul.bf16.gmra.mxu3 %v669_v8 }
 0x1d2   :  { %v748_v55 = vpop.f32.mrf.mxu3 }
 0x1d3   :  { %v3752_v34 = vadd.f32 %v3749_v21, %v748_v55 }
 0x1d5   :  { %5348 = vst [vmem:[#allocation27_spill] sm:$0xff] %v3752_v34  ;;  %1511 = vrot.lane.b32.xlu1 %v3752_v34, %s3328_s14  ;;  %v789_v39 = vsel %vm788_vm0, %v3752_v34, -inf }
 0x1d6   :  { %790 = vmax.xlane.f32.xlu0 %v789_v39  ;;  %v3835_v39 = vpop.permute.xlu0 %2120 }
 0x1da   :  { %v750_v6 = vpop.f32.mrf.mxu3 }
 0x1db   :  { %v3759_v43 = vadd.f32 %v3749_v21, %v750_v6 }
 0x1dd   :  { %5349 = vst [vmem:[#allocation28_spill] sm:$0xff] %v3759_v43  ;;  %1513 = vrot.lane.b32.xlu2 %v3759_v43, %s3328_s14  ;;  %v792_v44 = vsel %vm788_vm0, %v3759_v43, -inf }
 0x1de   :  { %793 = vmax.xlane.f32.xlu0 %v792_v44  ;;  %v642_v17 = vpop.f32.mrf.mxu2  ;;  %v3839_v44 = vpop.permute.xlu1 %2122 }
 0x1df   :  { %v643_v3 = vadd.f32 %v3696_v2, %v642_v17  ;;  %5360 = vst [vmem:[#allocation39_spill] sm:$0xff] %v3839_v44 }
 0x1e1   :  { %v661_v19 = vmax.f32 %v643_v3, 0.0 }
 0x1e2   :  { %v753_v45 = vpop.f32.mrf.mxu3 }
 0x1e3   :  { %v3772_v61 = vadd.f32 %v3749_v21, %v753_v45  ;;  %v3841_v45 = vpop.permute.xlu0 %2126 }
 0x1e4   :  { %5361 = vst [vmem:[#allocation40_spill] sm:$0xff] %v3841_v45 }
 0x1e5   :  { %5351 = vst [vmem:[#allocation30_spill] sm:$0xff] %v3772_v61  ;;  %v795_v16 = vsel %vm788_vm0, %v3772_v61, -inf }
 0x1e6   :  { %v644_v18 = vpop.f32.mrf.mxu2  ;;  %v3846_v60 = vpop.permute.xlu1 %2128 }
 0x1e7   :  { %v645_v22 = vadd.f32 %v3696_v2, %v644_v18  ;;  %5363 = vst [vmem:[#allocation42_spill] sm:$0xff] %v3846_v60 }
 0x1e9   :  { %v662_v23 = vmax.f32 %v645_v22, 0.0 }
 0x1ea   :  { %v755_v50 = vpop.f32.mrf.mxu3 }
 0x1eb   :  { %v3766_v58 = vadd.f32 %v3749_v21, %v755_v50  ;;  %v670_v12 = vpack.c.bf16 %v662_v23, %v661_v19  ;;  %v3854_v0 = vpop.permute.xlu0 %2132 }
 0x1ec   :  { %5365 = vst [vmem:[#allocation44_spill] sm:$0xff] %v3854_v0 }
 0x1ed   :  { %5350 = vst [vmem:[#allocation29_spill] sm:$0xff] %v3766_v58  ;;  %1517 = vrot.lane.b32.xlu2 %v3766_v58, %s3328_s14  ;;  %v798_v54 = vsel %vm788_vm0, %v3766_v58, -inf  ;;  %782 = vmatmul.bf16.gmra.mxu3 %v670_v12 }
 0x1ee   :  { %v3856_v8 = vpop.permute.xlu1 %2134 }
 0x1ef   :  { %5366 = vst [vmem:[#allocation45_spill] sm:$0xff] %v3856_v8 }
 0x1f2   :  { %v758_v1 = vpop.f32.mrf.mxu3  ;;  %1515 = vrot.lane.b32.xlu0 %v3772_v61, %s3328_s14 }
 0x1f3   :  { %v3789_v13 = vadd.f32 %v3749_v21, %v758_v1  ;;  %v3852_v1 = vpop.permute.xlu2 %2124 }
 0x1f4   :  { %5364 = vst [vmem:[#allocation43_spill] sm:$0xff] %v3852_v1 }
 0x1f5   :  { %5353 = vst [vmem:[#allocation32_spill] sm:$0xff] %v3789_v13  ;;  %v801_v24 = vsel %vm788_vm0, %v3789_v13, -inf }
 0x1f6   :  { %v3867_v3 = vpop.permute.xlu1 %2140 }
 0x1f7   :  { %5370 = vst [vmem:[#allocation49_spill] sm:$0xff] %v3867_v3 }
 0x1fa   :  { %v760_v10 = vpop.f32.mrf.mxu3 }
 0x1fb   :  { %v3778_v15 = vadd.f32 %v3749_v21, %v760_v10  ;;  %v3858_v10 = vpop.permute.xlu2 %2130 }
 0x1fc   :  { %5367 = vst [vmem:[#allocation46_spill] sm:$0xff] %v3858_v10 }
 0x1fd   :  { %5352 = vst [vmem:[#allocation31_spill] sm:$0xff] %v3778_v15  ;;  %1521 = vrot.lane.b32.xlu0 %v3778_v15, %s3328_s14  ;;  %v804_v25 = vsel %vm788_vm0, %v3778_v15, -inf }
 0x1fe   :  { %v3880_v23 = vpop.permute.xlu1 %2146 }
 0x1ff   :  { %796 = vmax.xlane.f32.xlu1 %v795_v16  ;;  %v3860_v16 = vpop.permute.xlu0 %2138  ;;  %5374 = vst [vmem:[#allocation53_spill] sm:$0xff] %v3880_v23 }
 0x200   :  { %5368 = vst [vmem:[#allocation47_spill] sm:$0xff] %v3860_v16 }
 0x202   :  { %v763_v51 = vpop.f32.mrf.mxu3 }
 0x203   :  { %v3796_v20 = vadd.f32 %v3749_v21, %v763_v51  ;;  %v3872_v19 = vpop.permute.xlu2 %2136 }
 0x204   :  { %5372 = vst [vmem:[#allocation51_spill] sm:$0xff] %v3872_v19 }
 0x205   :  { %5354 = vst [vmem:[#allocation33_spill] sm:$0xff] %v3796_v20  ;;  %v807_v27 = vsel %vm788_vm0, %v3796_v20, -inf }
 0x207   :  { %799 = vmax.xlane.f32.xlu1 %v798_v54  ;;  %v3874_v22 = vpop.permute.xlu0 %2144 }
 0x208   :  { %5373 = vst [vmem:[#allocation52_spill] sm:$0xff] %v3874_v22 }
 0x20a   :  { %v765_v2 = vpop.f32.mrf.mxu3 }
 0x20b   :  { %v3803_v33 = vadd.f32 %v3749_v21, %v765_v2  ;;  %v3882_v12 = vpop.permute.xlu2 %2142 }
 0x20c   :  { %5375 = vst [vmem:[#allocation54_spill] sm:$0xff] %v3882_v12 }
 0x20d   :  { %5355 = vst [vmem:[#allocation34_spill] sm:$0xff] %v3803_v33  ;;  %v810_v29 = vsel %vm788_vm0, %v3803_v33, -inf }
 0x212   :  { %v768_v4 = vpop.f32.mrf.mxu3 }
 0x213   :  { %v3810_v28 = vadd.f32 %v3749_v21, %v768_v4 }
 0x215   :  { %5356 = vst [vmem:[#allocation35_spill] sm:$0xff] %v3810_v28  ;;  %v813_v41 = vsel %vm788_vm0, %v3810_v28, -inf }
 0x216   :  { %802 = vmax.xlane.f32.xlu2 %v801_v24  ;;  %v3884_v24 = vpop.permute.xlu0 %2150 }
 0x217   :  { %5376 = vst [vmem:[#allocation55_spill] sm:$0xff] %v3884_v24 }
 0x21a   :  { %v770_v14 = vpop.f32.mrf.mxu3 }
 0x21b   :  { %v3819_v31 = vadd.f32 %v3749_v21, %v770_v14 }
 0x21d   :  { %5357 = vst [vmem:[#allocation36_spill] sm:$0xff] %v3819_v31  ;;  %v816_v35 = vsel %vm788_vm0, %v3819_v31, -inf }
 0x21e   :  { %805 = vmax.xlane.f32.xlu2 %v804_v25  ;;  %v3888_v25 = vpop.permute.xlu2 %2148 }
 0x21f   :  { %5377 = vst [vmem:[#allocation56_spill] sm:$0xff] %v3888_v25 }
 0x220   :  { %1519 = vrot.lane.b32.xlu1 %v3789_v13, %s3328_s14 }
 0x222   :  { %v773_v37 = vpop.f32.mrf.mxu3 }
 0x223   :  { %v3824_v38 = vadd.f32 %v3749_v21, %v773_v37 }
 0x225   :  { %5358 = vst [vmem:[#allocation37_spill] sm:$0xff] %v3824_v38  ;;  %v819_v6 = vsel %vm788_vm0, %v3824_v38, -inf }
 0x227   :  { %808 = vmax.xlane.f32.xlu0 %v807_v27  ;;  %v837_v27 = vlaneseq }
 0x228   :  { %1525 = vrot.lane.b32.xlu1 %v3803_v33, %s3328_s14 }
 0x22a   :  { %v775_v56 = vpop.f32.mrf.mxu3 }
 0x22b   :  { %v3829_v55 = vadd.f32 %v3749_v21, %v775_v56 }
 0x22d   :  { %5359 = vst [vmem:[#allocation38_spill] sm:$0xff] %v3829_v55  ;;  %v822_v57 = vsel %vm788_vm0, %v3829_v55, -inf }
 0x232   :  { %v778_v47 = vpop.f32.mrf.mxu3 }
 0x233   :  { %v3844_v50 = vadd.f32 %v3749_v21, %v778_v47 }
 0x235   :  { %5362 = vst [vmem:[#allocation41_spill] sm:$0xff] %v3844_v50  ;;  %v825_v63 = vsel %vm788_vm0, %v3844_v50, -inf }
 0x236   :  { %1523 = vrot.lane.b32.xlu2 %v3796_v20, %s3328_s14 }
 0x237   :  { %v3895_v14 = vpop.permute.xlu2 %1513 }
 0x23a   :  { %v780_v7 = vpop.f32.mrf.mxu3 }
 0x23b   :  { %1527 = vrot.lane.b32.xlu0 %v3810_v28, %s3328_s14  ;;  %v3863_v17 = vadd.f32 %v3749_v21, %v780_v7 }
 0x23d   :  { %5369 = vst [vmem:[#allocation48_spill] sm:$0xff] %v3863_v17 }
 0x247   :  { %v3886_v51 = vpop.permute.xlu1 %1511 }
 0x249   :  { %v791_v2 = vpop.xlane.xlu0 %790 }
 0x24a   :  { %vm839_vm1 = vcmp.ge.f32.partialorder %v3752_v34, %v791_v2  ;;  %v1111_v56 = vsub.f32 %v3752_v34, %v791_v2 }
 0x24c   :  { %v1127_v24 = vmul.f32 1.442695, %v1111_v56 }
 0x252   :  { %811 = vmax.xlane.f32.xlu1 %v810_v29  ;;  %v3892_v29 = vand.u32 127, %v837_v27  ;;  %v3906_v27 = vpop.permute.xlu2 %1517 }
 0x25f   :  { %814 = vmax.xlane.f32.xlu2 %v813_v41  ;;  %v794_v41 = vpop.xlane.xlu0 %793 }
 0x260   :  { %v1112_v37 = vsub.f32 %v3759_v43, %v794_v41  ;;  %vm840_vm3 = vcmp.ge.f32.partialorder %v3759_v43, %v794_v41 }
 0x262   :  { %v1129_v7 = vmul.f32 1.442695, %v1112_v37 }
 0x264   :  { %3091 = vpow2.f32 %v1129_v7  ;;  %v856_v7 = vsel %vm840_vm3, %v3892_v29, 5 }
 0x265   :  { %817 = vmax.xlane.f32.xlu0 %v816_v35  ;;  %v855_v35 = vsel %vm839_vm1, %v3892_v29, 5  ;;  %3093 = vpow2.f32 %v1127_v24 }
 0x266   :  { %v3903_v47 = vsel %vm788_vm0, %v855_v35, 2147483647 }
 0x267   :  { %v3911_v2 = vpop.permute.xlu0 %1515 }
 0x26b   :  { %1531 = vrot.lane.b32.xlu1 %v3824_v38, %s3328_s14 }
 0x270   :  { %v783_v54 = vpop.f32.mrf.mxu3 }
 0x271   :  { %v3870_v18 = vadd.f32 %v3749_v21, %v783_v54  ;;  %v873_v54 = vshra.s32 %v3903_v47, 16 }
 0x272   :  { %v3890_v4 = vpop.xlane.xlu1 %796 }
 0x273   :  { %5371 = vst [vmem:[#allocation50_spill] sm:$0xff] %v3870_v18  ;;  %v3913_v25 = vcvt.s32.f32 %v873_v54  ;;  %v831_v35 = vsel %vm788_vm0, %v3870_v18, -inf  ;;  %v3926_v54 = vpop.permute.xlu0 %1521  ;;  %vm841_vm9 = vcmp.ge.f32.partialorder %v3772_v61, %v3890_v4 }
 0x277   :  { %1529 = vrot.lane.b32.xlu2 %v3819_v31, %s3328_s14 }
 0x279   :  { %1533 = vrot.lane.b32.xlu0 %v3829_v55, %s3328_s14 }
 0x295   :  { %820 = vmax.xlane.f32.xlu1 %v819_v6  ;;  %v828_v6 = vsel %vm788_vm0, %v3863_v17, -inf }
 0x2a0   :  { %823 = vmax.xlane.f32.xlu2 %v822_v57  ;;  %v800_v57 = vpop.xlane.xlu1 %799 }
 0x2a1   :  { %vm842_vm2 = vcmp.ge.f32.partialorder %v3766_v58, %v800_v57  ;;  %v1114_v23 = vsub.f32 %v3766_v58, %v800_v57 }
 0x2a2   :  { %v858_v24 = vsel %vm842_vm2, %v3892_v29, 5 }
 0x2a3   :  { %826 = vmax.xlane.f32.xlu0 %v825_v63  ;;  %v785_v63 = vpop.f32.mrf.mxu3  ;;  %v1133_v22 = vmul.f32 1.442695, %v1114_v23 }
 0x2a4   :  { %v3909_v26 = vadd.f32 %v3749_v21, %v785_v63  ;;  %v803_v21 = vpop.xlane.xlu2 %802 }
 0x2a5   :  { %v1115_v62 = vsub.f32 %v3789_v13, %v803_v21  ;;  %vm843_vm5 = vcmp.ge.f32.partialorder %v3789_v13, %v803_v21 }
 0x2a6   :  { %5378 = vst [vmem:[#allocation57_spill] sm:$0xff] %v3909_v26  ;;  %v834_v37 = vsel %vm788_vm0, %v3909_v26, -inf }
 0x2a7   :  { %v1135_v43 = vmul.f32 1.442695, %v1115_v62 }
 0x2a8   :  { %v3921_v56 = vpop.permute.xlu1 %1519 }
 0x2a9   :  { %3095 = vpow2.f32 %v1135_v43  ;;  %v859_v43 = vsel %vm843_vm5, %v3892_v29, 5 }
 0x2aa   :  { %3097 = vpow2.f32 %v1133_v22  ;;  %v3962_v13 = vsel %vm788_vm0, %v859_v43, 2147483647 }
 0x2ae   :  { %1537 = vrot.lane.b32.xlu1 %v3863_v17, %s3328_s14 }
 0x2b0   :  { %v3939_v5 = vpop.permute.xlu1 %1525 }
 0x2b7   :  { %1539 = vrot.lane.b32.xlu0 %v3870_v18, %s3328_s14 }
 0x2b8   :  { %1535 = vrot.lane.b32.xlu2 %v3844_v50, %s3328_s14 }
 0x2c5   :  { %v812_v62 = vpop.xlane.xlu1 %811 }
 0x2c6   :  { %v1118_v22 = vsub.f32 %v3803_v33, %v812_v62  ;;  %vm846_vm7 = vcmp.ge.f32.partialorder %v3803_v33, %v812_v62 }
 0x2c8   :  { %v1141_v12 = vmul.f32 1.442695, %v1118_v22 }
 0x2ca   :  { %3099 = vpow2.f32 %v1141_v12 }
 0x2d8   :  { %829 = vmax.xlane.f32.xlu1 %v828_v6  ;;  %v3092_v6 = vpop.eup %3091 }
 0x2d9   :  { %v3094_v63 = vpop.eup %3093  ;;  %v1162_v34 = vsel %vm788_vm0, %v3092_v6, 0.0  ;;  %v809_v6 = vpop.xlane.xlu0 %808 }
 0x2da   :  { %v1159_v41 = vsel %vm788_vm0, %v3094_v63, 0.0  ;;  %vm845_vm4 = vcmp.ge.f32.partialorder %v3796_v20, %v809_v6  ;;  %v3096_v23 = vpop.eup %3095 }
 0x2db   :  { %v3098_v63 = vpop.eup %3097 }
 0x2dc   :  { %v1168_v21 = vsel %vm788_vm0, %v3098_v63, 0.0  ;;  %v3100_v43 = vpop.eup %3099 }
 0x2dd   :  { %v3972_v63 = vpop.permute.xlu1 %1531 }
 0x2e0   :  { %876 = vmin.xlane.f32.xlu1 %v3913_v25 }
 0x2e1   :  { %832 = vmax.xlane.f32.xlu2 %v831_v35  ;;  %835 = vmax.xlane.f32.xlu0 %v834_v37  ;;  %v3932_v35 = vsel %vm788_vm0, %v858_v24, 2147483647  ;;  %v3936_v37 = vsel %vm788_vm0, %v856_v7, 2147483647  ;;  %v861_v24 = vsel %vm845_vm4, %v3892_v29, 5  ;;  %v1117_v7 = vsub.f32 %v3796_v20, %v809_v6 }
 0x2e2   :  { %v918_v49 = vshra.s32 %v3932_v35, 16  ;;  %v888_v57 = vshra.s32 %v3936_v37, 16  ;;  %v933_v6 = vshra.s32 %v3962_v13, 16 }
 0x2e3   :  { %v1139_v3 = vmul.f32 1.442695, %v1117_v7  ;;  %v1180_v7 = vsel %vm788_vm0, %v3100_v43, 0.0 }
 0x2e4   :  { %v3942_v58 = vcvt.s32.f32 %v918_v49  ;;  %v3952_v49 = vpop.permute.xlu0 %1527 }
 0x2e5   :  { %3101 = vpow2.f32 %v1139_v3 }
 0x2e8   :  { %1163 = vadd.xlane.f32.xlu1 %v1162_v34  ;;  %v3944_v34 = vcvt.s32.f32 %v888_v57  ;;  %v3958_v57 = vsel %vm788_vm0, %v861_v24, 2147483647 }
 0x2e9   :  { %1160 = vadd.xlane.f32.xlu0 %v1159_v41  ;;  %v1171_v41 = vsel %vm788_vm0, %v3096_v23, 0.0  ;;  %v963_v52 = vshra.s32 %v3958_v57, 16 }
 0x2eb   :  { %v3968_v24 = vcvt.s32.f32 %v963_v52  ;;  %v3102_v12 = vpop.eup %3101  ;;  %v862_v52 = vsel %vm846_vm7, %v3892_v29, 5 }
 0x2ec   :  { %v818_v23 = vpop.xlane.xlu0 %817  ;;  %v1177_v20 = vsel %vm788_vm0, %v3102_v12, 0.0  ;;  %v3987_v30 = vsel %vm788_vm0, %v862_v52, 2147483647 }
 0x2ed   :  { %vm848_vm6 = vcmp.ge.f32.partialorder %v3819_v31, %v818_v23  ;;  %v1120_v3 = vsub.f32 %v3819_v31, %v818_v23  ;;  %v978_v23 = vshra.s32 %v3987_v30, 16 }
 0x2ee   :  { %v864_v22 = vsel %vm848_vm6, %v3892_v29, 5 }
 0x2ef   :  { %v1145_v16 = vmul.f32 1.442695, %v1120_v3 }
 0x2f0   :  { %921 = vmin.xlane.f32.xlu1 %v3942_v58 }
 0x2f1   :  { %891 = vmin.xlane.f32.xlu0 %v3944_v34 }
 0x2f4   :  { %v3992_v43 = vpop.permute.xlu0 %1533 }
 0x2f8   :  { %1172 = vadd.xlane.f32.xlu1 %v1171_v41  ;;  %v3970_v41 = vcvt.s32.f32 %v933_v6 }
 0x2f9   :  { %1541 = vrot.lane.b32.xlu2 %v3909_v26, %s3328_s14  ;;  %1169 = vadd.xlane.f32.xlu0 %v1168_v21  ;;  %v3983_v21 = vsel %vm788_vm0, %v864_v22, 2147483647 }
 0x2fa   :  { %v1008_v33 = vshra.s32 %v3983_v21, 16 }
 0x2fc   :  { %v3994_v22 = vcvt.s32.f32 %v1008_v33 }
 0x300   :  { %966 = vmin.xlane.f32.xlu1 %v3968_v24 }
 0x301   :  { %936 = vmin.xlane.f32.xlu0 %v3970_v41 }
 0x308   :  { %v821_v6 = vpop.xlane.xlu1 %820  ;;  %1181 = vadd.xlane.f32.xlu1 %v1180_v7  ;;  %v3996_v7 = vcvt.s32.f32 %v978_v23 }
 0x309   :  { %v1121_v62 = vsub.f32 %v3824_v38, %v821_v6  ;;  %1178 = vadd.xlane.f32.xlu0 %v1177_v20  ;;  %vm849_vm8 = vcmp.ge.f32.partialorder %v3824_v38, %v821_v6 }
 0x30a   :  { %v865_v52 = vsel %vm849_vm8, %v3892_v29, 5 }
 0x30b   :  { %v1147_v53 = vmul.f32 1.442695, %v1121_v62  ;;  %v1113_v62 = vsub.f32 %v3772_v61, %v3890_v4  ;;  %v4013_v38 = vsel %vm788_vm0, %v865_v52, 2147483647 }
 0x30c   :  { %v1023_v4 = vshra.s32 %v4013_v38, 16 }
 0x30d   :  { %3103 = vpow2.f32 %v1147_v53  ;;  %v857_v53 = vsel %vm841_vm9, %v3892_v29, 5 }
 0x30e   :  { %3105 = vpow2.f32 %v1145_v16  ;;  %v4019_v19 = vsel %vm788_vm0, %v857_v53, 2147483647  ;;  %v4026_v52 = vcvt.s32.f32 %v1023_v4 }
 0x310   :  { %1011 = vmin.xlane.f32.xlu1 %v3994_v22 }
 0x311   :  { %981 = vmin.xlane.f32.xlu0 %v3996_v7 }
 0x313   :  { %v3104_v20 = vpop.eup %3103 }
 0x314   :  { %v3106_v12 = vpop.eup %3105  ;;  %v1189_v16 = vsel %vm788_vm0, %v3104_v20, 0.0 }
 0x315   :  { %v1186_v6 = vsel %vm788_vm0, %v3106_v12, 0.0  ;;  %v903_v12 = vshra.s32 %v4019_v19, 16 }
 0x316   :  { %v827_v3 = vpop.xlane.xlu0 %826 }
 0x317   :  { %vm851_vm10 = vcmp.ge.f32.partialorder %v3844_v50, %v827_v3  ;;  %v1123_v33 = vsub.f32 %v3844_v50, %v827_v3  ;;  %v806_v50 = vpop.xlane.xlu2 %805 }
 0x318   :  { %1190 = vadd.xlane.f32.xlu1 %v1189_v16  ;;  %v867_v23 = vsel %vm851_vm10, %v3892_v29, 5  ;;  %v1131_v16 = vmul.f32 1.442695, %v1113_v62  ;;  %vm844_vm11 = vcmp.ge.f32.partialorder %v3778_v15, %v806_v50 }
 0x319   :  { %1187 = vadd.xlane.f32.xlu0 %v1186_v6  ;;  %v4016_v31 = vsel %vm788_vm0, %v867_v23, 2147483647  ;;  %v1151_v3 = vmul.f32 1.442695, %v1123_v33  ;;  %v4029_v6 = vcvt.s32.f32 %v903_v12  ;;  %v860_v23 = vsel %vm844_vm11, %v3892_v29, 5 }
 0x31a   :  { %v1053_v20 = vshra.s32 %v4016_v31, 16 }
 0x31b   :  { %3107 = vpow2.f32 %v1151_v3 }
 0x31c   :  { %v4024_v61 = vcvt.s32.f32 %v1053_v20  ;;  %3109 = vpow2.f32 %v1131_v16  ;;  %v1116_v20 = vsub.f32 %v3778_v15, %v806_v50  ;;  %v4041_v16 = vsel %vm788_vm0, %v860_v23, 2147483647 }
 0x31d   :  { %v948_v32 = vshra.s32 %v4041_v16, 16 }
 0x31e   :  { %v1137_v12 = vmul.f32 1.442695, %v1116_v20 }
 0x31f   :  { %v4034_v62 = vpop.permute.xlu2 %1523  ;;  %v4044_v9 = vcvt.s32.f32 %v948_v32 }
 0x320   :  { %1056 = vmin.xlane.f32.xlu1 %v4024_v61  ;;  %3111 = vpow2.f32 %v1137_v12 }
 0x321   :  { %1026 = vmin.xlane.f32.xlu0 %v4026_v52  ;;  %v3108_v53 = vpop.eup %3107 }
 0x322   :  { %906 = vmin.xlane.f32.xlu2 %v4029_v6  ;;  %v3110_v33 = vpop.eup %3109  ;;  %v1195_v3 = vsel %vm788_vm0, %v3108_v53, 0.0 }
 0x323   :  { %v1165_v4 = vsel %vm788_vm0, %v3110_v33, 0.0 }
 0x326   :  { %v3112_v50 = vpop.eup %3111 }
 0x327   :  { %v815_v8 = vpop.xlane.xlu2 %814  ;;  %v1174_v23 = vsel %vm788_vm0, %v3112_v50, 0.0 }
 0x328   :  { %vm847_vm12 = vcmp.ge.f32.partialorder %v3810_v28, %v815_v8  ;;  %v1119_v33 = vsub.f32 %v3810_v28, %v815_v8  ;;  %v4061_v8 = vpop.permute.xlu1 %1537 }
 0x329   :  { %1196 = vadd.xlane.f32.xlu0 %v1195_v3  ;;  %v863_v53 = vsel %vm847_vm12, %v3892_v29, 5  ;;  %v4071_v46 = vpop.permute.xlu0 %1539 }
 0x32a   :  { %1166 = vadd.xlane.f32.xlu2 %v1165_v4  ;;  %v4054_v20 = vsel %vm788_vm0, %v863_v53, 2147483647  ;;  %v1143_v4 = vmul.f32 1.442695, %v1119_v33 }
 0x32b   :  { %v993_v32 = vshra.s32 %v4054_v20, 16 }
 0x32c   :  { %3113 = vpow2.f32 %v1143_v4 }
 0x32d   :  { %v4057_v15 = vcvt.s32.f32 %v993_v32 }
 0x32f   :  { %v4050_v3 = vpop.permute.xlu2 %1529 }
 0x332   :  { %951 = vmin.xlane.f32.xlu2 %v4044_v9  ;;  %v3114_v28 = vpop.eup %3113 }
 0x337   :  { %v824_v12 = vpop.xlane.xlu2 %823 }
 0x338   :  { %vm850_vm13 = vcmp.ge.f32.partialorder %v3829_v55, %v824_v12  ;;  %v1122_v53 = vsub.f32 %v3829_v55, %v824_v12 }
 0x339   :  { %v866_v50 = vsel %vm850_vm13, %v3892_v29, 5 }
 0x33a   :  { %1175 = vadd.xlane.f32.xlu2 %v1174_v23  ;;  %v1183_v23 = vsel %vm788_vm0, %v3114_v28, 0.0  ;;  %v4067_v33 = vsel %vm788_vm0, %v866_v50, 2147483647  ;;  %v1149_v4 = vmul.f32 1.442695, %v1122_v53 }
 0x33b   :  { %v1038_v11 = vshra.s32 %v4067_v33, 16 }
 0x33c   :  { %3115 = vpow2.f32 %v1149_v4 }
 0x33d   :  { %v4081_v53 = vcvt.s32.f32 %v1038_v11 }
 0x33f   :  { %v4069_v0 = vpop.permute.xlu2 %1535 }
 0x342   :  { %996 = vmin.xlane.f32.xlu2 %v4057_v15 }
 0x34a   :  { %1184 = vadd.xlane.f32.xlu2 %v1183_v23 }
 0x34b   :  { %v830_v32 = vpop.xlane.xlu1 %829 }
 0x34c   :  { %vm852_vm14 = vcmp.ge.f32.partialorder %v3863_v17, %v830_v32  ;;  %v1124_v10 = vsub.f32 %v3863_v17, %v830_v32 }
 0x34d   :  { %v868_v12 = vsel %vm852_vm14, %v3892_v29, 5 }
 0x34e   :  { %v1153_v55 = vmul.f32 1.442695, %v1124_v10  ;;  %v4078_v28 = vsel %vm788_vm0, %v868_v12, 2147483647  ;;  %v3116_v10 = vpop.eup %3115 }
 0x34f   :  { %v1068_v50 = vshra.s32 %v4078_v28, 16  ;;  %v1192_v1 = vsel %vm788_vm0, %v3116_v10, 0.0 }
 0x350   :  { %3117 = vpow2.f32 %v1153_v55 }
 0x351   :  { %v4083_v23 = vcvt.s32.f32 %v1068_v50 }
 0x352   :  { %1041 = vmin.xlane.f32.xlu2 %v4081_v53 }
 0x353   :  { %v4086_v60 = vpop.xlane.xlu1 %876  ;;  %1071 = vmin.xlane.f32.xlu0 %v4083_v23 }
 0x354   :  { %v833_v32 = vpop.xlane.xlu2 %832  ;;  %v836_v17 = vpop.xlane.xlu0 %835  ;;  %vm878_vm3 = vcmp.eq.f32.partialorder %v3913_v25, %v4086_v60 }
 0x355   :  { %vm853_vm15 = vcmp.ge.f32.partialorder %v3870_v18, %v833_v32  ;;  %vm854_vm1 = vcmp.ge.f32.partialorder %v3909_v26, %v836_v17  ;;  %v1126_v4 = vsub.f32 %v3909_v26, %v836_v17  ;;  %v1125_v45 = vsub.f32 %v3870_v18, %v833_v32 }
 0x356   :  { %v3118_v55 = vpop.eup %3117  ;;  %v870_v11 = vsel %vm854_vm1, %v3892_v29, 5  ;;  %v869_v12 = vsel %vm853_vm15, %v3892_v29, 5 }
 0x357   :  { %v1157_v50 = vmul.f32 1.442695, %v1126_v4  ;;  %v1198_v59 = vsel %vm788_vm0, %v3118_v55, 0.0  ;;  %v4097_v42 = vsel %vm788_vm0, %v870_v11, 2147483647  ;;  %v887_v11 = vand.u32 65535, %v3936_v37 }
 0x358   :  { %1199 = vadd.xlane.f32.xlu1 %v1198_v59  ;;  %v4101_v40 = vsel %vm788_vm0, %v869_v12, 2147483647  ;;  %v1098_v17 = vshra.s32 %v4097_v42, 16  ;;  %v1155_v4 = vmul.f32 1.442695, %v1125_v45 }
 0x359   :  { %3119 = vpow2.f32 %v1157_v50  ;;  %v1083_v32 = vshra.s32 %v4101_v40, 16  ;;  %v889_v50 = vcvt.s32.f32 %v887_v11  ;;  %v932_v11 = vand.u32 65535, %v3962_v13 }
 0x35a   :  { %1193 = vadd.xlane.f32.xlu2 %v1192_v1  ;;  %v4109_v59 = vcvt.s32.f32 %v1098_v17  ;;  %3121 = vpow2.f32 %v1155_v4 }
 0x35b   :  { %v4104_v26 = vpop.xlane.xlu1 %1163  ;;  %v4112_v10 = vcvt.s32.f32 %v1083_v32 }
 0x35c   :  { %5379 = vst [vmem:[#allocation58_spill] sm:$0xff] %v4104_v26  ;;  %v4106_v44 = vpop.xlane.xlu0 %1160 }
 0x35f   :  { %v3120_v55 = vpop.eup %3119 }
 0x360   :  { %1101 = vmin.xlane.f32.xlu1 %v4109_v59  ;;  %v1204_v1 = vsel %vm788_vm0, %v3120_v55, 0.0  ;;  %v3122_v17 = vpop.eup %3121  ;;  %v872_v55 = vand.u32 65535, %v3903_v47 }
 0x361   :  { %1205 = vadd.xlane.f32.xlu0 %v1204_v1  ;;  %v1201_v32 = vsel %vm788_vm0, %v3122_v17, 0.0 }
 0x362   :  { %1086 = vmin.xlane.f32.xlu2 %v4112_v10  ;;  %v874_v18 = vcvt.s32.f32 %v872_v55 }
 0x363   :  { %v4117_v45 = vpop.xlane.xlu1 %921 }
 0x364   :  { %v4119_v12 = vpop.xlane.xlu0 %891  ;;  %v879_v26 = vsel %vm878_vm3, %v874_v18, inf  ;;  %vm923_vm4 = vcmp.eq.f32.partialorder %v3942_v58, %v4117_v45  ;;  %v1007_v58 = vand.u32 65535, %v3983_v21  ;;  %v1052_v21 = vand.u32 65535, %v4016_v31 }
 0x365   :  { %vm893_vm2 = vcmp.eq.f32.partialorder %v3944_v34, %v4119_v12 }
 0x366   :  { %v894_v4 = vsel %vm893_vm2, %v889_v50, inf  ;;  %v917_v50 = vand.u32 65535, %v3932_v35 }
 0x368   :  { %895 = vmin.xlane.f32.xlu1 %v894_v4  ;;  %v934_v4 = vcvt.s32.f32 %v932_v11  ;;  %v919_v25 = vcvt.s32.f32 %v917_v50 }
 0x36a   :  { %1202 = vadd.xlane.f32.xlu2 %v1201_v32  ;;  %v924_v32 = vsel %vm923_vm4, %v919_v25, inf  ;;  %vm1575_vm4 = vcmask 162816  }
 0x36b   :  { %v4124_v37 = vpop.xlane.xlu1 %1172 }
 0x36c   :  { %v4127_v1 = vpop.xlane.xlu0 %1169 }
 0x372   :  { %880 = vmin.xlane.f32.xlu2 %v879_v26  ;;  %v962_v26 = vand.u32 65535, %v3958_v57 }
 0x373   :  { %v4132_v34 = vpop.xlane.xlu1 %966 }
 0x374   :  { %v4135_v17 = vpop.xlane.xlu0 %936  ;;  %vm968_vm5 = vcmp.eq.f32.partialorder %v3968_v24, %v4132_v34  ;;  %v964_v35 = vcvt.s32.f32 %v962_v26  ;;  %v1009_v24 = vcvt.s32.f32 %v1007_v58  ;;  %v1022_v26 = vand.u32 65535, %v4013_v38 }
 0x375   :  { %vm938_vm0 = vcmp.eq.f32.partialorder %v3970_v41, %v4135_v17  ;;  %v977_v41 = vand.u32 65535, %v3987_v30 }
 0x376   :  { %v939_v47 = vsel %vm938_vm0, %v934_v4, inf  ;;  %v969_v55 = vsel %vm968_vm5, %v964_v35, inf }
 0x377   :  { %940 = vmin.xlane.f32.xlu1 %v939_v47  ;;  %v979_v4 = vcvt.s32.f32 %v977_v41  ;;  %v1054_v41 = vcvt.s32.f32 %v1052_v21 }
 0x37a   :  { %925 = vmin.xlane.f32.xlu2 %v924_v32  ;;  %v4162_v32 = vpop.permute.xlu2 %1541 }
 0x37b   :  { %v4141_v13 = vpop.xlane.xlu1 %1181 }
 0x37c   :  { %v4144_v18 = vpop.xlane.xlu0 %1178 }
 0x382   :  { %970 = vmin.xlane.f32.xlu2 %v969_v55  ;;  %v1024_v55 = vcvt.s32.f32 %v1022_v26  ;;  %v992_v26 = vand.u32 65535, %v4054_v20 }
 0x383   :  { %v4149_v11 = vpop.xlane.xlu1 %1011 }
 0x384   :  { %v4152_v50 = vpop.xlane.xlu0 %981  ;;  %vm1013_vm7 = vcmp.eq.f32.partialorder %v3994_v22, %v4149_v11 }
 0x385   :  { %vm983_vm6 = vcmp.eq.f32.partialorder %v3996_v7, %v4152_v50  ;;  %v1014_v47 = vsel %vm1013_vm7, %v1009_v24, inf  ;;  %v902_v7 = vand.u32 65535, %v4019_v19 }
 0x386   :  { %v984_v57 = vsel %vm983_vm6, %v979_v4, inf }
 0x387   :  { %985 = vmin.xlane.f32.xlu1 %v984_v57  ;;  %v904_v38 = vcvt.s32.f32 %v902_v7 }
 0x38a   :  { %1015 = vmin.xlane.f32.xlu2 %v1014_v47 }
 0x38b   :  { %v4158_v30 = vpop.xlane.xlu1 %1190 }
 0x38c   :  { %v4160_v25 = vpop.xlane.xlu0 %1187 }
 0x393   :  { %v4167_v35 = vpop.xlane.xlu1 %1056 }
 0x394   :  { %v4169_v22 = vpop.xlane.xlu0 %1026  ;;  %vm1058_vm8 = vcmp.eq.f32.partialorder %v4024_v61, %v4167_v35  ;;  %v947_v61 = vand.u32 65535, %v4041_v16 }
 0x395   :  { %v4173_v58 = vpop.xlane.xlu2 %906  ;;  %v1059_v4 = vsel %vm1058_vm8, %v1054_v41, inf  ;;  %vm1028_vm9 = vcmp.eq.f32.partialorder %v4026_v52, %v4169_v22 }
 0x396   :  { %1060 = vmin.xlane.f32.xlu2 %v1059_v4  ;;  %v1029_v31 = vsel %vm1028_vm9, %v1024_v55, inf  ;;  %vm908_vm10 = vcmp.eq.f32.partialorder %v4029_v6, %v4173_v58  ;;  %v949_v47 = vcvt.s32.f32 %v947_v61  ;;  %v994_v6 = vcvt.s32.f32 %v992_v26 }
 0x397   :  { %1030 = vmin.xlane.f32.xlu1 %v1029_v31  ;;  %v909_v19 = vsel %vm908_vm10, %v904_v38, inf  ;;  %v1067_v4 = vand.u32 65535, %v4078_v28  ;;  %v1097_v28 = vand.u32 65535, %v4097_v42 }
 0x398   :  { %910 = vmin.xlane.f32.xlu0 %v909_v19 }
 0x399   :  { %v1069_v19 = vcvt.s32.f32 %v1067_v4  ;;  %v1099_v26 = vcvt.s32.f32 %v1097_v28 }
 0x39c   :  { %v4195_v55 = vpop.xlane.xlu0 %1196 }
 0x39d   :  { %v4179_v57 = vpop.xlane.xlu2 %1166  ;;  %5380 = vst [vmem:[#allocation59_spill] sm:$0xff] %v4195_v55 }
 0x3a5   :  { %v4182_v24 = vpop.xlane.xlu2 %951 }
 0x3a6   :  { %vm953_vm11 = vcmp.eq.f32.partialorder %v4044_v9, %v4182_v24  ;;  %v1037_v9 = vand.u32 65535, %v4067_v33 }
 0x3a7   :  { %v954_v52 = vsel %vm953_vm11, %v949_v47, inf }
 0x3a8   :  { %955 = vmin.xlane.f32.xlu0 %v954_v52  ;;  %v1039_v38 = vcvt.s32.f32 %v1037_v9 }
 0x3ad   :  { %v4186_v21 = vpop.xlane.xlu2 %1175 }
 0x3b5   :  { %v4189_v7 = vpop.xlane.xlu2 %996 }
 0x3b6   :  { %vm998_vm12 = vcmp.eq.f32.partialorder %v4057_v15, %v4189_v7 }
 0x3b7   :  { %v999_v41 = vsel %vm998_vm12, %v994_v6, inf  ;;  %v1082_v6 = vand.u32 65535, %v4101_v40  ;;  %v883_v40 = vcvt.f32.s32 %v4086_v60 }
 0x3b8   :  { %1000 = vmin.xlane.f32.xlu0 %v999_v41 }
 0x3b9   :  { %v1084_v41 = vcvt.s32.f32 %v1082_v6 }
 0x3bd   :  { %v4193_v16 = vpop.xlane.xlu2 %1184 }
 0x3c5   :  { %v4199_v31 = vpop.xlane.xlu2 %1041 }
 0x3c6   :  { %v4201_v20 = vpop.xlane.xlu0 %1071  ;;  %vm1043_vm13 = vcmp.eq.f32.partialorder %v4081_v53, %v4199_v31 }
 0x3c7   :  { %v1044_v15 = vsel %vm1043_vm13, %v1039_v38, inf  ;;  %vm1073_vm14 = vcmp.eq.f32.partialorder %v4083_v23, %v4201_v20  ;;  %v898_v38 = vcvt.f32.s32 %v4119_v12 }
 0x3c8   :  { %1045 = vmin.xlane.f32.xlu0 %v1044_v15  ;;  %v1074_v61 = vsel %vm1073_vm14, %v1069_v19, inf }
 0x3c9   :  { %1075 = vmin.xlane.f32.xlu1 %v1074_v61  ;;  %v899_v15 = vshll.u32 %v898_v38, 16  ;;  %v884_v61 = vshll.u32 %v883_v40, 16 }
 0x3cb   :  { %v4207_v47 = vpop.xlane.xlu1 %1199 }
 0x3cc   :  { %5381 = vst [vmem:[#allocation60_spill] sm:$0xff] %v4207_v47 }
 0x3cd   :  { %v4209_v33 = vpop.xlane.xlu2 %1193 }
 0x3d3   :  { %v4212_v52 = vpop.xlane.xlu1 %1101 }
 0x3d4   :  { %vm1103_vm15 = vcmp.eq.f32.partialorder %v4109_v59, %v4212_v52 }
 0x3d5   :  { %v4217_v53 = vpop.xlane.xlu2 %1086  ;;  %v1104_v23 = vsel %vm1103_vm15, %v1099_v26, inf }
 0x3d6   :  { %1105 = vmin.xlane.f32.xlu2 %v1104_v23  ;;  %vm1088_vm1 = vcmp.eq.f32.partialorder %v4112_v10, %v4217_v53 }
 0x3d7   :  { %v1089_v9 = vsel %vm1088_vm1, %v1084_v41, inf }
 0x3d8   :  { %1090 = vmin.xlane.f32.xlu0 %v1089_v9 }
 0x3db   :  { %v896_v42 = vpop.xlane.xlu1 %895 }
 0x3dc   :  { %v897_v19 = vcvt.f32.s32 %v896_v42 }
 0x3dd   :  { %v4221_v4 = vpop.xlane.xlu2 %1202 }
 0x3de   :  { %5382 = vst [vmem:[#allocation61_spill] sm:$0xff] %v4221_v4  ;;  %v4225_v28 = vadd.s32 %v899_v15, %v897_v19 }
 0x3e0   :  { %v1448_v10 = vmul.u32 4, %v4225_v28 }
 0x3e2   :  { %v1464_v9 = vsub.s32 %v3892_v29, %v1448_v10 }
 0x3e4   :  { %vm1625_vm5 = vcmp.eq.s32.totalorder %v1464_v9, 1  ;;  %vm1480_vm6 = vcmp.eq.s32.totalorder %v1464_v9, 0  ;;  %vm1785_vm8 = vcmp.eq.s32.totalorder %v1464_v9, 3  ;;  %vm1705_vm9 = vcmp.eq.s32.totalorder %v1464_v9, 2 }
 0x3e5   :  { %v881_v59 = vpop.xlane.xlu2 %880  ;;  %v1641_v15 = vsel %vm1625_vm5, %v3895_v14, 0.0 }
 0x3e6   :  { %v882_v26 = vcvt.f32.s32 %v881_v59  ;;  %v1560_v59 = vsel %vm1480_vm6, %v3895_v14, 0.0 }
 0x3e7   :  { %v1579_v10 = vsel %vm1575_vm4, %v1560_v59, 0.0 }
 0x3e8   :  { %v4227_v6 = vadd.s32 %v884_v61, %v882_v26  ;;  %v1659_v26 = vsel %vm1575_vm4, %v1641_v15, 0.0 }
 0x3ea   :  { %v1447_v23 = vmul.u32 4, %v4227_v6 }
 0x3ec   :  { %v1463_v41 = vsub.s32 %v3892_v29, %v1447_v23 }
 0x3ee   :  { %vm1624_vm2 = vcmp.eq.s32.totalorder %v1463_v41, 1  ;;  %vm1704_vm3 = vcmp.eq.s32.totalorder %v1463_v41, 2  ;;  %vm1479_vm0 = vcmp.eq.s32.totalorder %v1463_v41, 0  ;;  %vm1784_vm7 = vcmp.eq.s32.totalorder %v1463_v41, 3 }
 0x3ef   :  { %v1640_v60 = vsel %vm1624_vm2, %v3886_v51, 0.0  ;;  %v1720_v12 = vsel %vm1704_vm3, %v3886_v51, 0.0  ;;  %v1559_v40 = vsel %vm1479_vm0, %v3886_v51, 0.0  ;;  %v1800_v61 = vsel %vm1784_vm7, %v3886_v51, 0.0 }
 0x3f0   :  { %v1656_v42 = vsel %vm1575_vm4, %v1640_v60, 0.0  ;;  %v1736_v38 = vsel %vm1575_vm4, %v1720_v12, 0.0  ;;  %v1576_v19 = vsel %vm1575_vm4, %v1559_v40, 0.0  ;;  %v1816_v23 = vsel %vm1575_vm4, %v1800_v61, 0.0 }
 0x3f1   :  { %1657 = vadd.xlane.f32.xlu0 %v1656_v42  ;;  %1737 = vadd.xlane.f32.xlu2 %v1736_v38  ;;  %v1801_v60 = vsel %vm1785_vm8, %v3895_v14, 0.0  ;;  %v1721_v41 = vsel %vm1705_vm9, %v3895_v14, 0.0  ;;  %v4249_v42 = vpop.xlane.xlu0 %1205  ;;  %v926_v38 = vpop.xlane.xlu2 %925  ;;  %v928_v40 = vcvt.f32.s32 %v4117_v45 }
 0x3f2   :  { %1577 = vadd.xlane.f32.xlu1 %v1576_v19  ;;  %v1819_v12 = vsel %vm1575_vm4, %v1801_v60, 0.0  ;;  %v1739_v51 = vsel %vm1575_vm4, %v1721_v41, 0.0  ;;  %5383 = vst [vmem:[#allocation62_spill] sm:$0xff] %v4249_v42  ;;  %v913_v19 = vcvt.f32.s32 %v4173_v58  ;;  %v927_v15 = vcvt.f32.s32 %v926_v38 }
 0x3f3   :  { %v929_v59 = vshll.u32 %v928_v40, 16 }
 0x3f4   :  { %v914_v61 = vshll.u32 %v913_v19, 16 }
 0x3f9   :  { %1660 = vadd.xlane.f32.xlu2 %v1659_v26  ;;  %1580 = vadd.xlane.f32.xlu0 %v1579_v10  ;;  %v941_v26 = vpop.xlane.xlu1 %940  ;;  %v4253_v10 = vadd.s32 %v929_v59, %v927_v15 }
 0x3fa   :  { %1817 = vadd.xlane.f32.xlu1 %v1816_v23  ;;  %v943_v23 = vcvt.f32.s32 %v4135_v17  ;;  %v942_v41 = vcvt.f32.s32 %v941_v26 }
 0x3fc   :  { %v944_v45 = vshll.u32 %v943_v23, 16 }
 0x3fe   :  { %v4261_v38 = vadd.s32 %v944_v45, %v942_v41  ;;  %v958_v45 = vcvt.f32.s32 %v4182_v24 }
 0x400   :  { %v1451_v26 = vmul.u32 4, %v4261_v38 }
 0x401   :  { %1820 = vadd.xlane.f32.xlu0 %v1819_v12  ;;  %v1450_v12 = vmul.u32 4, %v4253_v10 }
 0x402   :  { %1740 = vadd.xlane.f32.xlu1 %v1739_v51  ;;  %v1467_v41 = vsub.s32 %v3892_v29, %v1451_v26  ;;  %v971_v26 = vpop.xlane.xlu2 %970 }
 0x403   :  { %v1466_v40 = vsub.s32 %v3892_v29, %v1450_v12 }
 0x404   :  { %vm1483_vm1 = vcmp.eq.s32.totalorder %v1467_v41, 0  ;;  %vm1788_vm0 = vcmp.eq.s32.totalorder %v1467_v41, 3  ;;  %vm1708_vm5 = vcmp.eq.s32.totalorder %v1467_v41, 2  ;;  %vm1628_vm6 = vcmp.eq.s32.totalorder %v1467_v41, 1 }
 0x405   :  { %vm1627_vm13 = vcmp.eq.s32.totalorder %v1466_v40, 1  ;;  %vm1482_vm14 = vcmp.eq.s32.totalorder %v1466_v40, 0  ;;  %vm1787_vm2 = vcmp.eq.s32.totalorder %v1466_v40, 3  ;;  %vm1707_vm3 = vcmp.eq.s32.totalorder %v1466_v40, 2 }
 0x406   :  { %v1562_v23 = vsel %vm1482_vm14, %v3906_v27, 0.0  ;;  %v1723_v24 = vsel %vm1707_vm3, %v3906_v27, 0.0 }
 0x407   :  { %v1745_v40 = vsel %vm1575_vm4, %v1723_v24, 0.0 }
 0x40b   :  { %v911_v9 = vpop.xlane.xlu0 %910 }
 0x40c   :  { %v912_v14 = vcvt.f32.s32 %v911_v9 }
 0x40e   :  { %v4256_v60 = vadd.s32 %v914_v61, %v912_v14  ;;  %v1643_v14 = vsel %vm1627_vm13, %v3906_v27, 0.0 }
 0x410   :  { %v1449_v51 = vmul.u32 4, %v4256_v60 }
 0x412   :  { %v1465_v58 = vsub.s32 %v3892_v29, %v1449_v51 }
 0x414   :  { %vm1706_vm10 = vcmp.eq.s32.totalorder %v1465_v58, 2  ;;  %vm1626_vm11 = vcmp.eq.s32.totalorder %v1465_v58, 1  ;;  %vm1481_vm12 = vcmp.eq.s32.totalorder %v1465_v58, 0  ;;  %vm1786_vm15 = vcmp.eq.s32.totalorder %v1465_v58, 3 }
 0x415   :  { %v1722_v19 = vsel %vm1706_vm10, %v3911_v2, 0.0  ;;  %v1642_v17 = vsel %vm1626_vm11, %v3911_v2, 0.0  ;;  %v1561_v15 = vsel %vm1481_vm12, %v3911_v2, 0.0  ;;  %v1802_v12 = vsel %vm1786_vm15, %v3911_v2, 0.0 }
 0x416   :  { %v1742_v59 = vsel %vm1575_vm4, %v1722_v19, 0.0  ;;  %v1662_v9 = vsel %vm1575_vm4, %v1642_v17, 0.0  ;;  %v1582_v61 = vsel %vm1575_vm4, %v1561_v15, 0.0  ;;  %v1665_v19 = vsel %vm1575_vm4, %v1643_v14, 0.0 }
 0x417   :  { %1743 = vadd.xlane.f32.xlu0 %v1742_v59  ;;  %1663 = vadd.xlane.f32.xlu1 %v1662_v9  ;;  %v1585_v17 = vsel %vm1575_vm4, %v1562_v23, 0.0  ;;  %v1822_v15 = vsel %vm1575_vm4, %v1802_v12, 0.0  ;;  %v959_v59 = vshll.u32 %v958_v45, 16  ;;  %v1563_v9 = vsel %vm1483_vm1, %v3921_v56, 0.0 }
 0x418   :  { %1583 = vadd.xlane.f32.xlu2 %v1582_v61  ;;  %v1803_v2 = vsel %vm1787_vm2, %v3906_v27, 0.0  ;;  %v973_v14 = vcvt.f32.s32 %v4132_v34  ;;  %v1588_v23 = vsel %vm1575_vm4, %v1563_v9, 0.0  ;;  %v1804_v27 = vsel %vm1788_vm0, %v3921_v56, 0.0 }
 0x419   :  { %v1825_v12 = vsel %vm1575_vm4, %v1803_v2, 0.0  ;;  %v1724_v34 = vsel %vm1708_vm5, %v3921_v56, 0.0  ;;  %v988_v9 = vcvt.f32.s32 %v4152_v50  ;;  %v1828_v2 = vsel %vm1575_vm4, %v1804_v27, 0.0 }
 0x41a   :  { %v1748_v24 = vsel %vm1575_vm4, %v1724_v34, 0.0 }
 0x41b   :  { %v956_v51 = vpop.xlane.xlu0 %955 }
 0x41c   :  { %v957_v58 = vcvt.f32.s32 %v956_v51  ;;  %v972_v51 = vcvt.f32.s32 %v971_v26 }
 0x41e   :  { %v4281_v61 = vadd.s32 %v959_v59, %v957_v58  ;;  %v1644_v58 = vsel %vm1628_vm6, %v3921_v56, 0.0  ;;  %v986_v59 = vpop.xlane.xlu1 %985 }
 0x41f   :  { %1666 = vadd.xlane.f32.xlu0 %v1665_v19  ;;  %1586 = vadd.xlane.f32.xlu1 %v1585_v17  ;;  %v974_v19 = vshll.u32 %v973_v14, 16  ;;  %v1668_v41 = vsel %vm1575_vm4, %v1644_v58, 0.0  ;;  %v987_v14 = vcvt.f32.s32 %v986_v59 }
 0x420   :  { %1823 = vadd.xlane.f32.xlu2 %v1822_v15  ;;  %v1452_v45 = vmul.u32 4, %v4281_v61 }
 0x421   :  { %v4291_v17 = vadd.s32 %v974_v19, %v972_v51 }
 0x422   :  { %v1468_v15 = vsub.s32 %v3892_v29, %v1452_v45 }
 0x423   :  { %v1453_v26 = vmul.u32 4, %v4291_v17 }
 0x424   :  { %vm1709_vm7 = vcmp.eq.s32.totalorder %v1468_v15, 2  ;;  %vm1629_vm8 = vcmp.eq.s32.totalorder %v1468_v15, 1  ;;  %vm1484_vm9 = vcmp.eq.s32.totalorder %v1468_v15, 0  ;;  %vm1789_vm12 = vcmp.eq.s32.totalorder %v1468_v15, 3 }
 0x425   :  { %v1725_v56 = vsel %vm1709_vm7, %v3926_v54, 0.0  ;;  %v1645_v50 = vsel %vm1629_vm8, %v3926_v54, 0.0  ;;  %v1564_v51 = vsel %vm1484_vm9, %v3926_v54, 0.0 }
 0x426   :  { %v1751_v45 = vsel %vm1575_vm4, %v1725_v56, 0.0  ;;  %v1671_v19 = vsel %vm1575_vm4, %v1645_v50, 0.0  ;;  %v1591_v27 = vsel %vm1575_vm4, %v1564_v51, 0.0 }
 0x427   :  { %1589 = vadd.xlane.f32.xlu0 %v1588_v23  ;;  %1826 = vadd.xlane.f32.xlu1 %v1825_v12  ;;  %v989_v23 = vshll.u32 %v988_v9, 16  ;;  %v1469_v12 = vsub.s32 %v3892_v29, %v1453_v26 }
 0x428   :  { %1746 = vadd.xlane.f32.xlu2 %v1745_v40 }
 0x429   :  { %v4303_v40 = vadd.s32 %v989_v23, %v987_v14  ;;  %vm1630_vm10 = vcmp.eq.s32.totalorder %v1469_v12, 1  ;;  %vm1485_vm11 = vcmp.eq.s32.totalorder %v1469_v12, 0  ;;  %vm1790_vm14 = vcmp.eq.s32.totalorder %v1469_v12, 3 }
 0x42a   :  { %v1646_v58 = vsel %vm1630_vm10, %v4034_v62, 0.0  ;;  %v1565_v59 = vsel %vm1485_vm11, %v4034_v62, 0.0  ;;  %vm1710_vm15 = vcmp.eq.s32.totalorder %v1469_v12, 2 }
 0x42b   :  { %v1454_v34 = vmul.u32 4, %v4303_v40  ;;  %v1674_v26 = vsel %vm1575_vm4, %v1646_v58, 0.0  ;;  %v1594_v14 = vsel %vm1575_vm4, %v1565_v59, 0.0 }
 0x42d   :  { %v1470_v9 = vsub.s32 %v3892_v29, %v1454_v34 }
 0x42f   :  { %1829 = vadd.xlane.f32.xlu0 %v1828_v2  ;;  %1749 = vadd.xlane.f32.xlu1 %v1748_v24  ;;  %v1805_v2 = vsel %vm1789_vm12, %v3926_v54, 0.0  ;;  %v1001_v24 = vpop.xlane.xlu0 %1000  ;;  %vm1486_vm13 = vcmp.eq.s32.totalorder %v1470_v9, 0  ;;  %v1806_v54 = vsel %vm1790_vm14, %v4034_v62, 0.0  ;;  %vm1791_vm1 = vcmp.eq.s32.totalorder %v1470_v9, 3 }
 0x430   :  { %1669 = vadd.xlane.f32.xlu2 %v1668_v41  ;;  %v1003_v41 = vcvt.f32.s32 %v4189_v7  ;;  %v1831_v23 = vsel %vm1575_vm4, %v1805_v2, 0.0  ;;  %v1002_v15 = vcvt.f32.s32 %v1001_v24  ;;  %v1566_v50 = vsel %vm1486_vm13, %v3939_v5, 0.0 }
 0x431   :  { %v1726_v7 = vsel %vm1710_vm15, %v4034_v62, 0.0  ;;  %v1834_v34 = vsel %vm1575_vm4, %v1806_v54, 0.0  ;;  %vm1711_vm2 = vcmp.eq.s32.totalorder %v1470_v9, 2  ;;  %vm1631_vm3 = vcmp.eq.s32.totalorder %v1470_v9, 1 }
 0x432   :  { %v1004_v56 = vshll.u32 %v1003_v41, 16  ;;  %v1754_v12 = vsel %vm1575_vm4, %v1726_v7, 0.0  ;;  %v1807_v62 = vsel %vm1791_vm1, %v3939_v5, 0.0 }
 0x434   :  { %v4320_v51 = vadd.s32 %v1004_v56, %v1002_v15  ;;  %v1837_v15 = vsel %vm1575_vm4, %v1807_v62, 0.0 }
 0x436   :  { %v1455_v59 = vmul.u32 4, %v4320_v51 }
 0x437   :  { %1752 = vadd.xlane.f32.xlu0 %v1751_v45  ;;  %1672 = vadd.xlane.f32.xlu1 %v1671_v19  ;;  %v1016_v45 = vpop.xlane.xlu2 %1015  ;;  %v1018_v19 = vcvt.f32.s32 %v4149_v11  ;;  %v1727_v11 = vsel %vm1711_vm2, %v3939_v5, 0.0 }
 0x438   :  { %1592 = vadd.xlane.f32.xlu2 %v1591_v27  ;;  %v1597_v27 = vsel %vm1575_vm4, %v1566_v50, 0.0  ;;  %v1017_v58 = vcvt.f32.s32 %v1016_v45  ;;  %v1471_v41 = vsub.s32 %v3892_v29, %v1455_v59  ;;  %v1757_v56 = vsel %vm1575_vm4, %v1727_v11, 0.0 }
 0x439   :  { %v1019_v2 = vshll.u32 %v1018_v19, 16 }
 0x43a   :  { %vm1712_vm0 = vcmp.eq.s32.totalorder %v1471_v41, 2  ;;  %vm1632_vm5 = vcmp.eq.s32.totalorder %v1471_v41, 1  ;;  %vm1487_vm6 = vcmp.eq.s32.totalorder %v1471_v41, 0  ;;  %vm1792_vm9 = vcmp.eq.s32.totalorder %v1471_v41, 3 }
 0x43b   :  { %v4330_v24 = vadd.s32 %v1019_v2, %v1017_v58 }
 0x43d   :  { %5384 = vst [vmem:[#allocation63_spill] sm:$0xff] %v4330_v24  ;;  %v1456_v50 = vmul.u32 4, %v4330_v24 }
 0x43f   :  { %1675 = vadd.xlane.f32.xlu0 %v1674_v26  ;;  %1595 = vadd.xlane.f32.xlu1 %v1594_v14  ;;  %v1647_v26 = vsel %vm1631_vm3, %v3939_v5, 0.0  ;;  %v1031_v14 = vpop.xlane.xlu1 %1030  ;;  %v1728_v5 = vsel %vm1712_vm0, %v3952_v49, 0.0  ;;  %v1472_v45 = vsub.s32 %v3892_v29, %v1456_v50 }
 0x440   :  { %1832 = vadd.xlane.f32.xlu2 %v1831_v23  ;;  %v1033_v23 = vcvt.f32.s32 %v4169_v22  ;;  %v1677_v9 = vsel %vm1575_vm4, %v1647_v26, 0.0  ;;  %v1032_v54 = vcvt.f32.s32 %v1031_v14  ;;  %v1648_v22 = vsel %vm1632_vm5, %v3952_v49, 0.0  ;;  %v1046_v14 = vpop.xlane.xlu0 %1045 }
 0x441   :  { %vm1633_vm7 = vcmp.eq.s32.totalorder %v1472_v45, 1  ;;  %vm1488_vm8 = vcmp.eq.s32.totalorder %v1472_v45, 0  ;;  %v1808_v26 = vsel %vm1792_vm9, %v3952_v49, 0.0  ;;  %v1047_v41 = vcvt.f32.s32 %v1046_v14 }
 0x442   :  { %v1034_v7 = vshll.u32 %v1033_v23, 16  ;;  %v1649_v2 = vsel %vm1633_vm7, %v4050_v3, 0.0  ;;  %v1568_v62 = vsel %vm1488_vm8, %v4050_v3, 0.0  ;;  %v1048_v23 = vcvt.f32.s32 %v4199_v31 }
 0x443   :  { %vm1793_vm11 = vcmp.eq.s32.totalorder %v1472_v45, 3  ;;  %vm1713_vm12 = vcmp.eq.s32.totalorder %v1472_v45, 2 }
 0x444   :  { %v4342_v19 = vadd.s32 %v1034_v7, %v1032_v54  ;;  %v1049_v50 = vshll.u32 %v1048_v23, 16  ;;  %v1729_v31 = vsel %vm1713_vm12, %v4050_v3, 0.0 }
 0x445   :  { %v1763_v45 = vsel %vm1575_vm4, %v1729_v31, 0.0 }
 0x446   :  { %5385 = vst [vmem:[#allocation64_spill] sm:$0xff] %v4342_v19  ;;  %v1457_v59 = vmul.u32 4, %v4342_v19  ;;  %v4359_v7 = vadd.s32 %v1049_v50, %v1047_v41  ;;  %v5393_v19 = vld [vmem:[#allocation43_spill] sm:$0xff] }
 0x447   :  { %1598 = vadd.xlane.f32.xlu0 %v1597_v27  ;;  %1835 = vadd.xlane.f32.xlu1 %v1834_v34  ;;  %v1567_v27 = vsel %vm1487_vm6, %v3952_v49, 0.0  ;;  %v1760_v34 = vsel %vm1575_vm4, %v1728_v5, 0.0  ;;  %v1809_v49 = vsel %vm1793_vm11, %v4050_v3, 0.0  ;;  %v1061_v5 = vpop.xlane.xlu2 %1060 }
 0x448   :  { %1755 = vadd.xlane.f32.xlu2 %v1754_v12  ;;  %v1680_v12 = vsel %vm1575_vm4, %v1648_v22, 0.0  ;;  %v1600_v58 = vsel %vm1575_vm4, %v1567_v27, 0.0  ;;  %v1473_v11 = vsub.s32 %v3892_v29, %v1457_v59  ;;  %5386 = vst [vmem:[#allocation65_spill] sm:$0xff] %v4359_v7  ;;  %v1063_v22 = vcvt.f32.s32 %v4167_v35  ;;  %v1076_v27 = vpop.xlane.xlu1 %1075 }
 0x449   :  { %v1062_v59 = vcvt.f32.s32 %v1061_v5 }
 0x44a   :  { %vm1489_vm10 = vcmp.eq.s32.totalorder %v1473_v11, 0  ;;  %vm1794_vm13 = vcmp.eq.s32.totalorder %v1473_v11, 3  ;;  %vm1714_vm14 = vcmp.eq.s32.totalorder %v1473_v11, 2  ;;  %vm1634_vm15 = vcmp.eq.s32.totalorder %v1473_v11, 1 }
 0x44b   :  { %v1569_v54 = vsel %vm1489_vm10, %v3972_v63, 0.0  ;;  %v1064_v3 = vshll.u32 %v1063_v22, 16  ;;  %v1810_v35 = vsel %vm1794_vm13, %v3972_v63, 0.0  ;;  %v1650_v23 = vsel %vm1634_vm15, %v3972_v63, 0.0 }
 0x44c   :  { %v1846_v41 = vsel %vm1575_vm4, %v1810_v35, 0.0  ;;  %v1686_v50 = vsel %vm1575_vm4, %v1650_v23, 0.0 }
 0x44f   :  { %1838 = vadd.xlane.f32.xlu0 %v1837_v15  ;;  %1758 = vadd.xlane.f32.xlu1 %v1757_v56  ;;  %v1683_v15 = vsel %vm1575_vm4, %v1649_v2, 0.0  ;;  %v1603_v56 = vsel %vm1575_vm4, %v1568_v62, 0.0  ;;  %v1458_v2 = vmul.u32 4, %v4359_v7  ;;  %v1730_v62 = vsel %vm1714_vm14, %v3972_v63, 0.0  ;;  %v4384_v63 = vpop.xlane.xlu2 %1105 }
 0x450   :  { %1678 = vadd.xlane.f32.xlu2 %v1677_v9  ;;  %v1840_v9 = vsel %vm1575_vm4, %v1808_v26, 0.0  ;;  %v4371_v26 = vadd.s32 %v1064_v3, %v1062_v59  ;;  %v1766_v11 = vsel %vm1575_vm4, %v1730_v62, 0.0 }
 0x451   :  { %v1474_v14 = vsub.s32 %v3892_v29, %v1458_v2 }
 0x452   :  { %5387 = vst [vmem:[#allocation66_spill] sm:$0xff] %v4371_v26 }
 0x453   :  { %vm1715_vm1 = vcmp.eq.s32.totalorder %v1474_v14, 2  ;;  %vm1635_vm2 = vcmp.eq.s32.totalorder %v1474_v14, 1  ;;  %vm1490_vm3 = vcmp.eq.s32.totalorder %v1474_v14, 0  ;;  %vm1795_vm6 = vcmp.eq.s32.totalorder %v1474_v14, 3 }
 0x454   :  { %v1731_v31 = vsel %vm1715_vm1, %v3992_v43, 0.0  ;;  %v1651_v5 = vsel %vm1635_vm2, %v3992_v43, 0.0 }
 0x457   :  { %1761 = vadd.xlane.f32.xlu0 %v1760_v34  ;;  %1681 = vadd.xlane.f32.xlu1 %v1680_v12  ;;  %v4363_v34 = vpop.xlane.xlu0 %1090  ;;  %v1606_v12 = vsel %vm1575_vm4, %v1569_v54, 0.0  ;;  %v1459_v54 = vmul.u32 4, %v4371_v26  ;;  %v5392_v26 = vld [vmem:[#allocation13_spill] sm:$0xff] }
 0x458   :  { %1601 = vadd.xlane.f32.xlu2 %v1600_v58  ;;  %v1843_v58 = vsel %vm1575_vm4, %v1809_v49, 0.0  ;;  %v1077_v49 = vcvt.f32.s32 %v1076_v27  ;;  %v1689_v27 = vsel %vm1575_vm4, %v1651_v5, 0.0  ;;  %v1092_v14 = vcvt.f32.s32 %v4363_v34 }
 0x459   :  { %v1475_v22 = vsub.s32 %v3892_v29, %v1459_v54  ;;  %v1108_v34 = vcvt.f32.s32 %v4212_v52 }
 0x45b   :  { %vm1636_vm0 = vcmp.eq.s32.totalorder %v1475_v22, 1  ;;  %vm1491_vm5 = vcmp.eq.s32.totalorder %v1475_v22, 0  ;;  %vm1796_vm8 = vcmp.eq.s32.totalorder %v1475_v22, 3  ;;  %vm1716_vm9 = vcmp.eq.s32.totalorder %v1475_v22, 2 }
 0x45c   :  { %v1652_v23 = vsel %vm1636_vm0, %v4069_v0, 0.0 }
 0x45d   :  { %v1692_v54 = vsel %vm1575_vm4, %v1652_v23, 0.0 }
 0x45f   :  { %1684 = vadd.xlane.f32.xlu0 %v1683_v15  ;;  %1604 = vadd.xlane.f32.xlu1 %v1603_v56  ;;  %v1078_v15 = vcvt.f32.s32 %v4201_v20 }
 0x460   :  { %1841 = vadd.xlane.f32.xlu2 %v1840_v9 }
 0x461   :  { %v1079_v20 = vshll.u32 %v1078_v15, 16  ;;  %v1571_v15 = vsel %vm1491_vm5, %v4069_v0, 0.0 }
 0x464   :  { %v4378_v9 = vpop.xlane.xlu0 %1657  ;;  %v4400_v62 = vpop.xlane.xlu2 %1737 }
 0x465   :  { %v4376_v56 = vpop.xlane.xlu1 %1577 }
 0x467   :  { %1607 = vadd.xlane.f32.xlu0 %v1606_v12  ;;  %1844 = vadd.xlane.f32.xlu1 %v1843_v58  ;;  %v4389_v12 = vadd.s32 %v1079_v20, %v1077_v49  ;;  %v1570_v58 = vsel %vm1490_vm3, %v3992_v43, 0.0  ;;  %v1612_v49 = vsel %vm1575_vm4, %v1571_v15, 0.0  ;;  %v1107_v15 = vcvt.f32.s32 %v4384_v63 }
 0x468   :  { %1764 = vadd.xlane.f32.xlu2 %v1763_v45  ;;  %v1769_v45 = vsel %vm1575_vm4, %v1731_v31, 0.0  ;;  %v1609_v59 = vsel %vm1575_vm4, %v1570_v58, 0.0 }
 0x469   :  { %5388 = vst [vmem:[#allocation67_spill] sm:$0xff] %v4389_v12  ;;  %v1460_v2 = vmul.u32 4, %v4389_v12 }
 0x46c   :  { %v4398_v35 = vpop.xlane.xlu0 %1580 }
 0x46d   :  { %v4396_v3 = vpop.xlane.xlu1 %1817 }
 0x46f   :  { %1847 = vadd.xlane.f32.xlu0 %v1846_v41  ;;  %1767 = vadd.xlane.f32.xlu1 %v1766_v11  ;;  %v1476_v41 = vsub.s32 %v3892_v29, %v1460_v2  ;;  %v1811_v11 = vsel %vm1795_vm6, %v3992_v43, 0.0  ;;  %vm2680_vm6 = vcmask 203776  }
 0x470   :  { %1687 = vadd.xlane.f32.xlu2 %v1686_v50  ;;  %v1093_v50 = vcvt.f32.s32 %v4217_v53  ;;  %v1849_v20 = vsel %vm1575_vm4, %v1811_v11, 0.0  ;;  %v4415_v53 = vpop.xlane.xlu2 %1660 }
 0x471   :  { %vm1492_vm7 = vcmp.eq.s32.totalorder %v1476_v41, 0  ;;  %vm1797_vm10 = vcmp.eq.s32.totalorder %v1476_v41, 3  ;;  %vm1717_vm11 = vcmp.eq.s32.totalorder %v1476_v41, 2  ;;  %vm1637_vm12 = vcmp.eq.s32.totalorder %v1476_v41, 1 }
 0x472   :  { %v1094_v31 = vshll.u32 %v1093_v50, 16  ;;  %v1572_v58 = vsel %vm1492_vm7, %v4061_v8, 0.0  ;;  %v1109_v50 = vshll.u32 %v1108_v34, 16 }
 0x473   :  { %v1615_v2 = vsel %vm1575_vm4, %v1572_v58, 0.0 }
 0x474   :  { %v4413_v43 = vpop.xlane.xlu0 %1820 }
 0x475   :  { %v4411_v5 = vpop.xlane.xlu1 %1740 }
 0x477   :  { %1770 = vadd.xlane.f32.xlu0 %v1769_v45  ;;  %1690 = vadd.xlane.f32.xlu1 %v1689_v27  ;;  %v1812_v45 = vsel %vm1796_vm8, %v4069_v0, 0.0  ;;  %v4419_v27 = vadd.s32 %v1094_v31, %v1092_v14  ;;  %v4436_v14 = vadd.s32 %v1109_v50, %v1107_v15  ;;  %v1653_v31 = vsel %vm1637_vm12, %v4061_v8, 0.0 }
 0x478   :  { %1610 = vadd.xlane.f32.xlu2 %v1609_v59  ;;  %v1732_v59 = vsel %vm1716_vm9, %v4069_v0, 0.0  ;;  %v1852_v22 = vsel %vm1575_vm4, %v1812_v45, 0.0  ;;  %v1695_v45 = vsel %vm1575_vm4, %v1653_v31, 0.0  ;;  %v1864_v31 = vmin.f32 %v4400_v62, 4.1351666 }
 0x479   :  { %5389 = vst [vmem:[#allocation68_spill] sm:$0xff] %v4419_v27  ;;  %v1772_v23 = vsel %vm1575_vm4, %v1732_v59, 0.0  ;;  %v1461_v11 = vmul.u32 4, %v4419_v27  ;;  %v1462_v59 = vmul.u32 4, %v4436_v14 }
 0x47a   :  { %5390 = vst [vmem:[#allocation69_spill] sm:$0xff] %v4436_v14 }
 0x47b   :  { %v1477_v63 = vsub.s32 %v3892_v29, %v1461_v11  ;;  %v1478_v15 = vsub.s32 %v3892_v29, %v1462_v59 }
 0x47d   :  { %vm1718_vm13 = vcmp.eq.s32.totalorder %v1477_v63, 2  ;;  %vm1638_vm14 = vcmp.eq.s32.totalorder %v1477_v63, 1  ;;  %vm1493_vm15 = vcmp.eq.s32.totalorder %v1477_v63, 0  ;;  %vm1639_vm1 = vcmp.eq.s32.totalorder %v1478_v15, 1 }
 0x47e   :  { %v1573_v11 = vsel %vm1493_vm15, %v4071_v46, 0.0  ;;  %vm1494_vm2 = vcmp.eq.s32.totalorder %v1478_v15, 0  ;;  %vm1798_vm3 = vcmp.eq.s32.totalorder %v1477_v63, 3  ;;  %vm1799_vm0 = vcmp.eq.s32.totalorder %v1478_v15, 3 }
 0x47f   :  { %1693 = vadd.xlane.f32.xlu0 %v1692_v54  ;;  %1613 = vadd.xlane.f32.xlu1 %v1612_v49  ;;  %v1813_v49 = vsel %vm1797_vm10, %v4061_v8, 0.0  ;;  %v1574_v59 = vsel %vm1494_vm2, %v4162_v32, 0.0  ;;  %vm1719_vm5 = vcmp.eq.s32.totalorder %v1478_v15, 2  ;;  %vm2748_vm15 = vcmask 236544  }
 0x480   :  { %1850 = vadd.xlane.f32.xlu2 %v1849_v20  ;;  %v1733_v20 = vsel %vm1717_vm11, %v4061_v8, 0.0  ;;  %v1855_v58 = vsel %vm1575_vm4, %v1813_v49, 0.0  ;;  %v1734_v8 = vsel %vm1718_vm13, %v4071_v46, 0.0  ;;  %v1621_v62 = vsel %vm1575_vm4, %v1574_v59, 0.0 }
 0x481   :  { %v1775_v41 = vsel %vm1575_vm4, %v1733_v20, 0.0  ;;  %v1778_v50 = vsel %vm1575_vm4, %v1734_v8, 0.0  ;;  %v1618_v20 = vsel %vm1575_vm4, %v1573_v11, 0.0  ;;  %v2216_v8 = vmul.f32 1.442695, %v1864_v31 }
 0x482   :  { %v1735_v59 = vsel %vm1719_vm5, %v4162_v32, 0.0  ;;  %vm2697_vm11 = vcmask 211968   ;;  %vm2714_vm13 = vcmask 220160   ;;  %vm2782_vm2 = vcmask 252928  }
 0x483   :  { %3123 = vpow2.f32 %v2216_v8 }
 0x487   :  { %1616 = vadd.xlane.f32.xlu0 %v1615_v2  ;;  %1853 = vadd.xlane.f32.xlu1 %v1852_v22 }
 0x488   :  { %1773 = vadd.xlane.f32.xlu2 %v1772_v23  ;;  %v1654_v23 = vsel %vm1638_vm14, %v4071_v46, 0.0  ;;  %vm2731_vm14 = vcmask 228352  }
 0x489   :  { %v1698_v49 = vsel %vm1575_vm4, %v1654_v23, 0.0  ;;  %v1814_v23 = vsel %vm1798_vm3, %v4071_v46, 0.0  ;;  %v1815_v46 = vsel %vm1799_vm0, %v4162_v32, 0.0 }
 0x48a   :  { %v4428_v0 = vpop.xlane.xlu1 %1663  ;;  %v4430_v52 = vpop.xlane.xlu0 %1743  ;;  %v1858_v63 = vsel %vm1575_vm4, %v1814_v23, 0.0  ;;  %v1861_v8 = vsel %vm1575_vm4, %v1815_v46, 0.0 }
 0x48b   :  { %v4432_v54 = vpop.xlane.xlu2 %1583  ;;  %v3124_v23 = vpop.eup %3123  ;;  %v1866_v15 = vmin.f32 %v4430_v52, 4.1351666 }
 0x48d   :  { %v2220_v46 = vmul.f32 1.442695, %v1866_v15  ;;  %v2185_v15 = vmul.f32 %v3630_v48, %v4415_v53 }
 0x48f   :  { %1856 = vadd.xlane.f32.xlu0 %v1855_v58  ;;  %1776 = vadd.xlane.f32.xlu1 %v1775_v41 }
 0x490   :  { %1696 = vadd.xlane.f32.xlu2 %v1695_v45  ;;  %v1655_v45 = vsel %vm1639_vm1, %v4162_v32, 0.0  ;;  %v2088_v32 = vmul.f32 %v3612_v36, %v4376_v56  ;;  %vm2765_vm1 = vcmask 244736  }
 0x491   :  { %v1701_v11 = vsel %vm1575_vm4, %v1655_v45, 0.0 }
 0x492   :  { %v4444_v34 = vpop.xlane.xlu1 %1586  ;;  %v4446_v2 = vpop.xlane.xlu0 %1666  ;;  %v2168_v52 = vadd.f32 %v3835_v39, %v2088_v32 }
 0x493   :  { %v4448_v22 = vpop.xlane.xlu2 %1823 }
 0x497   :  { %1779 = vadd.xlane.f32.xlu0 %v1778_v50  ;;  %1699 = vadd.xlane.f32.xlu1 %v1698_v49  ;;  %v1881_v50 = vmin.f32 %v4413_v43, 4.1351666  ;;  %v1781_v43 = vsel %vm1575_vm4, %v1735_v59, 0.0  ;;  %vm1212_vm4 = vweird.f32 %v4106_v44 }
 0x498   :  { %1619 = vadd.xlane.f32.xlu2 %v1618_v20 }
 0x499   :  { %v2266_v45 = vmul.f32 1.442695, %v1881_v50 }
 0x49a   :  { %v4458_v58 = vpop.xlane.xlu1 %1826  ;;  %v4460_v41 = vpop.xlane.xlu0 %1589 }
 0x49b   :  { %v4462_v29 = vpop.xlane.xlu2 %1746  ;;  %3125 = vpow2.f32 %v2266_v45  ;;  %v1865_v45 = vmin.f32 %v4411_v5, 4.1351666 }
 0x49c   :  { %v1867_v53 = vmin.f32 %v4462_v29, 4.1351666 }
 0x49f   :  { %1702 = vadd.xlane.f32.xlu0 %v1701_v11  ;;  %1622 = vadd.xlane.f32.xlu1 %v1621_v62  ;;  %v1880_v11 = vmin.f32 %v4396_v3, 4.1351666  ;;  %v2248_v62 = vmul.f32 %v3124_v23, %v3612_v36 }
 0x4a0   :  { %1859 = vadd.xlane.f32.xlu2 %v1858_v63 }
 0x4a1   :  { %v2264_v63 = vmul.f32 1.442695, %v1880_v11  ;;  %v3126_v59 = vpop.eup %3125  ;;  %v1882_v11 = vmin.f32 %v4448_v22, 4.1351666 }
 0x4a2   :  { %v4471_v49 = vpop.xlane.xlu1 %1749  ;;  %v4473_v20 = vpop.xlane.xlu0 %1829  ;;  %v2297_v27 = vmul.f32 %v3126_v59, %v3630_v48  ;;  %v2184_v59 = vmul.f32 %v3612_v36, %v4378_v9  ;;  %v2222_v9 = vmul.f32 1.442695, %v1867_v53  ;;  %v1883_v53 = vmin.f32 %v4458_v58, 4.1351666 }
 0x4a3   :  { %v4475_v31 = vpop.xlane.xlu2 %1669  ;;  %3127 = vpow2.f32 %v2264_v63  ;;  %v2268_v5 = vmul.f32 1.442695, %v1882_v11  ;;  %v1884_v24 = vmin.f32 %v4473_v20, 4.1351666 }
 0x4a4   :  { %3129 = vpow2.f32 %v2220_v46  ;;  %v4505_v22 = vmul.f32 0.5, %v2297_v27  ;;  %v5391_v46 = vld [vmem:[#allocation39_spill] sm:$0xff] }
 0x4a7   :  { %1862 = vadd.xlane.f32.xlu1 %v1861_v8  ;;  %v2312_v8 = vmul.f32 0.5, %v2248_v62 }
 0x4a8   :  { %1782 = vadd.xlane.f32.xlu2 %v1781_v43  ;;  %v2218_v43 = vmul.f32 1.442695, %v1865_v45  ;;  %v2201_v45 = vadd.f32 %v2185_v15, %v5391_v46 }
 0x4a9   :  { %v2376_v23 = vadd.f32 %v2312_v8, %v2168_v52  ;;  %v3128_v42 = vpop.eup %3127 }
 0x4aa   :  { %v4484_v14 = vpop.xlane.xlu1 %1672  ;;  %v4486_v50 = vpop.xlane.xlu0 %1752  ;;  %3131 = vpow2.f32 %v2218_v43  ;;  %v2296_v32 = vmul.f32 %v3128_v42, %v3612_v36  ;;  %v2361_v7 = vsub.f32 %v2201_v45, %v4505_v22  ;;  %v2090_v42 = vmul.f32 %v5392_v26, %v4432_v54 }
 0x4ab   :  { %v4490_v3 = vpop.xlane.xlu2 %1592  ;;  %v3130_v63 = vpop.eup %3129  ;;  %3133 = vpow2.f32 %v2268_v5  ;;  %v2200_v36 = vadd.f32 %v2184_v59, %v3835_v39  ;;  %v2089_v54 = vmul.f32 %v3630_v48, %v4398_v35  ;;  %v2186_v59 = vmul.f32 %v5392_v26, %v4428_v0  ;;  %v5394_v0 = vld [vmem:[#allocation14_spill] sm:$0xff] }
 0x4ac   :  { %v2250_v4 = vmul.f32 %v3130_v63, %v5392_v26  ;;  %v2328_v63 = vsub.f32 %v2168_v52, %v2312_v8  ;;  %v2170_v55 = vadd.f32 %v5393_v19, %v2090_v42  ;;  %3135 = vpow2.f32 %v2222_v9 }
 0x4ad   :  { %v2272_v35 = vmul.f32 1.442695, %v1884_v24  ;;  %v2091_v58 = vmul.f32 %v5394_v0, %v4444_v34 }
 0x4ae   :  { %v4524_v29 = vmul.f32 0.5, %v2250_v4 }
 0x4af   :  { %3137 = vpow2.f32 %v2272_v35  ;;  %v5395_v35 = vld [vmem:[#allocation40_spill] sm:$0xff] }
 0x4b0   :  { %v3132_v43 = vpop.eup %3131  ;;  %v2330_v4 = vsub.f32 %v2170_v55, %v4524_v29 }
 0x4b1   :  { %v3134_v5 = vpop.eup %3133 }
 0x4b2   :  { %v4496_v12 = vpop.xlane.xlu1 %1595  ;;  %v4498_v56 = vpop.xlane.xlu0 %1675  ;;  %v2298_v39 = vmul.f32 %v3134_v5, %v5392_v26  ;;  %v2202_v5 = vadd.f32 %v2186_v59, %v5393_v19  ;;  %v2270_v26 = vmul.f32 1.442695, %v1883_v53  ;;  %v2171_v53 = vadd.f32 %v5395_v35, %v2091_v58 }
 0x4b3   :  { %v4502_v62 = vpop.xlane.xlu2 %1832  ;;  %2568 = vrot.lane.b32.xlu0 %v2376_v23, %s3329_s6  ;;  %v2344_v23 = vmul.f32 0.5, %v2296_v32  ;;  %v2249_v32 = vmul.f32 %v3132_v43, %v3630_v48  ;;  %v3136_v43 = vpop.eup %3135  ;;  %v2378_v58 = vadd.f32 %v4524_v29, %v2170_v55 }
 0x4b4   :  { %v2346_v20 = vmul.f32 0.5, %v2298_v39  ;;  %3139 = vpow2.f32 %v2270_v26 }
 0x4b5   :  { %v2360_v47 = vsub.f32 %v2200_v36, %v2344_v23  ;;  %v2392_v9 = vadd.f32 %v2344_v23, %v2200_v36  ;;  %v1868_v36 = vmin.f32 %v4471_v49, 4.1351666  ;;  %v3138_v39 = vpop.eup %3137 }
 0x4b7   :  { %v2224_v34 = vmul.f32 1.442695, %v1868_v36  ;;  %v5397_v36 = vld [vmem:[#allocation42_spill] sm:$0xff] }
 0x4ba   :  { %v4514_v11 = vpop.xlane.xlu1 %1835  ;;  %v4516_v27 = vpop.xlane.xlu0 %1598 }
 0x4bb   :  { %v4520_v15 = vpop.xlane.xlu2 %1755  ;;  %2506 = vrot.lane.b32.xlu0 %v2361_v7, %s3330_s5  ;;  %v2313_v7 = vmul.f32 0.5, %v2249_v32  ;;  %v2251_v32 = vmul.f32 %v3136_v43, %v5394_v0  ;;  %v1885_v43 = vmin.f32 %v4502_v62, 4.1351666 }
 0x4bd   :  { %v2274_v62 = vmul.f32 1.442695, %v1885_v43 }
 0x4c0   :  { %2504 = vrot.lane.b32.xlu2 %v2360_v47, %s3330_s5  ;;  %2440 = vrot.lane.b32.xlu1 %v2328_v63, %s3330_s5  ;;  %v2169_v47 = vadd.f32 %v5391_v46, %v2089_v54  ;;  %v1869_v63 = vmin.f32 %v4486_v50, 4.1351666  ;;  %v2394_v46 = vadd.f32 %v2346_v20, %v2202_v5  ;;  %v2315_v50 = vmul.f32 0.5, %v2251_v32  ;;  %v3140_v32 = vpop.eup %3139 }
 0x4c2   :  { %v4535_v8 = vpop.xlane.xlu1 %1758  ;;  %v4537_v52 = vpop.xlane.xlu0 %1838  ;;  %v2329_v42 = vsub.f32 %v2169_v47, %v2313_v7  ;;  %v2226_v19 = vmul.f32 1.442695, %v1869_v63  ;;  %v2377_v59 = vadd.f32 %v2313_v7, %v2169_v47  ;;  %v2379_v63 = vadd.f32 %v2315_v50, %v2171_v53 }
 0x4c3   :  { %v4541_v48 = vpop.xlane.xlu2 %1678  ;;  %2444 = vrot.lane.b32.xlu0 %v2330_v4, %s3330_s5  ;;  %v2393_v4 = vadd.f32 %v4505_v22, %v2201_v45 }
 0x4c4   :  { %3141 = vpow2.f32 %v2226_v19  ;;  %v2362_v19 = vsub.f32 %v2202_v5, %v2346_v20 }
 0x4c5   :  { %3143 = vpow2.f32 %v2224_v34 }
 0x4c6   :  { %3145 = vpow2.f32 %v2274_v62 }
 0x4c8   :  { %2442 = vrot.lane.b32.xlu2 %v2329_v42, %s3330_s5  ;;  %2632 = vrot.lane.b32.xlu1 %v2392_v9, %s3329_s6  ;;  %v5396_v42 = vld [vmem:[#allocation17_spill] sm:$0xff] }
 0x4c9   :  { %v2300_v9 = vmul.f32 %v3138_v39, %v5396_v42  ;;  %v2188_v22 = vmul.f32 %v5396_v42, %v4475_v31  ;;  %v1870_v31 = vmin.f32 %v4520_v15, 4.1351666 }
 0x4ca   :  { %v4551_v24 = vpop.xlane.xlu1 %1681  ;;  %v4553_v54 = vpop.xlane.xlu0 %1761 }
 0x4cb   :  { %v4557_v23 = vpop.xlane.xlu2 %1601  ;;  %2636 = vrot.lane.b32.xlu0 %v2394_v46, %s3329_s6  ;;  %v4576_v7 = vmul.f32 0.5, %v2300_v9  ;;  %v3142_v47 = vpop.eup %3141  ;;  %v2299_v46 = vmul.f32 %v3140_v32, %v5394_v0  ;;  %v2204_v39 = vadd.f32 %v2188_v22, %v5397_v36  ;;  %v2228_v5 = vmul.f32 1.442695, %v1870_v31 }
 0x4cc   :  { %v3144_v29 = vpop.eup %3143 }
 0x4cd   :  { %v2364_v34 = vsub.f32 %v2204_v39, %v4576_v7  ;;  %v2347_v9 = vmul.f32 0.5, %v2299_v46  ;;  %v3146_v32 = vpop.eup %3145  ;;  %v2252_v22 = vmul.f32 %v3144_v29, %v5396_v42  ;;  %v5399_v46 = vld [vmem:[#allocation46_spill] sm:$0xff]  ;;  %3147 = vpow2.f32 %v2228_v5 }
 0x4ce   :  { %v1886_v29 = vmin.f32 %v4514_v11, 4.1351666 }
 0x4cf   :  { %v2316_v31 = vmul.f32 0.5, %v2252_v22 }
 0x4d0   :  { %2634 = vrot.lane.b32.xlu2 %v2393_v4, %s3329_s6  ;;  %2570 = vrot.lane.b32.xlu1 %v2377_v59, %s3329_s6  ;;  %v2187_v4 = vmul.f32 %v5394_v0, %v4446_v2  ;;  %v5398_v59 = vld [vmem:[#allocation20_spill] sm:$0xff] }
 0x4d1   :  { %v2253_v43 = vmul.f32 %v3142_v47, %v5398_v59  ;;  %v2093_v2 = vmul.f32 %v5398_v59, %v4490_v3  ;;  %v2331_v47 = vsub.f32 %v2171_v53, %v2315_v50  ;;  %v1887_v3 = vmin.f32 %v4537_v52, 4.1351666 }
 0x4d2   :  { %v4567_v26 = vpop.xlane.xlu1 %1604  ;;  %v4569_v49 = vpop.xlane.xlu0 %1684  ;;  %v2203_v15 = vadd.f32 %v2187_v4, %v5395_v35  ;;  %v2301_v35 = vmul.f32 %v3146_v32, %v5398_v59  ;;  %v2189_v50 = vmul.f32 %v5398_v59, %v4484_v14  ;;  %v1872_v14 = vmin.f32 %v4553_v54, 4.1351666 }
 0x4d3   :  { %v4573_v45 = vpop.xlane.xlu2 %1841  ;;  %2574 = vrot.lane.b32.xlu0 %v2379_v63, %s3329_s6  ;;  %v4598_v0 = vmul.f32 0.5, %v2253_v43  ;;  %v2278_v52 = vmul.f32 1.442695, %v1887_v3  ;;  %v2276_v59 = vmul.f32 1.442695, %v1886_v29 }
 0x4d4   :  { %v2363_v62 = vsub.f32 %v2203_v15, %v2347_v9  ;;  %v2395_v32 = vadd.f32 %v2347_v9, %v2203_v15  ;;  %v2205_v22 = vadd.f32 %v2189_v50, %v5399_v46  ;;  %v2232_v9 = vmul.f32 1.442695, %v1872_v14 }
 0x4d5   :  { %3149 = vpow2.f32 %v2278_v52  ;;  %v1871_v15 = vmin.f32 %v4535_v8, 4.1351666  ;;  %v5401_v52 = vld [vmem:[#allocation44_spill] sm:$0xff] }
 0x4d6   :  { %3151 = vpow2.f32 %v2276_v59 }
 0x4d7   :  { %3153 = vpow2.f32 %v2232_v9  ;;  %v5403_v9 = vld [vmem:[#allocation45_spill] sm:$0xff] }
 0x4d8   :  { %2572 = vrot.lane.b32.xlu2 %v2378_v58, %s3329_s6  ;;  %2508 = vrot.lane.b32.xlu1 %v2362_v19, %s3330_s5  ;;  %v2173_v58 = vadd.f32 %v5399_v46, %v2093_v2  ;;  %v2092_v19 = vmul.f32 %v5396_v42, %v4460_v41  ;;  %v3148_v2 = vpop.eup %3147 }
 0x4da   :  { %v4588_v63 = vpop.xlane.xlu1 %1844  ;;  %v4590_v55 = vpop.xlane.xlu0 %1607  ;;  %v2333_v4 = vsub.f32 %v2173_v58, %v4598_v0  ;;  %v2172_v41 = vadd.f32 %v5397_v36, %v2092_v19  ;;  %v5400_v36 = vld [vmem:[#allocation15_spill] sm:$0xff] }
 0x4db   :  { %v4594_v20 = vpop.xlane.xlu2 %1764  ;;  %2512 = vrot.lane.b32.xlu0 %v2364_v34, %s3330_s5  ;;  %v2349_v34 = vmul.f32 0.5, %v2301_v35  ;;  %v2094_v19 = vmul.f32 %v5400_v36, %v4496_v12  ;;  %v3150_v46 = vpop.eup %3149  ;;  %v1888_v12 = vmin.f32 %v4573_v45, 4.1351666 }
 0x4dc   :  { %v2332_v5 = vsub.f32 %v2172_v41, %v2316_v31  ;;  %v2380_v50 = vadd.f32 %v2316_v31, %v2172_v41  ;;  %v3152_v8 = vpop.eup %3151 }
 0x4dd   :  { %v2174_v29 = vadd.f32 %v5401_v52, %v2094_v19  ;;  %v3154_v31 = vpop.eup %3153  ;;  %v2302_v41 = vmul.f32 %v3152_v8, %v5400_v36  ;;  %v2365_v19 = vsub.f32 %v2205_v22, %v2349_v34 }
 0x4e0   :  { %2510 = vrot.lane.b32.xlu2 %v2363_v62, %s3330_s5  ;;  %2446 = vrot.lane.b32.xlu1 %v2331_v47, %s3330_s5  ;;  %v2254_v62 = vmul.f32 %v3148_v2, %v5400_v36  ;;  %v2397_v47 = vadd.f32 %v2349_v34, %v2205_v22  ;;  %v2230_v2 = vmul.f32 1.442695, %v1871_v15 }
 0x4e2   :  { %v4609_v43 = vpop.xlane.xlu0 %1847  ;;  %v4617_v42 = vpop.xlane.xlu1 %1767  ;;  %v2318_v54 = vmul.f32 0.5, %v2254_v62  ;;  %3155 = vpow2.f32 %v2230_v2 }
 0x4e3   :  { %v4613_v53 = vpop.xlane.xlu2 %1687  ;;  %2450 = vrot.lane.b32.xlu0 %v2333_v4, %s3330_s5  ;;  %v2396_v4 = vadd.f32 %v4576_v7, %v2204_v39  ;;  %v2280_v7 = vmul.f32 1.442695, %v1888_v12 }
 0x4e4   :  { %v2382_v14 = vadd.f32 %v2318_v54, %v2174_v29 }
 0x4e5   :  { %3157 = vpow2.f32 %v2280_v7  ;;  %v5405_v7 = vld [vmem:[#allocation51_spill] sm:$0xff] }
 0x4e8   :  { %2448 = vrot.lane.b32.xlu2 %v2332_v5, %s3330_s5  ;;  %2638 = vrot.lane.b32.xlu1 %v2395_v32, %s3329_s6  ;;  %v5402_v5 = vld [vmem:[#allocation19_spill] sm:$0xff] }
 0x4e9   :  { %v2303_v32 = vmul.f32 %v3150_v46, %v5402_v5  ;;  %v2191_v59 = vmul.f32 %v5402_v5, %v4541_v48  ;;  %v2190_v48 = vmul.f32 %v5400_v36, %v4498_v56  ;;  %v1873_v46 = vmin.f32 %v4594_v20, 4.1351666 }
 0x4ea   :  { %v4629_v3 = vpop.xlane.xlu0 %1770  ;;  %v4633_v35 = vpop.xlane.xlu1 %1690 }
 0x4eb   :  { %v4627_v11 = vpop.xlane.xlu2 %1610  ;;  %2642 = vrot.lane.b32.xlu0 %v2397_v47, %s3329_s6  ;;  %v4646_v39 = vmul.f32 0.5, %v2303_v32  ;;  %v2381_v47 = vadd.f32 %v4598_v0, %v2173_v58  ;;  %v2207_v15 = vadd.f32 %v2191_v59, %v5403_v9  ;;  %v2350_v0 = vmul.f32 0.5, %v2302_v41  ;;  %v3156_v58 = vpop.eup %3155 }
 0x4ec   :  { %v2206_v56 = vadd.f32 %v2190_v48, %v5401_v52  ;;  %v2234_v20 = vmul.f32 1.442695, %v1873_v46  ;;  %v3158_v32 = vpop.eup %3157  ;;  %v2334_v59 = vsub.f32 %v2174_v29, %v2318_v54 }
 0x4ed   :  { %v2367_v2 = vsub.f32 %v2207_v15, %v4646_v39 }
 0x4ee   :  { %v2366_v8 = vsub.f32 %v2206_v56, %v2350_v0  ;;  %3159 = vpow2.f32 %v2234_v20 }
 0x4f0   :  { %2640 = vrot.lane.b32.xlu2 %v2396_v4, %s3329_s6  ;;  %2576 = vrot.lane.b32.xlu1 %v2380_v50, %s3329_s6  ;;  %v5404_v50 = vld [vmem:[#allocation23_spill] sm:$0xff] }
 0x4f1   :  { %v2256_v12 = vmul.f32 %v3154_v31, %v5404_v50  ;;  %v2096_v34 = vmul.f32 %v5404_v50, %v4557_v23  ;;  %v2095_v23 = vmul.f32 %v5402_v5, %v4516_v27  ;;  %v2304_v52 = vmul.f32 %v3158_v32, %v5404_v50 }
 0x4f2   :  { %v4648_v45 = vpop.xlane.xlu0 %1693  ;;  %v4656_v4 = vpop.xlane.xlu1 %1613  ;;  %v2192_v29 = vmul.f32 %v5404_v50, %v4551_v24  ;;  %v1875_v32 = vmin.f32 %v4629_v3, 4.1351666  ;;  %v5406_v50 = vld [vmem:[#allocation16_spill] sm:$0xff] }
 0x4f3   :  { %v4643_v62 = vpop.xlane.xlu2 %1850  ;;  %2580 = vrot.lane.b32.xlu0 %v2382_v14, %s3329_s6  ;;  %v4668_v36 = vmul.f32 0.5, %v2256_v12  ;;  %v2255_v14 = vmul.f32 %v3156_v58, %v5402_v5  ;;  %v2176_v31 = vadd.f32 %v5405_v7, %v2096_v34  ;;  %v2175_v27 = vadd.f32 %v5403_v9, %v2095_v23 }
 0x4f4   :  { %v2352_v5 = vmul.f32 0.5, %v2304_v52  ;;  %v1889_v12 = vmin.f32 %v4588_v63, 4.1351666  ;;  %v2398_v34 = vadd.f32 %v2350_v0, %v2206_v56  ;;  %v2208_v20 = vadd.f32 %v2192_v29, %v5405_v7 }
 0x4f5   :  { %v2319_v48 = vmul.f32 0.5, %v2255_v14  ;;  %v2097_v63 = vmul.f32 %v5406_v50, %v4567_v26  ;;  %v2238_v0 = vmul.f32 1.442695, %v1875_v32  ;;  %v1874_v7 = vmin.f32 %v4617_v42, 4.1351666 }
 0x4f6   :  { %v2282_v24 = vmul.f32 1.442695, %v1889_v12  ;;  %v1891_v26 = vmin.f32 %v4643_v62, 4.1351666  ;;  %v5408_v12 = vld [vmem:[#allocation22_spill] sm:$0xff] }
 0x4f7   :  { %v2335_v58 = vsub.f32 %v2175_v27, %v2319_v48  ;;  %v2383_v52 = vadd.f32 %v2319_v48, %v2175_v27  ;;  %v2194_v42 = vmul.f32 %v5408_v12, %v4613_v53 }
 0x4f8   :  { %2578 = vrot.lane.b32.xlu2 %v2381_v47, %s3329_s6  ;;  %2514 = vrot.lane.b32.xlu1 %v2365_v19, %s3330_s5  ;;  %v1890_v47 = vmin.f32 %v4609_v43, 4.1351666  ;;  %v2336_v19 = vsub.f32 %v2176_v31, %v4668_v36 }
 0x4fa   :  { %v4672_v41 = vpop.xlane.xlu0 %1616  ;;  %v4681_v54 = vpop.xlane.xlu1 %1853  ;;  %v2284_v43 = vmul.f32 1.442695, %v1890_v47  ;;  %v2399_v47 = vadd.f32 %v4646_v39, %v2207_v15  ;;  %v2286_v15 = vmul.f32 1.442695, %v1891_v26 }
 0x4fb   :  { %v4664_v22 = vpop.xlane.xlu2 %1773  ;;  %2518 = vrot.lane.b32.xlu0 %v2367_v2, %s3330_s5  ;;  %v3160_v2 = vpop.eup %3159 }
 0x4fc   :  { %3161 = vpow2.f32 %v2284_v43  ;;  %v2257_v14 = vmul.f32 %v3160_v2, %v5406_v50  ;;  %v2236_v43 = vmul.f32 1.442695, %v1874_v7  ;;  %v1876_v7 = vmin.f32 %v4664_v22, 4.1351666 }
 0x4fd   :  { %3163 = vpow2.f32 %v2282_v24 }
 0x4fe   :  { %v2321_v3 = vmul.f32 0.5, %v2257_v14  ;;  %3165 = vpow2.f32 %v2238_v0  ;;  %v2384_v14 = vadd.f32 %v4668_v36, %v2176_v31  ;;  %v2193_v0 = vmul.f32 %v5406_v50, %v4569_v49 }
 0x4ff   :  { %3167 = vpow2.f32 %v2236_v43  ;;  %v2240_v22 = vmul.f32 1.442695, %v1876_v7 }
 0x500   :  { %2516 = vrot.lane.b32.xlu2 %v2366_v8, %s3330_s5  ;;  %2452 = vrot.lane.b32.xlu1 %v2334_v59, %s3330_s5  ;;  %v2400_v8 = vadd.f32 %v2352_v5, %v2208_v20  ;;  %3169 = vpow2.f32 %v2286_v15  ;;  %v2098_v15 = vmul.f32 %v5408_v12, %v4590_v55 }
 0x501   :  { %3171 = vrcp.f32 %v4106_v44 }
 0x502   :  { %v4695_v9 = vpop.xlane.xlu0 %1856  ;;  %v4702_v56 = vpop.xlane.xlu1 %1776  ;;  %3173 = vpow2.f32 %v2240_v22 }
 0x503   :  { %v4685_v46 = vpop.xlane.xlu2 %1696  ;;  %2456 = vrot.lane.b32.xlu0 %v2336_v19, %s3330_s5  ;;  %v3162_v23 = vpop.eup %3161  ;;  %v5407_v19 = vld [vmem:[#allocation47_spill] sm:$0xff] }
 0x504   :  { %v2177_v29 = vadd.f32 %v5407_v19, %v2097_v63  ;;  %v2306_v2 = vmul.f32 %v3162_v23, %v5408_v12  ;;  %v5409_v63 = vld [vmem:[#allocation49_spill] sm:$0xff]  ;;  %v2209_v49 = vadd.f32 %v2193_v0, %v5407_v19  ;;  %v1893_v19 = vmin.f32 %v4695_v9, 4.1351666  ;;  %v5412_v9 = vld [vmem:[#allocation58_spill] sm:$0xff] }
 0x505   :  { %v4725_v53 = vadd.f32 %v2194_v42, %v5409_v63  ;;  %v5410_v23 = vld [vmem:[#allocation25_spill] sm:$0xff]  ;;  %v5411_v42 = vld [vmem:[#allocation54_spill] sm:$0xff]  ;;  %3175 = vrcp.f32 %v5412_v9  ;;  %vm1227_vm10 = vweird.f32 %v5412_v9 }
 0x506   :  { %v4718_v62 = vmul.f32 0.5, %v2306_v2  ;;  %v2290_v0 = vmul.f32 1.442695, %v1893_v19 }
 0x508   :  { %2454 = vrot.lane.b32.xlu2 %v2335_v58, %s3330_s5  ;;  %2644 = vrot.lane.b32.xlu1 %v2398_v34, %s3329_s6  ;;  %v2385_v58 = vadd.f32 %v2321_v3, %v2177_v29  ;;  %v3164_v34 = vpop.eup %3163  ;;  %3177 = vpow2.f32 %v2290_v0 }
 0x509   :  { %v3166_v48 = vpop.eup %3165  ;;  %v2305_v27 = vmul.f32 %v3164_v34, %v5406_v50  ;;  %v2337_v34 = vsub.f32 %v2177_v29, %v2321_v3 }
 0x50a   :  { %v4713_v32 = vpop.xlane.xlu0 %1779  ;;  %v4721_v24 = vpop.xlane.xlu1 %1699 }
 0x50b   :  { %v4699_v59 = vpop.xlane.xlu2 %1619  ;;  %2648 = vrot.lane.b32.xlu0 %v2400_v8, %s3329_s6  ;;  %v2368_v8 = vsub.f32 %v2208_v20, %v2352_v5  ;;  %v2353_v36 = vmul.f32 0.5, %v2305_v27  ;;  %v3168_v31 = vpop.eup %3167  ;;  %v2099_v5 = vmul.f32 %v5410_v23, %v4627_v11 }
 0x50c   :  { %v3170_v43 = vpop.eup %3169  ;;  %v2258_v2 = vmul.f32 %v3168_v31, %v5408_v12  ;;  %v2178_v12 = vadd.f32 %v5409_v63, %v2098_v15 }
 0x50d   :  { %v4748_v11 = vadd.f32 %v5411_v42, %v2099_v5  ;;  %v2307_v27 = vmul.f32 %v3170_v43, %v5410_v23  ;;  %v4765_v55 = vpop.eup %3171  ;;  %v1878_v43 = vmin.f32 %v4713_v32, 4.1351666 }
 0x50e   :  { %v2322_v29 = vmul.f32 0.5, %v2258_v2  ;;  %v3174_v31 = vpop.eup %3173  ;;  %vm1213_vm7 = vweird.f32 %v4765_v55 }
 0x50f   :  { %v4769_v7 = vmul.f32 0.5, %v2307_v27  ;;  %v2244_v32 = vmul.f32 1.442695, %v1878_v43  ;;  %v1218_v43 = vand.u32 2147483648, %v4106_v44  ;;  %vm4849_vm12 = vmor %vm1212_vm4, %vm1213_vm7  ;;  %vm1242_vm4 = vweird.f32 %v4179_v57 }
 0x510   :  { %2646 = vrot.lane.b32.xlu2 %v2399_v47, %s3329_s6  ;;  %2582 = vrot.lane.b32.xlu1 %v2383_v52, %s3329_s6  ;;  %v2259_v47 = vmul.f32 %v3166_v48, %v5410_v23  ;;  %v2370_v52 = vsub.f32 %v4725_v53, %v4718_v62  ;;  %v2338_v5 = vsub.f32 %v2178_v12, %v2322_v29 }
 0x512   :  { %v4741_v50 = vmul.f32 0.5, %v2259_v47  ;;  %v4743_v26 = vpop.xlane.xlu0 %1702  ;;  %v4753_v48 = vpop.xlane.xlu1 %1622  ;;  %v1892_v47 = vmin.f32 %v4681_v54, 4.1351666  ;;  %v5413_v54 = vld [vmem:[#allocation18_spill] sm:$0xff] }
 0x513   :  { %v4715_v39 = vpop.xlane.xlu2 %1859  ;;  %2586 = vrot.lane.b32.xlu0 %v2385_v58, %s3329_s6  ;;  %v2369_v58 = vsub.f32 %v2209_v49, %v2353_v36  ;;  %v2260_v2 = vmul.f32 %v3174_v31, %v5413_v54 }
 0x514   :  { %v2339_v3 = vsub.f32 %v4748_v11, %v4741_v50  ;;  %v2288_v63 = vmul.f32 1.442695, %v1892_v47  ;;  %v2402_v47 = vadd.f32 %v4718_v62, %v4725_v53 }
 0x515   :  { %v4796_v27 = vmul.f32 0.5, %v2260_v2 }
 0x516   :  { %3179 = vpow2.f32 %v2288_v63 }
 0x517   :  { %3181 = vrcp.f32 %v4179_v57 }
 0x518   :  { %2584 = vrot.lane.b32.xlu2 %v2384_v14, %s3329_s6  ;;  %2520 = vrot.lane.b32.xlu1 %v2368_v8, %s3330_s5  ;;  %v2195_v14 = vmul.f32 %v5410_v23, %v4633_v35  ;;  %v2401_v35 = vadd.f32 %v2353_v36, %v2209_v49  ;;  %v1208_v23 = vmul.f32 %v4765_v55, %v4106_v44  ;;  %v4785_v36 = vpop.eup %3175  ;;  %3183 = vpow2.f32 %v2244_v32 }
 0x519   :  { %v1223_v19 = vmul.f32 %v4785_v36, %v5412_v9  ;;  %v3178_v0 = vpop.eup %3177  ;;  %vm1228_vm9 = vweird.f32 %v4785_v36 }
 0x51a   :  { %v4777_v22 = vadd.f32 %v2195_v14, %v5411_v42  ;;  %v4787_v49 = vpop.xlane.xlu1 %1862  ;;  %v2100_v42 = vmul.f32 %v5413_v54, %v4656_v4  ;;  %v2386_v4 = vadd.f32 %v2322_v29, %v2178_v12  ;;  %v5415_v29 = vld [vmem:[#allocation24_spill] sm:$0xff]  ;;  %vm4902_vm3 = vmor %vm1227_vm10, %vm1228_vm9  ;;  %vm1257_vm10 = vweird.f32 %v4127_v1 }
 0x51b   :  { %v4737_v20 = vpop.xlane.xlu2 %1782  ;;  %2524 = vrot.lane.b32.xlu0 %v2370_v52, %s3330_s5  ;;  %v1224_v62 = vsub.f32 1.0, %v1223_v19  ;;  %v2309_v12 = vmul.f32 %v3178_v0, %v5415_v29 }
 0x520   :  { %2522 = vrot.lane.b32.xlu2 %v2369_v58, %s3330_s5  ;;  %2458 = vrot.lane.b32.xlu1 %v2337_v34, %s3330_s5  ;;  %v2403_v58 = vadd.f32 %v4769_v7, %v4777_v22  ;;  %v1209_v34 = vsub.f32 1.0, %v1208_v23  ;;  %v1879_v23 = vmin.f32 %v4737_v20, 4.1351666  ;;  %v3180_v20 = vpop.eup %3179 }
 0x521   :  { %v4831_v2 = vpop.eup %3181 }
 0x522   :  { %v1210_v31 = vmul.f32 %v4765_v55, %v1209_v34  ;;  %v2197_v34 = vmul.f32 %v5415_v29, %v4685_v46  ;;  %v2246_v19 = vmul.f32 1.442695, %v1879_v23  ;;  %v1225_v46 = vmul.f32 %v4785_v36, %v1224_v62  ;;  %v3184_v23 = vpop.eup %3183 }
 0x523   :  { %v4762_v8 = vpop.permute.xlu2 %2504  ;;  %2462 = vrot.lane.b32.xlu0 %v2339_v3, %s3330_s5  ;;  %v1877_v3 = vmin.f32 %v4702_v56, 4.1351666  ;;  %v1216_v56 = vand.u32 2147483647, %v4106_v44  ;;  %v1894_v44 = vmin.f32 %v4715_v39, 4.1351666  ;;  %vm1243_vm5 = vweird.f32 %v4831_v2 }
 0x524   :  { %v1211_v32 = vadd.f32 %v4765_v55, %v1210_v31  ;;  %vm4964_vm7 = vmor %vm1242_vm4, %vm1243_vm5  ;;  %vm1272_vm5 = vweird.f32 %v4124_v37 }
 0x525   :  { %v4772_v52 = vpop.permute.xlu0 %2568  ;;  %v2242_v53 = vmul.f32 1.442695, %v1877_v3  ;;  %v5416_v3 = vld [vmem:[#allocation27_spill] sm:$0xff]  ;;  %vm4827_vm8 = vcmp.eq.f32.partialorder %v1216_v56, 8.507059e+37  ;;  %v2308_v56 = vmul.f32 %v3180_v20, %v5413_v54 }
 0x527   :  { %3185 = vpow2.f32 %v2242_v53  ;;  %v5421_v53 = vld [vmem:[#allocation53_spill] sm:$0xff] }
 0x528   :  { %2460 = vrot.lane.b32.xlu2 %v2338_v5, %s3330_s5  ;;  %2650 = vrot.lane.b32.xlu1 %v2401_v35, %s3329_s6  ;;  %v5414_v5 = vld [vmem:[#allocation52_spill] sm:$0xff]  ;;  %3187 = vpow2.f32 %v2246_v19  ;;  %v2408_v19 = vcvt.s32.f32 %v4227_v6  ;;  %v1895_v6 = vmin.f32 %v4787_v49, 4.1351666  ;;  %v5429_v49 = vld [vmem:[#allocation55_spill] sm:$0xff] }
 0x529   :  { %v4806_v35 = vadd.f32 %v5414_v5, %v2100_v42  ;;  %3189 = vrcp.f32 %v4127_v1 }
 0x52b   :  { %v4791_v15 = vpop.permute.xlu2 %2442  ;;  %2654 = vrot.lane.b32.xlu0 %v2403_v58, %s3329_s6  ;;  %v2388_v63 = vadd.f32 %v4796_v27, %v4806_v35 }
 0x52d   :  { %v4799_v14 = vpop.permute.xlu0 %2506 }
 0x530   :  { %2652 = vrot.lane.b32.xlu2 %v2402_v47, %s3329_s6  ;;  %2588 = vrot.lane.b32.xlu1 %v2386_v4, %s3329_s6  ;;  %v1219_v4 = vor.u32 1.1754944e-38, %v1218_v43  ;;  %v2387_v43 = vadd.f32 %v4741_v50, %v4748_v11  ;;  %v1215_v50 = vsel %vm4849_vm12, %v4765_v55, %v1211_v32  ;;  %v2196_v11 = vmul.f32 %v5413_v54, %v4648_v45  ;;  %v3186_v32 = vpop.eup %3185 }
 0x532   :  { %v2441_v58 = vpop.permute.xlu1 %2440  ;;  %v1220_v45 = vsel %vm4827_vm8, %v1219_v4, %v1215_v50  ;;  %v2212_v47 = vadd.f32 %v2196_v11, %v5414_v5  ;;  %v2292_v4 = vmul.f32 1.442695, %v1894_v44  ;;  %v2261_v50 = vmul.f32 %v3186_v32, %v5415_v29 }
 0x533   :  { %v4820_v42 = vpop.permute.xlu2 %2634  ;;  %2592 = vrot.lane.b32.xlu0 %v2388_v63, %s3329_s6  ;;  %v2681_v0 = vsel %vm2680_vm6, %v5416_v3, %v2441_v58  ;;  %v4835_v63 = vmul.f32 0.5, %v2309_v12  ;;  %v2371_v58 = vsub.f32 %v4777_v22, %v4769_v7  ;;  %v4854_v12 = vadd.f32 %v2197_v34, %v5421_v53 }
 0x534   :  { %v2698_v20 = vsel %vm2697_vm11, %v2681_v0, %v4762_v8  ;;  %v1238_v7 = vmul.f32 %v4831_v2, %v4179_v57  ;;  %v5422_v8 = vld [vmem:[#allocation26_spill] sm:$0xff]  ;;  %v4871_v34 = vmul.f32 0.5, %v2308_v56  ;;  %v2340_v11 = vsub.f32 %v4806_v35, %v4796_v27 }
 0x535   :  { %v4837_v31 = vpop.permute.xlu0 %2444  ;;  %v2262_v22 = vmul.f32 %v3184_v23, %v5422_v8  ;;  %v2373_v55 = vsub.f32 %v4854_v12, %v4835_v63  ;;  %v2715_v54 = vsel %vm2714_vm13, %v2698_v20, %v4772_v52  ;;  %v2102_v3 = vmul.f32 %v5422_v8, %v4699_v59  ;;  %v3188_v20 = vpop.eup %3187 }
 0x536   :  { %v1226_v52 = vadd.f32 %v4785_v36, %v1225_v46  ;;  %v2372_v5 = vsub.f32 %v2212_v47, %v4871_v34  ;;  %v5425_v46 = vld [vmem:[#allocation56_spill] sm:$0xff]  ;;  %3191 = vpow2.f32 %v2292_v4  ;;  %v2294_v35 = vmul.f32 1.442695, %v1895_v6 }
 0x537   :  { %v4908_v44 = vadd.f32 %v5425_v46, %v2102_v3 }
 0x538   :  { %2590 = vrot.lane.b32.xlu2 %v2387_v43, %s3329_s6  ;;  %2526 = vrot.lane.b32.xlu1 %v2371_v58, %s3330_s5  ;;  %v1239_v43 = vsub.f32 1.0, %v1238_v7  ;;  %v4887_v58 = vmul.f32 0.5, %v2262_v22  ;;  %v1231_v7 = vand.u32 2147483647, %v5412_v9  ;;  %v2101_v22 = vmul.f32 %v5415_v29, %v4672_v41 }
 0x539   :  { %v1230_v27 = vsel %vm4902_vm3, %v4785_v36, %v1226_v52  ;;  %v5428_v41 = vand.u32 2147483648, %v5412_v9  ;;  %v2409_v9 = vcvt.s32.f32 %v4225_v28  ;;  %3193 = vpow2.f32 %v2294_v35 }
 0x53a   :  { %v2633_v39 = vpop.permute.xlu1 %2632  ;;  %v1240_v3 = vmul.f32 %v4831_v2, %v1239_v43  ;;  %vm1232_vm0 = vcmp.eq.f32.partialorder %v1231_v7, 8.507059e+37  ;;  %v2181_v6 = vadd.f32 %v5421_v53, %v2101_v22  ;;  %3195 = vrcp.f32 %v4124_v37 }
 0x53b   :  { %v2732_v0 = vsel %vm2731_vm14, %v2715_v54, %v2633_v39  ;;  %v4881_v23 = vpop.permute.xlu2 %2572  ;;  %2530 = vrot.lane.b32.xlu0 %v2373_v55, %s3330_s5  ;;  %v5427_v54 = vld [vmem:[#allocation28_spill] sm:$0xff]  ;;  %v1234_v29 = vor.u32 1.1754944e-38, %v5428_v41  ;;  %v1246_v35 = vand.u32 2147483647, %v4179_v57  ;;  %3197 = vrcp.f32 %v4186_v21 }
 0x53c   :  { %v2749_v56 = vsel %vm2748_vm15, %v2732_v0, %v1220_v45  ;;  %v5426_v45 = vld [vmem:[#allocation21_spill] sm:$0xff]  ;;  %v2682_v32 = vsel %vm2680_vm6, %v5427_v54, %v4791_v15  ;;  %v2325_v0 = vmul.f32 0.5, %v2261_v50  ;;  %v1241_v28 = vadd.f32 %v4831_v2, %v1240_v3  ;;  %v5432_v54 = vld [vmem:[#allocation30_spill] sm:$0xff] }
 0x53d   :  { %v2766_v59 = vsel %vm2765_vm1, %v2749_v56, %v2408_v19  ;;  %v4891_v62 = vpop.permute.xlu0 %2636  ;;  %v2263_v39 = vmul.f32 %v3188_v20, %v5426_v45  ;;  %v2342_v19 = vsub.f32 %v4908_v44, %v4887_v58  ;;  %v2699_v4 = vsel %vm2697_vm11, %v2682_v32, %v4799_v14  ;;  %v4939_v14 = vpop.eup %3189 }
 0x53e   :  { %v2783_v55 = vsel %vm2782_vm2, %v2766_v59, 0.0  ;;  %v2103_v56 = vmul.f32 %v5426_v45, %v4753_v48  ;;  %v1235_v43 = vsel %vm1232_vm0, %v1234_v29, %v1230_v27  ;;  %v1253_v27 = vmul.f32 %v4939_v14, %v4127_v1 }
 0x53f   :  { %2799 = vst [vmem:[#allocation9] sm:$0xff] %v2783_v55  ;;  %v4942_v48 = vmul.f32 0.5, %v2263_v39  ;;  %v3192_v55 = vpop.eup %3191  ;;  %v1245_v32 = vsel %vm4964_vm7, %v4831_v2, %v1241_v28  ;;  %v2198_v3 = vmul.f32 %v5422_v8, %v4721_v24  ;;  %vm1247_vm8 = vcmp.eq.f32.partialorder %v1246_v35, 8.507059e+37 }
 0x540   :  { %2528 = vrot.lane.b32.xlu2 %v2372_v5, %s3330_s5  ;;  %2464 = vrot.lane.b32.xlu1 %v2340_v11, %s3330_s5  ;;  %v2341_v5 = vsub.f32 %v2181_v6, %v2325_v0  ;;  %v2404_v11 = vadd.f32 %v4871_v34, %v2212_v47  ;;  %v4952_v7 = vadd.f32 %v5429_v49, %v2103_v56  ;;  %v3194_v41 = vpop.eup %3193  ;;  %v1254_v56 = vsub.f32 1.0, %v1253_v27 }
 0x541   :  { %v2310_v47 = vmul.f32 %v3192_v55, %v5422_v8  ;;  %v4990_v24 = vpop.eup %3195  ;;  %v2311_v8 = vmul.f32 %v3194_v41, %v5426_v45  ;;  %v2390_v55 = vadd.f32 %v4887_v58, %v4908_v44  ;;  %v2389_v28 = vadd.f32 %v2325_v0, %v2181_v6 }
 0x542   :  { %v2571_v36 = vpop.permute.xlu1 %2570  ;;  %v2391_v39 = vadd.f32 %v4942_v48, %v4952_v7  ;;  %vm1258_vm9 = vweird.f32 %v4939_v14  ;;  %v1263_v35 = vand.u32 2147483648, %v4127_v1  ;;  %vm1273_vm0 = vweird.f32 %v4990_v24 }
 0x543   :  { %v2716_v52 = vsel %vm2714_vm13, %v2699_v4, %v2571_v36  ;;  %v4932_v15 = vpop.permute.xlu2 %2510  ;;  %2468 = vrot.lane.b32.xlu0 %v2342_v19, %s3330_s5  ;;  %v2358_v2 = vmul.f32 0.5, %v2310_v47  ;;  %vm1259_vm12 = vmor %vm1257_vm10, %vm1258_vm9  ;;  %3199 = vrcp.f32 %v4144_v18  ;;  %vm1287_vm9 = vweird.f32 %v4186_v21 }
 0x544   :  { %v2733_v59 = vsel %vm2731_vm14, %v2716_v52, %v4820_v42  ;;  %v1248_v42 = vand.u32 2147483648, %v4179_v57  ;;  %v2683_v57 = vsel %vm2680_vm6, %v5432_v54, %v4837_v31  ;;  %v2410_v52 = vcvt.s32.f32 %v4256_v60  ;;  %vm1274_vm4 = vmor %vm1272_vm5, %vm1273_vm0 }
 0x545   :  { %v2750_v20 = vsel %vm2748_vm15, %v2733_v59, %v1235_v43  ;;  %v4945_v50 = vpop.permute.xlu0 %2574  ;;  %3201 = vrcp.f32 %v4141_v13  ;;  %vm1302_vm0 = vweird.f32 %v4144_v18 }
 0x546   :  { %v2767_v53 = vsel %vm2765_vm1, %v2750_v20, %v2409_v9  ;;  %v1249_v29 = vor.u32 1.1754944e-38, %v1248_v42  ;;  %3203 = vrcp.f32 %v4193_v16 }
 0x547   :  { %v2784_v22 = vsel %vm2782_vm2, %v2767_v53, 0.0  ;;  %v1255_v53 = vmul.f32 %v4939_v14, %v1254_v56  ;;  %3205 = vrcp.f32 %v4160_v25 }
 0x548   :  { %2800 = vst [vmem:[#allocation9 + $0x8] sm:$0xff] %v2784_v22  ;;  %2466 = vrot.lane.b32.xlu2 %v2341_v5, %s3330_s5  ;;  %2656 = vrot.lane.b32.xlu1 %v2404_v11, %s3329_s6  ;;  %v1250_v9 = vsel %vm1247_vm8, %v1249_v29, %v1245_v32  ;;  %v1268_v11 = vmul.f32 %v4990_v24, %v4124_v37  ;;  %3207 = vrcp.f32 %v4158_v30 }
 0x549   :  { %v1256_v42 = vadd.f32 %v4939_v14, %v1255_v53  ;;  %v2412_v53 = vcvt.s32.f32 %v4261_v38  ;;  %3209 = vrcp.f32 %v4209_v33 }
 0x54a   :  { %v2509_v19 = vpop.permute.xlu1 %2508  ;;  %v1269_v22 = vsub.f32 1.0, %v1268_v11 }
 0x54b   :  { %v2700_v4 = vsel %vm2697_vm11, %v2683_v57, %v2509_v19  ;;  %v4980_v36 = vpop.permute.xlu2 %2448  ;;  %2598 = vrot.lane.b32.xlu0 %v2391_v39, %s3329_s6  ;;  %v5024_v39 = vpop.eup %3197  ;;  %v1260_v57 = vsel %vm1259_vm12, %v4939_v14, %v1256_v42  ;;  %v1264_v19 = vor.u32 1.1754944e-38, %v1263_v35  ;;  %v1278_v14 = vand.u32 2147483648, %v4124_v37  ;;  %v5435_v42 = vld [vmem:[#allocation31_spill] sm:$0xff] }
 0x54c   :  { %v2717_v31 = vsel %vm2714_vm13, %v2700_v4, %v4881_v23  ;;  %v2214_v23 = vadd.f32 %v2198_v3, %v5425_v46  ;;  %v5007_v46 = vmul.f32 0.5, %v2311_v8  ;;  %v1270_v32 = vmul.f32 %v4990_v24, %v1269_v22  ;;  %v3200_v11 = vpop.eup %3199 }
 0x54d   :  { %v2734_v43 = vsel %vm2731_vm14, %v2717_v31, %v4891_v62  ;;  %v4988_v59 = vpop.permute.xlu0 %2512  ;;  %v2199_v62 = vmul.f32 %v5426_v45, %v4743_v26  ;;  %v5433_v45 = vld [vmem:[#allocation29_spill] sm:$0xff]  ;;  %v1283_v41 = vmul.f32 %v5024_v39, %v4186_v21  ;;  %v2343_v8 = vsub.f32 %v4952_v7, %v4942_v48 }
 0x54e   :  { %v2751_v20 = vsel %vm2748_vm15, %v2734_v43, %v1250_v9  ;;  %v2406_v58 = vadd.f32 %v2358_v2, %v2214_v23  ;;  %v2374_v47 = vsub.f32 %v2214_v23, %v2358_v2  ;;  %v1271_v9 = vadd.f32 %v4990_v24, %v1270_v32 }
 0x54f   :  { %v2768_v60 = vsel %vm2765_vm1, %v2751_v20, %v2410_v52  ;;  %v5011_v26 = vadd.f32 %v2199_v62, %v5429_v49  ;;  %v1261_v49 = vand.u32 2147483647, %v4127_v1  ;;  %v1284_v43 = vsub.f32 1.0, %v1283_v41  ;;  %v3202_v41 = vpop.eup %3201 }
 0x550   :  { %v2785_v5 = vsel %vm2782_vm2, %v2768_v60, 0.0  ;;  %2596 = vrot.lane.b32.xlu2 %v2390_v55, %s3329_s6  ;;  %2594 = vrot.lane.b32.xlu1 %v2389_v28, %s3329_s6  ;;  %v1276_v20 = vand.u32 2147483647, %v4124_v37  ;;  %v5434_v55 = vld [vmem:[#allocation32_spill] sm:$0xff]  ;;  %vm1288_vm8 = vweird.f32 %v5024_v39 }
 0x551   :  { %2801 = vst [vmem:[#allocation9 + $0x10] sm:$0xff] %v2785_v5  ;;  %v2375_v34 = vsub.f32 %v5011_v26, %v5007_v46  ;;  %vm1262_vm3 = vcmp.eq.f32.partialorder %v1261_v49, 8.507059e+37  ;;  %v2685_v28 = vsel %vm2680_vm6, %v5434_v55, %v4980_v36  ;;  %v1285_v48 = vmul.f32 %v5024_v39, %v1284_v43  ;;  %vm1289_vm10 = vmor %vm1287_vm9, %vm1288_vm8  ;;  %v5094_v43 = vpop.eup %3203 }
 0x552   :  { %v2447_v44 = vpop.permute.xlu1 %2446  ;;  %v1265_v3 = vsel %vm1262_vm3, %v1264_v19, %v1260_v57  ;;  %v2702_v7 = vsel %vm2697_vm11, %v2685_v28, %v4988_v59  ;;  %vm1277_vm7 = vcmp.eq.f32.partialorder %v1276_v20, 8.507059e+37  ;;  %vm1303_vm3 = vweird.f32 %v3200_v11 }
 0x553   :  { %v2641_v0 = vpop.permute.xlu2 %2640  ;;  %2660 = vrot.lane.b32.xlu0 %v2406_v58, %s3329_s6  ;;  %v2684_v6 = vsel %vm2680_vm6, %v5433_v45, %v2447_v44  ;;  %v1286_v58 = vadd.f32 %v5024_v39, %v1285_v48  ;;  %v2407_v44 = vadd.f32 %v5007_v46, %v5011_v26  ;;  %v1293_v45 = vand.u32 2147483648, %v4186_v21  ;;  %vm1304_vm5 = vmor %vm1302_vm0, %vm1303_vm3 }
 0x554   :  { %v2701_v54 = vsel %vm2697_vm11, %v2684_v6, %v4932_v15  ;;  %v2411_v15 = vcvt.s32.f32 %v4253_v10  ;;  %v2405_v10 = vadd.f32 %v4835_v63, %v4854_v12  ;;  %v1275_v63 = vsel %vm1274_vm4, %v4990_v24, %v1271_v9 }
 0x555   :  { %v5017_v27 = vpop.permute.xlu0 %2450  ;;  %v2718_v29 = vsel %vm2714_vm13, %v2701_v54, %v4945_v50  ;;  %v1279_v12 = vor.u32 1.1754944e-38, %v1278_v14  ;;  %v1291_v6 = vand.u32 2147483647, %v4186_v21  ;;  %v1290_v26 = vsel %vm1289_vm10, %v5024_v39, %v1286_v58 }
 0x556   :  { %v2686_v46 = vsel %vm2680_vm6, %v5435_v42, %v5017_v27  ;;  %v1294_v35 = vor.u32 1.1754944e-38, %v1293_v45  ;;  %v2413_v21 = vcvt.s32.f32 %v4281_v61  ;;  %v5436_v61 = vld [vmem:[#allocation33_spill] sm:$0xff]  ;;  %v1306_v9 = vand.u32 2147483647, %v4144_v18 }
 0x557   :  { %v1280_v62 = vsel %vm1277_vm7, %v1279_v12, %v1275_v63  ;;  %vm1292_vm12 = vcmp.eq.f32.partialorder %v1291_v6, 8.507059e+37  ;;  %v1328_v55 = vmul.f32 %v5094_v43, %v4193_v16  ;;  %v2414_v12 = vcvt.s32.f32 %v4291_v17 }
 0x558   :  { %2534 = vrot.lane.b32.xlu2 %v2375_v34, %s3330_s5  ;;  %2532 = vrot.lane.b32.xlu1 %v2374_v47, %s3330_s5  ;;  %v1295_v57 = vsel %vm1292_vm12, %v1294_v35, %v1290_v26  ;;  %vm1307_vm4 = vcmp.eq.f32.partialorder %v1306_v9, 8.507059e+37  ;;  %vm1318_vm7 = vweird.f32 %v3202_v41  ;;  %vm1317_vm8 = vweird.f32 %v4141_v13  ;;  %v3206_v26 = vpop.eup %3205 }
 0x559   :  { %v1321_v17 = vand.u32 2147483647, %v4141_v13  ;;  %vm1319_vm9 = vmor %vm1317_vm8, %vm1318_vm7  ;;  %v2415_v42 = vcvt.s32.f32 %v4303_v40  ;;  %vm1333_vm12 = vweird.f32 %v5094_v43  ;;  %v1343_v40 = vmul.f32 %v3206_v26, %v4160_v25 }
 0x55a   :  { %v2639_v1 = vpop.permute.xlu1 %2638  ;;  %vm1332_vm3 = vweird.f32 %v4193_v16  ;;  %vm1347_vm7 = vweird.f32 %v4160_v25 }
 0x55b   :  { %v2735_v4 = vsel %vm2731_vm14, %v2718_v29, %v2639_v1  ;;  %v2579_v56 = vpop.permute.xlu2 %2578  ;;  %vm1322_vm10 = vcmp.eq.f32.partialorder %v1321_v17, 8.507059e+37  ;;  %vm1334_vm0 = vmor %vm1332_vm3, %vm1333_vm12  ;;  %vm1362_vm12 = vweird.f32 %v4158_v30 }
 0x55c   :  { %v2752_v31 = vsel %vm2748_vm15, %v2735_v4, %v1265_v3 }
 0x55d   :  { %v2769_v52 = vsel %vm2765_vm1, %v2752_v31, %v2411_v15  ;;  %v2643_v2 = vpop.permute.xlu0 %2642  ;;  %v1313_v15 = vmul.f32 %v3202_v41, %v4141_v13 }
 0x55e   :  { %v2786_v50 = vsel %vm2782_vm2, %v2769_v52, 0.0 }
 0x55f   :  { %2802 = vst [vmem:[#allocation9 + $0x18] sm:$0xff] %v2786_v50  ;;  %v1314_v14 = vsub.f32 1.0, %v1313_v15 }
 0x560   :  { %2658 = vrot.lane.b32.xlu2 %v2405_v10, %s3329_s6  ;;  %2470 = vrot.lane.b32.xlu1 %v2343_v8, %s3330_s5 }
 0x561   :  { %v1315_v8 = vmul.f32 %v3202_v41, %v1314_v14 }
 0x562   :  { %v2577_v23 = vpop.permute.xlu1 %2576 }
 0x563   :  { %v2719_v37 = vsel %vm2714_vm13, %v2702_v7, %v2577_v23  ;;  %v2517_v60 = vpop.permute.xlu2 %2516 }
 0x564   :  { %v2736_v5 = vsel %vm2731_vm14, %v2719_v37, %v2641_v0  ;;  %v1298_v0 = vmul.f32 %v3200_v11, %v4144_v18 }
 0x565   :  { %v2753_v36 = vsel %vm2748_vm15, %v2736_v5, %v1280_v62  ;;  %v2581_v24 = vpop.permute.xlu0 %2580  ;;  %v1323_v62 = vand.u32 2147483648, %v4141_v13  ;;  %v1329_v5 = vsub.f32 1.0, %v1328_v55 }
 0x566   :  { %v2770_v59 = vsel %vm2765_vm1, %v2753_v36, %v2412_v53  ;;  %v1299_v49 = vsub.f32 1.0, %v1298_v0  ;;  %v1316_v53 = vadd.f32 %v3202_v41, %v1315_v8  ;;  %v5437_v36 = vld [vmem:[#allocation34_spill] sm:$0xff] }
 0x567   :  { %v2787_v38 = vsel %vm2782_vm2, %v2770_v59, 0.0  ;;  %v1324_v59 = vor.u32 1.1754944e-38, %v1323_v62  ;;  %v5440_v62 = vld [vmem:[#allocation63_spill] sm:$0xff] }
 0x568   :  { %2803 = vst [vmem:[#allocation9 + $0x20] sm:$0xff] %v2787_v38  ;;  %2662 = vrot.lane.b32.xlu1 %v2407_v44, %s3329_s6  ;;  %v1300_v1 = vmul.f32 %v3200_v11, %v1299_v49  ;;  %v1320_v58 = vsel %vm1319_vm9, %v3202_v41, %v1316_v53  ;;  %v1330_v44 = vmul.f32 %v5094_v43, %v1329_v5  ;;  %v1338_v49 = vand.u32 2147483648, %v4193_v16 }
 0x569   :  { %v2417_v5 = vcvt.s32.f32 %v5440_v62 }
 0x56a   :  { %v2515_v22 = vpop.permute.xlu1 %2514  ;;  %v1301_v31 = vadd.f32 %v3200_v11, %v1300_v1 }
 0x56b   :  { %v2703_v34 = vsel %vm2697_vm11, %v2686_v46, %v2515_v22  ;;  %v2455_v47 = vpop.permute.xlu2 %2454  ;;  %v1325_v46 = vsel %vm1322_vm10, %v1324_v59, %v1320_v58 }
 0x56c   :  { %v2720_v54 = vsel %vm2714_vm13, %v2703_v34, %v2579_v56  ;;  %v1305_v10 = vsel %vm1304_vm5, %v3200_v11, %v1301_v31  ;;  %v1331_v34 = vadd.f32 %v5094_v43, %v1330_v44  ;;  %v1368_v44 = vand.u32 2147483648, %v4158_v30 }
 0x56d   :  { %v2737_v32 = vsel %vm2731_vm14, %v2720_v54, %v2643_v2  ;;  %v2519_v19 = vpop.permute.xlu0 %2518  ;;  %v1308_v2 = vand.u32 2147483648, %v4144_v18 }
 0x56e   :  { %v2754_v27 = vsel %vm2748_vm15, %v2737_v32, %v1295_v57  ;;  %v5438_v57 = vld [vmem:[#allocation35_spill] sm:$0xff] }
 0x56f   :  { %v2771_v39 = vsel %vm2765_vm1, %v2754_v27, %v2413_v21  ;;  %v1309_v20 = vor.u32 1.1754944e-38, %v1308_v2  ;;  %v1336_v21 = vand.u32 2147483647, %v4193_v16  ;;  %v1339_v27 = vor.u32 1.1754944e-38, %v1338_v49 }
 0x570   :  { %v2788_v29 = vsel %vm2782_vm2, %v2771_v39, 0.0 }
 0x571   :  { %2804 = vst [vmem:[#allocation9 + $0x28] sm:$0xff] %v2788_v29  ;;  %v1310_v48 = vsel %vm1307_vm4, %v1309_v20, %v1305_v10  ;;  %v1344_v29 = vsub.f32 1.0, %v1343_v40  ;;  %vm1337_vm5 = vcmp.eq.f32.partialorder %v1336_v21, 8.507059e+37  ;;  %vm1348_vm4 = vweird.f32 %v3206_v26 }
 0x572   :  { %v2453_v3 = vpop.permute.xlu1 %2452  ;;  %vm1349_vm8 = vmor %vm1347_vm7, %vm1348_vm4  ;;  %vm1377_vm4 = vweird.f32 %v4209_v33 }
 0x573   :  { %v2647_v4 = vpop.permute.xlu2 %2646  ;;  %v2687_v56 = vsel %vm2680_vm6, %v5436_v61, %v2453_v3  ;;  %v2416_v3 = vcvt.s32.f32 %v4320_v51  ;;  %v5439_v51 = vld [vmem:[#allocation36_spill] sm:$0xff] }
 0x574   :  { %v2704_v50 = vsel %vm2697_vm11, %v2687_v56, %v2517_v60  ;;  %v3208_v56 = vpop.eup %3207 }
 0x575   :  { %v2457_v52 = vpop.permute.xlu0 %2456  ;;  %v2721_v63 = vsel %vm2714_vm13, %v2704_v50, %v2581_v24  ;;  %v2688_v24 = vsel %vm2680_vm6, %v5437_v36, %v2455_v47  ;;  %v1358_v9 = vmul.f32 %v3208_v56, %v4158_v30  ;;  %vm1363_vm10 = vweird.f32 %v3208_v56 }
 0x576   :  { %v2705_v45 = vsel %vm2697_vm11, %v2688_v24, %v2519_v19  ;;  %v2689_v32 = vsel %vm2680_vm6, %v5438_v57, %v2457_v52  ;;  %v1335_v19 = vsel %vm1334_vm0, %v5094_v43, %v1331_v34  ;;  %v1345_v52 = vmul.f32 %v3206_v26, %v1344_v29  ;;  %vm1364_vm3 = vmor %vm1362_vm12, %vm1363_vm10 }
 0x577   :  { %v1359_v20 = vsub.f32 1.0, %v1358_v9 }
 0x578   :  { %v1346_v8 = vadd.f32 %v3206_v26, %v1345_v52 }
 0x57a   :  { %v2645_v28 = vpop.permute.xlu1 %2644 }
 0x57b   :  { %v2738_v18 = vsel %vm2731_vm14, %v2721_v63, %v2645_v28  ;;  %v2585_v7 = vpop.permute.xlu2 %2584  ;;  %v1353_v28 = vand.u32 2147483648, %v4160_v25  ;;  %v1351_v63 = vand.u32 2147483647, %v4160_v25 }
 0x57c   :  { %v2755_v23 = vsel %vm2748_vm15, %v2738_v18, %v1310_v48  ;;  %v1350_v18 = vsel %vm1349_vm8, %v3206_v26, %v1346_v8  ;;  %v1369_v26 = vor.u32 1.1754944e-38, %v1368_v44 }
 0x57d   :  { %v2772_v37 = vsel %vm2765_vm1, %v2755_v23, %v2414_v12  ;;  %v2649_v60 = vpop.permute.xlu0 %2648  ;;  %v5143_v12 = vpop.eup %3209  ;;  %v1354_v23 = vor.u32 1.1754944e-38, %v1353_v28  ;;  %vm1352_vm9 = vcmp.eq.f32.partialorder %v1351_v63, 8.507059e+37 }
 0x57e   :  { %v2789_v11 = vsel %vm2782_vm2, %v2772_v37, 0.0  ;;  %v1373_v37 = vmul.f32 %v5143_v12, %v4209_v33 }
 0x57f   :  { %2805 = vst [vmem:[#allocation9 + $0x30] sm:$0xff] %v2789_v11  ;;  %v1355_v11 = vsel %vm1352_vm9, %v1354_v23, %v1350_v18  ;;  %v5448_v23 = vld [vmem:[#allocation41_spill] sm:$0xff] }
 0x582   :  { %v2583_v38 = vpop.permute.xlu1 %2582 }
 0x583   :  { %v2722_v0 = vsel %vm2714_vm13, %v2705_v45, %v2583_v38  ;;  %v2523_v6 = vpop.permute.xlu2 %2522  ;;  %v1374_v45 = vsub.f32 1.0, %v1373_v37 }
 0x584   :  { %v2739_v13 = vsel %vm2731_vm14, %v2722_v0, %v2647_v4  ;;  %v1340_v4 = vsel %vm1337_vm5, %v1339_v27, %v1335_v19  ;;  %v5441_v0 = vld [vmem:[#allocation59_spill] sm:$0xff]  ;;  %vm1378_vm5 = vweird.f32 %v5143_v12 }
 0x585   :  { %v2756_v22 = vsel %vm2748_vm15, %v2739_v13, %v1325_v46  ;;  %v2587_v35 = vpop.permute.xlu0 %2586  ;;  %3211 = vrcp.f32 %v5441_v0  ;;  %vm1379_vm7 = vmor %vm1377_vm4, %vm1378_vm5  ;;  %v1398_v62 = vand.u32 2147483648, %v5441_v0  ;;  %vm1392_vm10 = vweird.f32 %v5441_v0 }
 0x586   :  { %v2773_v47 = vsel %vm2765_vm1, %v2756_v22, %v2415_v42  ;;  %v5442_v42 = vld [vmem:[#allocation37_spill] sm:$0xff]  ;;  %v1375_v22 = vmul.f32 %v5143_v12, %v1374_v45 }
 0x587   :  { %v2790_v54 = vsel %vm2782_vm2, %v2773_v47, 0.0 }
 0x588   :  { %2806 = vst [vmem:[#allocation9 + $0x38] sm:$0xff] %v2790_v54  ;;  %v5443_v54 = vld [vmem:[#allocation64_spill] sm:$0xff] }
 0x589   :  { %v2418_v40 = vcvt.s32.f32 %v5443_v54 }
 0x58a   :  { %v2521_v41 = vpop.permute.xlu1 %2520 }
 0x58b   :  { %v2706_v39 = vsel %vm2697_vm11, %v2689_v32, %v2521_v41  ;;  %v2461_v1 = vpop.permute.xlu2 %2460  ;;  %v3212_v57 = vpop.eup %3211  ;;  %v1376_v41 = vadd.f32 %v5143_v12, %v1375_v22 }
 0x58c   :  { %v2723_v15 = vsel %vm2714_vm13, %v2706_v39, %v2585_v7  ;;  %v1360_v7 = vmul.f32 %v3208_v56, %v1359_v20  ;;  %v2691_v46 = vsel %vm2680_vm6, %v5442_v42, %v2461_v1  ;;  %v1383_v39 = vand.u32 2147483648, %v4209_v33 }
 0x58d   :  { %v2740_v16 = vsel %vm2731_vm14, %v2723_v15, %v2649_v60  ;;  %v2525_v61 = vpop.permute.xlu0 %2524  ;;  %v1388_v29 = vmul.f32 %v3212_v57, %v5441_v0  ;;  %v5444_v15 = vld [vmem:[#allocation60_spill] sm:$0xff]  ;;  %vm1393_vm9 = vweird.f32 %v3212_v57 }
 0x58e   :  { %v2757_v31 = vsel %vm2748_vm15, %v2740_v16, %v1340_v4  ;;  %v1361_v59 = vadd.f32 %v3208_v56, %v1360_v7  ;;  %3213 = vrcp.f32 %v5444_v15  ;;  %v5445_v4 = vld [vmem:[#allocation38_spill] sm:$0xff]  ;;  %vm1394_vm12 = vmor %vm1392_vm10, %vm1393_vm9  ;;  %vm1407_vm5 = vweird.f32 %v5444_v15 }
 0x58f   :  { %v2774_v14 = vsel %vm2765_vm1, %v2757_v31, %v2416_v3  ;;  %v1381_v3 = vand.u32 2147483647, %v4209_v33  ;;  %v1384_v31 = vor.u32 1.1754944e-38, %v1383_v39  ;;  %v1411_v54 = vand.u32 2147483647, %v5444_v15 }
 0x590   :  { %v2791_v2 = vsel %vm2782_vm2, %v2774_v14, 0.0  ;;  %v1365_v13 = vsel %vm1364_vm3, %v3208_v56, %v1361_v59 }
 0x591   :  { %2807 = vst [vmem:[#allocation9 + $0x40] sm:$0xff] %v2791_v2  ;;  %v1389_v2 = vsub.f32 1.0, %v1388_v29  ;;  %vm1382_vm8 = vcmp.eq.f32.partialorder %v1381_v3, 8.507059e+37  ;;  %v5452_v29 = vld [vmem:[#allocation67_spill] sm:$0xff] }
 0x592   :  { %v2459_v43 = vpop.permute.xlu1 %2458  ;;  %v2421_v3 = vcvt.s32.f32 %v5452_v29 }
 0x593   :  { %v2653_v50 = vpop.permute.xlu2 %2652  ;;  %v2690_v10 = vsel %vm2680_vm6, %v5439_v51, %v2459_v43  ;;  %v5446_v43 = vld [vmem:[#allocation65_spill] sm:$0xff]  ;;  %v1390_v28 = vmul.f32 %v3212_v57, %v1389_v2 }
 0x594   :  { %v2707_v48 = vsel %vm2697_vm11, %v2690_v10, %v2523_v6  ;;  %v1366_v6 = vand.u32 2147483647, %v4158_v30  ;;  %v3214_v10 = vpop.eup %3213 }
 0x595   :  { %v2463_v55 = vpop.permute.xlu0 %2462  ;;  %v2724_v53 = vsel %vm2714_vm13, %v2707_v48, %v2587_v35  ;;  %v2708_v35 = vsel %vm2697_vm11, %v2691_v46, %v2525_v61  ;;  %v1380_v61 = vsel %vm1379_vm7, %v5143_v12, %v1376_v41  ;;  %v1403_v12 = vmul.f32 %v3214_v10, %v5444_v15  ;;  %v5447_v48 = vld [vmem:[#allocation61_spill] sm:$0xff] }
 0x596   :  { %vm1367_vm0 = vcmp.eq.f32.partialorder %v1366_v6, 8.507059e+37  ;;  %v2692_v16 = vsel %vm2680_vm6, %v5445_v4, %v2463_v55  ;;  %v1385_v51 = vsel %vm1382_vm8, %v1384_v31, %v1380_v61  ;;  %3215 = vrcp.f32 %v5447_v48 }
 0x597   :  { %v1370_v21 = vsel %vm1367_vm0, %v1369_v26, %v1365_v13  ;;  %vm1408_vm0 = vweird.f32 %v3214_v10  ;;  %vm1412_vm7 = vcmp.eq.f32.partialorder %v1411_v54, 8.507059e+37  ;;  %vm1422_vm9 = vweird.f32 %v5447_v48 }
 0x598   :  { %vm1409_vm4 = vmor %vm1407_vm5, %vm1408_vm0 }
 0x59a   :  { %v2651_v60 = vpop.permute.xlu1 %2650 }
 0x59b   :  { %v2741_v25 = vsel %vm2731_vm14, %v2724_v53, %v2651_v60  ;;  %v2591_v17 = vpop.permute.xlu2 %2590  ;;  %v1391_v60 = vadd.f32 %v3212_v57, %v1390_v28  ;;  %v1404_v53 = vsub.f32 1.0, %v1403_v12 }
 0x59c   :  { %v2758_v36 = vsel %vm2748_vm15, %v2741_v25, %v1355_v11  ;;  %v5194_v11 = vpop.eup %3215 }
 0x59d   :  { %v2775_v24 = vsel %vm2765_vm1, %v2758_v36, %v2417_v5  ;;  %v2655_v58 = vpop.permute.xlu0 %2654  ;;  %v1396_v5 = vand.u32 2147483647, %v5441_v0  ;;  %v1395_v36 = vsel %vm1394_vm12, %v3212_v57, %v1391_v60  ;;  %v1418_v59 = vmul.f32 %v5194_v11, %v5447_v48 }
 0x59e   :  { %v2792_v38 = vsel %vm2782_vm2, %v2775_v24, 0.0  ;;  %v1405_v24 = vmul.f32 %v3214_v10, %v1404_v53  ;;  %vm1423_vm8 = vweird.f32 %v5194_v11 }
 0x59f   :  { %2808 = vst [vmem:[#allocation9 + $0x48] sm:$0xff] %v2792_v38  ;;  %vm1397_vm3 = vcmp.eq.f32.partialorder %v1396_v5, 8.507059e+37  ;;  %v5449_v38 = vld [vmem:[#allocation66_spill] sm:$0xff]  ;;  %vm1424_vm10 = vmor %vm1422_vm9, %vm1423_vm8  ;;  %v5455_v5 = vld [vmem:[#allocation57_spill] sm:$0xff] }
 0x5a0   :  { %v2420_v6 = vcvt.s32.f32 %v5449_v38  ;;  %v1406_v22 = vadd.f32 %v3214_v10, %v1405_v24 }
 0x5a2   :  { %v2589_v34 = vpop.permute.xlu1 %2588 }
 0x5a3   :  { %v2725_v47 = vsel %vm2714_vm13, %v2708_v35, %v2589_v34  ;;  %v2529_v49 = vpop.permute.xlu2 %2528  ;;  %v1419_v35 = vsub.f32 1.0, %v1418_v59 }
 0x5a4   :  { %v2742_v30 = vsel %vm2731_vm14, %v2725_v47, %v2653_v50  ;;  %v2419_v50 = vcvt.s32.f32 %v5446_v43  ;;  %v1413_v47 = vand.u32 2147483648, %v5444_v15 }
 0x5a5   :  { %v2759_v32 = vsel %vm2748_vm15, %v2742_v30, %v1370_v21  ;;  %v2593_v19 = vpop.permute.xlu0 %2592  ;;  %v1410_v30 = vsel %vm1409_vm4, %v3214_v10, %v1406_v22  ;;  %v1420_v57 = vmul.f32 %v5194_v11, %v1419_v35 }
 0x5a6   :  { %v2776_v27 = vsel %vm2765_vm1, %v2759_v32, %v2418_v40  ;;  %v5451_v40 = vld [vmem:[#allocation48_spill] sm:$0xff] }
 0x5a7   :  { %v2793_v1 = vsel %vm2782_vm2, %v2776_v27, 0.0  ;;  %v1414_v27 = vor.u32 1.1754944e-38, %v1413_v47 }
 0x5a8   :  { %2809 = vst [vmem:[#allocation9 + $0x50] sm:$0xff] %v2793_v1 }
 0x5a9   :  { %v1415_v4 = vsel %vm1412_vm7, %v1414_v27, %v1410_v30 }
 0x5aa   :  { %v2527_v56 = vpop.permute.xlu1 %2526 }
 0x5ab   :  { %v2709_v14 = vsel %vm2697_vm11, %v2692_v16, %v2527_v56  ;;  %v2467_v52 = vpop.permute.xlu2 %2466  ;;  %v1421_v56 = vadd.f32 %v5194_v11, %v1420_v57 }
 0x5ac   :  { %v2726_v9 = vsel %vm2714_vm13, %v2709_v14, %v2591_v17  ;;  %v2694_v21 = vsel %vm2680_vm6, %v5451_v40, %v2467_v52  ;;  %v1428_v14 = vand.u32 2147483648, %v5447_v48 }
 0x5ad   :  { %v2743_v33 = vsel %vm2731_vm14, %v2726_v9, %v2655_v58  ;;  %v2531_v20 = vpop.permute.xlu0 %2530  ;;  %v1399_v58 = vor.u32 1.1754944e-38, %v1398_v62  ;;  %v1426_v9 = vand.u32 2147483647, %v5447_v48  ;;  %v1425_v43 = vsel %vm1424_vm10, %v5194_v11, %v1421_v56 }
 0x5ae   :  { %v2760_v8 = vsel %vm2748_vm15, %v2743_v33, %v1385_v51  ;;  %v2711_v32 = vsel %vm2697_vm11, %v2694_v21, %v2531_v20  ;;  %v1429_v10 = vor.u32 1.1754944e-38, %v1428_v14 }
 0x5af   :  { %v2777_v55 = vsel %vm2765_vm1, %v2760_v8, %v2419_v50  ;;  %v1400_v42 = vsel %vm1397_vm3, %v1399_v58, %v1395_v36  ;;  %v5453_v50 = vld [vmem:[#allocation50_spill] sm:$0xff]  ;;  %vm1427_vm12 = vcmp.eq.f32.partialorder %v1426_v9, 8.507059e+37 }
 0x5b0   :  { %v2794_v63 = vsel %vm2782_vm2, %v2777_v55, 0.0  ;;  %v1430_v48 = vsel %vm1427_vm12, %v1429_v10, %v1425_v43 }
 0x5b1   :  { %2810 = vst [vmem:[#allocation9 + $0x58] sm:$0xff] %v2794_v63  ;;  %v5454_v63 = vld [vmem:[#allocation68_spill] sm:$0xff] }
 0x5b2   :  { %v2465_v18 = vpop.permute.xlu1 %2464  ;;  %v2422_v12 = vcvt.s32.f32 %v5454_v63 }
 0x5b3   :  { %v5187_v7 = vpop.permute.xlu2 %2596  ;;  %v2693_v37 = vsel %vm2680_vm6, %v5448_v23, %v2465_v18 }
 0x5b4   :  { %v2710_v25 = vsel %vm2697_vm11, %v2693_v37, %v2529_v49  ;;  %v5450_v49 = vld [vmem:[#allocation62_spill] sm:$0xff] }
 0x5b5   :  { %v2469_v17 = vpop.permute.xlu0 %2468  ;;  %v2727_v45 = vsel %vm2714_vm13, %v2710_v25, %v2593_v19  ;;  %3217 = vrcp.f32 %v5450_v49  ;;  %vm1437_vm0 = vweird.f32 %v5450_v49 }
 0x5b6   :  { %v2695_v51 = vsel %vm2680_vm6, %v5453_v50, %v2469_v17  ;;  %v1441_v17 = vand.u32 2147483647, %v5450_v49 }
 0x5ba   :  { %v2657_v44 = vpop.permute.xlu1 %2656 }
 0x5bb   :  { %v2744_v0 = vsel %vm2731_vm14, %v2727_v45, %v2657_v44  ;;  %v5202_v46 = vpop.permute.xlu2 %2534  ;;  %v3218_v16 = vpop.eup %3217  ;;  %v5456_v45 = vld [vmem:[#allocation69_spill] sm:$0xff] }
 0x5bc   :  { %v2761_v13 = vsel %vm2748_vm15, %v2744_v0, %v1400_v42  ;;  %v1433_v2 = vmul.f32 %v3218_v16, %v5450_v49  ;;  %vm1438_vm3 = vweird.f32 %v3218_v16  ;;  %v2423_v38 = vcvt.s32.f32 %v5456_v45 }
 0x5bd   :  { %v2778_v26 = vsel %vm2765_vm1, %v2761_v13, %v2420_v6  ;;  %v2599_v19 = vpop.permute.xlu0 %2598  ;;  %vm1439_vm5 = vmor %vm1437_vm0, %vm1438_vm3 }
 0x5be   :  { %v2795_v34 = vsel %vm2782_vm2, %v2778_v26, 0.0  ;;  %v1434_v20 = vsub.f32 1.0, %v1433_v2 }
 0x5bf   :  { %2811 = vst [vmem:[#allocation9 + $0x60] sm:$0xff] %v2795_v34 }
 0x5c0   :  { %v1435_v60 = vmul.f32 %v3218_v16, %v1434_v20 }
 0x5c2   :  { %v2595_v41 = vpop.permute.xlu1 %2594  ;;  %v1436_v25 = vadd.f32 %v3218_v16, %v1435_v60 }
 0x5c3   :  { %v2728_v39 = vsel %vm2714_vm13, %v2711_v32, %v2595_v41  ;;  %v2659_v1 = vpop.permute.xlu2 %2658 }
 0x5c4   :  { %v2745_v15 = vsel %vm2731_vm14, %v2728_v39, %v2659_v1  ;;  %v1440_v24 = vsel %vm1439_vm5, %v3218_v16, %v1436_v25 }
 0x5c5   :  { %v2762_v61 = vsel %vm2748_vm15, %v2745_v15, %v1415_v4  ;;  %v2661_v55 = vpop.permute.xlu0 %2660 }
 0x5c6   :  { %v2779_v31 = vsel %vm2765_vm1, %v2762_v61, %v2421_v3 }
 0x5c7   :  { %v2796_v52 = vsel %vm2782_vm2, %v2779_v31, 0.0 }
 0x5c8   :  { %2812 = vst [vmem:[#allocation9 + $0x68] sm:$0xff] %v2796_v52 }
 0x5ca   :  { %v2533_v33 = vpop.permute.xlu1 %2532 }
 0x5cb   :  { %v2712_v8 = vsel %vm2697_vm11, %v2695_v51, %v2533_v33 }
 0x5cc   :  { %v2729_v28 = vsel %vm2714_vm13, %v2712_v8, %v5187_v7  ;;  %v1443_v7 = vand.u32 2147483648, %v5450_v49 }
 0x5cd   :  { %v2746_v18 = vsel %vm2731_vm14, %v2729_v28, %v2661_v55 }
 0x5ce   :  { %v2763_v23 = vsel %vm2748_vm15, %v2746_v18, %v1430_v48  ;;  %v1444_v58 = vor.u32 1.1754944e-38, %v1443_v7 }
 0x5cf   :  { %v2780_v37 = vsel %vm2765_vm1, %v2763_v23, %v2422_v12 }
 0x5d0   :  { %v2797_v53 = vsel %vm2782_vm2, %v2780_v37, 0.0 }
 0x5d1   :  { %2813 = vst [vmem:[#allocation9 + $0x70] sm:$0xff] %v2797_v53 }
 0x5d2   :  { %v2471_v62 = vpop.permute.xlu1 %2470 }
 0x5d3   :  { %v2696_v11 = vsel %vm2680_vm6, %v5455_v5, %v2471_v62  ;;  %vm1442_vm6 = vcmp.eq.f32.partialorder %v1441_v17, 8.507059e+37 }
 0x5d4   :  { %v2713_v36 = vsel %vm2697_vm11, %v2696_v11, %v5202_v46  ;;  %v1445_v6 = vsel %vm1442_vm6, %v1444_v58, %v1440_v24 }
 0x5d5   :  { %v2730_v44 = vsel %vm2714_vm13, %v2713_v36, %v2599_v19 }
 0x5da   :  { %v2663_v59 = vpop.permute.xlu1 %2662 }
 0x5db   :  { %v2747_v42 = vsel %vm2731_vm14, %v2730_v44, %v2663_v59 }
 0x5dc   :  { %v2764_v0 = vsel %vm2748_vm15, %v2747_v42, %v1445_v6 }
 0x5dd   :  { %v2781_v46 = vsel %vm2765_vm1, %v2764_v0, %v2423_v38 }
 0x5de   :  { %v2798_v13 = vsel %vm2782_vm2, %v2781_v46, 0.0 }
 0x5df   :  { %2814 = vst [vmem:[#allocation9 + $0x78] sm:$0xff] %v2798_v13 }
 0x5e0   :  { %2827 = dma.vmem_to_hbm [thread:$0]  %s2820_s22, 2048, %s2822_s25, [#allocation5], %s3332_s26, %s3332_s26, %s3333_s8  }
 0x5e1   :  { %3319 = dma.done.wait [#allocation5], 2048  }
 0x5e2   :  { %3320 = vsyncadd [#allocation5], 4294965248 }
 0x5e3   :  { %2832 = vsyncpa [#allocation4], 1 }
 0x5e4   :  { %2833 = vsyncpa [#allocation7], 1 }
 0x5e5   :  { %2834 = vsyncpa [#allocation5], 1 }

</bundles_post_ra>
